<compile_context>
chip_gen: v7x
topology: tpu7x:2x2x1
jax: 0.10.0
libtpu: 0.0.40
codegen_flags: <defaults>
</compile_context>

<pallas_src>
import jax
import jax.numpy as jnp
from jax.experimental import pallas as pl
from jax.experimental.pallas import tpu as pltpu

BN_EPS = 1e-5
N_OUT = 11 + 168 + 7          # 186 = torch.cat([fc1, fc2, fc3], 1)
N_PAD = 256                   # lane-dense padded output width (multiple of 128)


def _head_kernel(feat_ref, w0_ref, b0_ref, wcat_ref, bcat_ref, out_ref, pooled_ref):
    # feat_ref: (S, TB, C) bf16;  pooled_ref: (TB, 2C) bf16 VMEM scratch.
    S, TB, C = feat_ref.shape

    # ---- AdaptiveConcatPool2d, per 8-row batch strip so accumulators stay in vregs ----
    strip = 8 if TB >= 8 else TB
    n_strips = TB // strip
    for r in range(n_strips):
        r0 = r * strip
        first = feat_ref[0, r0:r0 + strip, :]                 # (strip, C) bf16, full tile
        mx = first                                            # max in bf16 (exact)
        sm = first.astype(jnp.float32)                        # sum accumulated in f32
        for s in range(1, S):
            sl = feat_ref[s, r0:r0 + strip, :]
            mx = jnp.maximum(mx, sl)
            sm = sm + sl.astype(jnp.float32)
        pooled_ref[r0:r0 + strip, :C] = mx                    # [max | sum] packed slab
        pooled_ref[r0:r0 + strip, C:] = sm.astype(jnp.bfloat16)

    # ---- fc: single (TB,2C)@(2C,512) dot; eval-BN and 1/S already folded into w0 ----
    h = (jnp.dot(pooled_ref[...], w0_ref[...], preferred_element_type=jnp.float32)
         + b0_ref[...])
    h = jnp.maximum(h, 0.0)                                   # Dropout(eval)=id, ReLU

    # ---- fc1/fc2/fc3 fused: wcat = concat([W1, W2, W3], 1), zero-padded to 256 lanes ----
    out_ref[...] = (jnp.dot(h.astype(jnp.bfloat16), wcat_ref[...],
                            preferred_element_type=jnp.float32)
                    + bcat_ref[...])                          # (TB, 256), unmasked store


def _ceil_to(x, m):
    return -(-x // m) * m


def _pick_batch_tile(B):
    """Pick (TB, B_pad): TB a multiple of 8, <= 64, >= 2 grid steps once B >= 16."""
    b8 = _ceil_to(B, 8)
    if b8 <= 8:
        tb = b8
    elif b8 <= 128:
        tb = max(8, (b8 // 2) // 8 * 8)      # two grid steps -> both v7x TensorCores busy
    else:
        tb = 64
    return tb, _ceil_to(b8, tb)


def _vmem_limit_bytes():
    """Generation-aware scoped-VMEM limit (safe 32 MiB fallback)."""
    try:
        cap = pltpu.get_tpu_info().vmem_capacity_bytes
    except Exception:
        return 32 << 20
    if cap >= (128 << 20):                    # v5e / v6e: 128 MiB physical
        return 64 << 20
    return min(48 << 20, max(32 << 20, cap - (16 << 20)))   # v7x: 64 MiB physical


def cnn_head_forward(feat, params):
    """feat: (S, B, C) bfloat16 backbone feature map; returns (B, 186) float32 logits."""
    feat = feat.astype(jnp.bfloat16)
    S, B, C = feat.shape
    w0, b0, wcat, bcat = params

    TB, B_pad = _pick_batch_tile(B)
    if B_pad != B:                            # pad batch instead of hard-failing
        feat = jnp.pad(feat, ((0, 0), (0, B_pad - B), (0, 0)))
    grid = (B_pad // TB,)

    out_padded = pl.pallas_call(
        _head_kernel,
        out_shape=jax.ShapeDtypeStruct((B_pad, N_PAD), jnp.float32),
        grid=grid,
        in_specs=[
            pl.BlockSpec((S, TB, C), lambda i: (0, i, 0)),
            # Constant block index -> weights stay VMEM-resident across batch tiles.
            pl.BlockSpec(w0.shape, lambda i: (0, 0)),
            pl.BlockSpec(b0.shape, lambda i: (0, 0)),
            pl.BlockSpec(wcat.shape, lambda i: (0, 0)),
            pl.BlockSpec(bcat.shape, lambda i: (0, 0)),
        ],
        out_specs=pl.BlockSpec((TB, N_PAD), lambda i: (i, 0)),
        scratch_shapes=[pltpu.VMEM((TB, 2 * C), jnp.bfloat16)],   # packed [max|sum] slab
        compiler_params=pltpu.CompilerParams(
            dimension_semantics=("parallel",),    # megacore-shardable batch axis
            vmem_limit_bytes=_vmem_limit_bytes(),
        ),
    )(feat, w0, b0, wcat, bcat)

    return out_padded[:B, :N_OUT]             # drop batch/lane padding -> (B, 186)


def init_params(key, feat_channels, spatial_size):
    """Deterministic params matching CNNHead(out_shape=2*feat_channels), pre-folded.

    Folds eval-mode BatchNorm1d into the fc Linear, folds 1/S of the avg pool into the
    avg half, keeps the [max | avg] halves concatenated (single dot), pads the fused
    fc1/fc2/fc3 weight to 256 output lanes, and stores matmul weights in bf16.
    """
    in_features = 2 * feat_channels           # 'concat' pool doubles channels
    ks = jax.random.split(key, 7)

    w0 = jax.random.normal(ks[0], (in_features, 512), jnp.float32) * 0.02
    b0 = jnp.zeros((512,), jnp.float32)
    gamma = jnp.ones((512,), jnp.float32)     # BatchNorm1d affine weight
    beta = jnp.zeros((512,), jnp.float32)     # BatchNorm1d affine bias
    rmean = jnp.zeros((512,), jnp.float32)    # running_mean
    rvar = jnp.ones((512,), jnp.float32)      # running_var

    # Eval BN is affine:  BN(x@W + b) = x @ (W*scale) + ((b - rmean)*scale + beta)
    scale = gamma * jax.lax.rsqrt(rvar + BN_EPS)
    w0_f = w0 * scale[None, :]
    b0_f = (b0 - rmean) * scale + beta

    w0_max = w0_f[:feat_channels]                                # acts on max-pool half
    w0_avg = w0_f[feat_channels:] * (1.0 / float(spatial_size))  # 1/S folded in
    w0_packed = jnp.concatenate([w0_max, w0_avg], axis=0)        # (2C, 512)

    w1 = jax.random.normal(ks[1], (512, 11), jnp.float32) * 0.04
    w2 = jax.random.normal(ks[2], (512, 168), jnp.float32) * 0.04
    w3 = jax.random.normal(ks[3], (512, 7), jnp.float32) * 0.04
    b1 = jax.random.normal(ks[4], (11,), jnp.float32) * 0.01
    b2 = jax.random.normal(ks[5], (168,), jnp.float32) * 0.01
    b3 = jax.random.normal(ks[6], (7,), jnp.float32) * 0.01
    wcat = jnp.concatenate([w1, w2, w3], axis=1)                 # (512, 186)
    bcat = jnp.concatenate([b1, b2, b3])                         # (186,)
    wcat_pad = jnp.zeros((512, N_PAD), jnp.float32).at[:, :N_OUT].set(wcat)
    bcat_pad = jnp.zeros((N_PAD,), jnp.float32).at[:N_OUT].set(bcat)

    return (w0_packed.astype(jnp.bfloat16),    # (4096, 512) bf16
            b0_f[None, :],                     # (1, 512) f32
            wcat_pad.astype(jnp.bfloat16),     # (512, 256) bf16
            bcat_pad[None, :])                 # (1, 256) f32


def backbone_stub(x, key, feat_channels=2048):
    """Plain-JAX stand-in for the se_resnext50_32x4d encoder body (glue, not the kernel).

    x: (B, 1, H, W) NCHW. Mirrors `x.repeat(1, 3, 1, 1)` then produces an
    (S, B, feat_channels) bf16 feature map for the Pallas head kernel.
    """
    B, _, H, W = x.shape
    x3 = jnp.tile(x, (1, 3, 1, 1))                           # x.repeat(1, 3, 1, 1)
    hs, ws = H // 4, W // 4
    xd = x3.reshape(B, 3, hs, 4, ws, 4).mean(axis=(3, 5))    # (B, 3, hs, ws)
    proj = jax.random.normal(key, (3, feat_channels), jnp.float32) * 0.1
    feat = jnp.einsum('bchw,cf->hwbf', xd, proj)             # (hs, ws, B, C)
    return feat.reshape(hs * ws, B, feat_channels).astype(jnp.bfloat16)


if __name__ == "__main__":
    key = jax.random.PRNGKey(0)
    k_in, k_bb, k_par = jax.random.split(key, 3)

    B, H, W = 2, 16, 16
    FEAT_C = 2048                                            # se_resnext50_32x4d out_shape

    x = jax.random.normal(k_in, (B, 1, H, W), jnp.float32)   # NCHW, single-channel input
    feat = backbone_stub(x, k_bb, FEAT_C)                    # (16, 2, 2048) bf16
    S = feat.shape[0]
    params = init_params(k_par, FEAT_C, S)

    out = cnn_head_forward(feat, params)                     # (B, 186) = 11 + 168 + 7
    out = jax.block_until_ready(out)
    assert out.shape == (B, 186) and out.dtype == jnp.float32
    assert bool(jnp.all(jnp.isfinite(out)))
    print("KERNEL_OK")
</pallas_src>

<mosaic_0001>
module attributes {stable_mosaic.version = 11 : i64} {
  func.func @_head_kernel(%arg0: i32, %arg1: memref<16x8x2048xbf16, #tpu.memory_space<vmem>>, %arg2: memref<4096x512xbf16, #tpu.memory_space<vmem>>, %arg3: memref<1x512xf32, #tpu.memory_space<vmem>>, %arg4: memref<512x256xbf16, #tpu.memory_space<vmem>>, %arg5: memref<1x256xf32, #tpu.memory_space<vmem>>, %arg6: memref<8x256xf32, #tpu.memory_space<vmem>>, %arg7: memref<8x4096xbf16, #tpu.memory_space<vmem>>) attributes {dimension_semantics = [#tpu.dimension_semantics<parallel>], iteration_bounds = array<i64: 1>, scalar_prefetch = 0 : i64, scratch_operands = 1 : i64, tpu.core_type = #tpu.core_type<tc>, window_params = [{transform_indices = @transform_0, window_bounds = array<i64: 16, 8, 2048>}, {pipeline_mode = #tpu.pipeline_mode<synchronous>, transform_indices = @transform_1, window_bounds = array<i64: 4096, 512>}, {pipeline_mode = #tpu.pipeline_mode<synchronous>, transform_indices = @transform_2, window_bounds = array<i64: 1, 512>}, {pipeline_mode = #tpu.pipeline_mode<synchronous>, transform_indices = @transform_3, window_bounds = array<i64: 512, 256>}, {pipeline_mode = #tpu.pipeline_mode<synchronous>, transform_indices = @transform_4, window_bounds = array<i64: 1, 256>}, {transform_indices = @transform_5, window_bounds = array<i64: 8, 256>}]} {
    %c0 = arith.constant 0 : index
    %c0_0 = arith.constant 0 : index
    %c0_1 = arith.constant 0 : index
    %0 = vector.load %arg1[%c0, %c0_0, %c0_1] : memref<16x8x2048xbf16, #tpu.memory_space<vmem>>, vector<1x8x2048xbf16>
    %1 = vector.shape_cast %0 : vector<1x8x2048xbf16> to vector<8x2048xbf16>
    %2 = arith.extf %1 : vector<8x2048xbf16> to vector<8x2048xf32>
    %c1 = arith.constant 1 : index
    %c0_2 = arith.constant 0 : index
    %c0_3 = arith.constant 0 : index
    %3 = vector.load %arg1[%c1, %c0_2, %c0_3] : memref<16x8x2048xbf16, #tpu.memory_space<vmem>>, vector<1x8x2048xbf16>
    %4 = vector.shape_cast %3 : vector<1x8x2048xbf16> to vector<8x2048xbf16>
    %5 = arith.maximumf %1, %4 : vector<8x2048xbf16>
    %6 = arith.extf %4 : vector<8x2048xbf16> to vector<8x2048xf32>
    %7 = arith.addf %2, %6 : vector<8x2048xf32>
    %c2 = arith.constant 2 : index
    %c0_4 = arith.constant 0 : index
    %c0_5 = arith.constant 0 : index
    %8 = vector.load %arg1[%c2, %c0_4, %c0_5] : memref<16x8x2048xbf16, #tpu.memory_space<vmem>>, vector<1x8x2048xbf16>
    %9 = vector.shape_cast %8 : vector<1x8x2048xbf16> to vector<8x2048xbf16>
    %10 = arith.maximumf %5, %9 : vector<8x2048xbf16>
    %11 = arith.extf %9 : vector<8x2048xbf16> to vector<8x2048xf32>
    %12 = arith.addf %7, %11 : vector<8x2048xf32>
    %c3 = arith.constant 3 : index
    %c0_6 = arith.constant 0 : index
    %c0_7 = arith.constant 0 : index
    %13 = vector.load %arg1[%c3, %c0_6, %c0_7] : memref<16x8x2048xbf16, #tpu.memory_space<vmem>>, vector<1x8x2048xbf16>
    %14 = vector.shape_cast %13 : vector<1x8x2048xbf16> to vector<8x2048xbf16>
    %15 = arith.maximumf %10, %14 : vector<8x2048xbf16>
    %16 = arith.extf %14 : vector<8x2048xbf16> to vector<8x2048xf32>
    %17 = arith.addf %12, %16 : vector<8x2048xf32>
    %c4 = arith.constant 4 : index
    %c0_8 = arith.constant 0 : index
    %c0_9 = arith.constant 0 : index
    %18 = vector.load %arg1[%c4, %c0_8, %c0_9] : memref<16x8x2048xbf16, #tpu.memory_space<vmem>>, vector<1x8x2048xbf16>
    %19 = vector.shape_cast %18 : vector<1x8x2048xbf16> to vector<8x2048xbf16>
    %20 = arith.maximumf %15, %19 : vector<8x2048xbf16>
    %21 = arith.extf %19 : vector<8x2048xbf16> to vector<8x2048xf32>
    %22 = arith.addf %17, %21 : vector<8x2048xf32>
    %c5 = arith.constant 5 : index
    %c0_10 = arith.constant 0 : index
    %c0_11 = arith.constant 0 : index
    %23 = vector.load %arg1[%c5, %c0_10, %c0_11] : memref<16x8x2048xbf16, #tpu.memory_space<vmem>>, vector<1x8x2048xbf16>
    %24 = vector.shape_cast %23 : vector<1x8x2048xbf16> to vector<8x2048xbf16>
    %25 = arith.maximumf %20, %24 : vector<8x2048xbf16>
    %26 = arith.extf %24 : vector<8x2048xbf16> to vector<8x2048xf32>
    %27 = arith.addf %22, %26 : vector<8x2048xf32>
    %c6 = arith.constant 6 : index
    %c0_12 = arith.constant 0 : index
    %c0_13 = arith.constant 0 : index
    %28 = vector.load %arg1[%c6, %c0_12, %c0_13] : memref<16x8x2048xbf16, #tpu.memory_space<vmem>>, vector<1x8x2048xbf16>
    %29 = vector.shape_cast %28 : vector<1x8x2048xbf16> to vector<8x2048xbf16>
    %30 = arith.maximumf %25, %29 : vector<8x2048xbf16>
    %31 = arith.extf %29 : vector<8x2048xbf16> to vector<8x2048xf32>
    %32 = arith.addf %27, %31 : vector<8x2048xf32>
    %c7 = arith.constant 7 : index
    %c0_14 = arith.constant 0 : index
    %c0_15 = arith.constant 0 : index
    %33 = vector.load %arg1[%c7, %c0_14, %c0_15] : memref<16x8x2048xbf16, #tpu.memory_space<vmem>>, vector<1x8x2048xbf16>
    %34 = vector.shape_cast %33 : vector<1x8x2048xbf16> to vector<8x2048xbf16>
    %35 = arith.maximumf %30, %34 : vector<8x2048xbf16>
    %36 = arith.extf %34 : vector<8x2048xbf16> to vector<8x2048xf32>
    %37 = arith.addf %32, %36 : vector<8x2048xf32>
    %c8 = arith.constant 8 : index
    %c0_16 = arith.constant 0 : index
    %c0_17 = arith.constant 0 : index
    %38 = vector.load %arg1[%c8, %c0_16, %c0_17] : memref<16x8x2048xbf16, #tpu.memory_space<vmem>>, vector<1x8x2048xbf16>
    %39 = vector.shape_cast %38 : vector<1x8x2048xbf16> to vector<8x2048xbf16>
    %40 = arith.maximumf %35, %39 : vector<8x2048xbf16>
    %41 = arith.extf %39 : vector<8x2048xbf16> to vector<8x2048xf32>
    %42 = arith.addf %37, %41 : vector<8x2048xf32>
    %c9 = arith.constant 9 : index
    %c0_18 = arith.constant 0 : index
    %c0_19 = arith.constant 0 : index
    %43 = vector.load %arg1[%c9, %c0_18, %c0_19] : memref<16x8x2048xbf16, #tpu.memory_space<vmem>>, vector<1x8x2048xbf16>
    %44 = vector.shape_cast %43 : vector<1x8x2048xbf16> to vector<8x2048xbf16>
    %45 = arith.maximumf %40, %44 : vector<8x2048xbf16>
    %46 = arith.extf %44 : vector<8x2048xbf16> to vector<8x2048xf32>
    %47 = arith.addf %42, %46 : vector<8x2048xf32>
    %c10 = arith.constant 10 : index
    %c0_20 = arith.constant 0 : index
    %c0_21 = arith.constant 0 : index
    %48 = vector.load %arg1[%c10, %c0_20, %c0_21] : memref<16x8x2048xbf16, #tpu.memory_space<vmem>>, vector<1x8x2048xbf16>
    %49 = vector.shape_cast %48 : vector<1x8x2048xbf16> to vector<8x2048xbf16>
    %50 = arith.maximumf %45, %49 : vector<8x2048xbf16>
    %51 = arith.extf %49 : vector<8x2048xbf16> to vector<8x2048xf32>
    %52 = arith.addf %47, %51 : vector<8x2048xf32>
    %c11 = arith.constant 11 : index
    %c0_22 = arith.constant 0 : index
    %c0_23 = arith.constant 0 : index
    %53 = vector.load %arg1[%c11, %c0_22, %c0_23] : memref<16x8x2048xbf16, #tpu.memory_space<vmem>>, vector<1x8x2048xbf16>
    %54 = vector.shape_cast %53 : vector<1x8x2048xbf16> to vector<8x2048xbf16>
    %55 = arith.maximumf %50, %54 : vector<8x2048xbf16>
    %56 = arith.extf %54 : vector<8x2048xbf16> to vector<8x2048xf32>
    %57 = arith.addf %52, %56 : vector<8x2048xf32>
    %c12 = arith.constant 12 : index
    %c0_24 = arith.constant 0 : index
    %c0_25 = arith.constant 0 : index
    %58 = vector.load %arg1[%c12, %c0_24, %c0_25] : memref<16x8x2048xbf16, #tpu.memory_space<vmem>>, vector<1x8x2048xbf16>
    %59 = vector.shape_cast %58 : vector<1x8x2048xbf16> to vector<8x2048xbf16>
    %60 = arith.maximumf %55, %59 : vector<8x2048xbf16>
    %61 = arith.extf %59 : vector<8x2048xbf16> to vector<8x2048xf32>
    %62 = arith.addf %57, %61 : vector<8x2048xf32>
    %c13 = arith.constant 13 : index
    %c0_26 = arith.constant 0 : index
    %c0_27 = arith.constant 0 : index
    %63 = vector.load %arg1[%c13, %c0_26, %c0_27] : memref<16x8x2048xbf16, #tpu.memory_space<vmem>>, vector<1x8x2048xbf16>
    %64 = vector.shape_cast %63 : vector<1x8x2048xbf16> to vector<8x2048xbf16>
    %65 = arith.maximumf %60, %64 : vector<8x2048xbf16>
    %66 = arith.extf %64 : vector<8x2048xbf16> to vector<8x2048xf32>
    %67 = arith.addf %62, %66 : vector<8x2048xf32>
    %c14 = arith.constant 14 : index
    %c0_28 = arith.constant 0 : index
    %c0_29 = arith.constant 0 : index
    %68 = vector.load %arg1[%c14, %c0_28, %c0_29] : memref<16x8x2048xbf16, #tpu.memory_space<vmem>>, vector<1x8x2048xbf16>
    %69 = vector.shape_cast %68 : vector<1x8x2048xbf16> to vector<8x2048xbf16>
    %70 = arith.maximumf %65, %69 : vector<8x2048xbf16>
    %71 = arith.extf %69 : vector<8x2048xbf16> to vector<8x2048xf32>
    %72 = arith.addf %67, %71 : vector<8x2048xf32>
    %c15 = arith.constant 15 : index
    %c0_30 = arith.constant 0 : index
    %c0_31 = arith.constant 0 : index
    %73 = vector.load %arg1[%c15, %c0_30, %c0_31] : memref<16x8x2048xbf16, #tpu.memory_space<vmem>>, vector<1x8x2048xbf16>
    %74 = vector.shape_cast %73 : vector<1x8x2048xbf16> to vector<8x2048xbf16>
    %75 = arith.maximumf %70, %74 : vector<8x2048xbf16>
    %76 = arith.extf %74 : vector<8x2048xbf16> to vector<8x2048xf32>
    %77 = arith.addf %72, %76 : vector<8x2048xf32>
    %c0_32 = arith.constant 0 : index
    %c0_33 = arith.constant 0 : index
    %78 = vector.load %arg7[%c0_32, %c0_33] : memref<8x4096xbf16, #tpu.memory_space<vmem>>, vector<8x2048xbf16>
    tpu.vector_store %arg7[%c0_32, %c0_33], %75 {strides = array<i32>} : memref<8x4096xbf16, #tpu.memory_space<vmem>>, vector<8x2048xbf16>,
    %79 = arith.truncf %77 : vector<8x2048xf32> to vector<8x2048xbf16>
    %c0_34 = arith.constant 0 : index
    %c2048 = arith.constant 2048 : index
    %80 = vector.load %arg7[%c0_34, %c2048] : memref<8x4096xbf16, #tpu.memory_space<vmem>>, vector<8x2048xbf16>
    tpu.vector_store %arg7[%c0_34, %c2048], %79 {strides = array<i32>} : memref<8x4096xbf16, #tpu.memory_space<vmem>>, vector<8x2048xbf16>,
    %c0_35 = arith.constant 0 : index
    %c0_36 = arith.constant 0 : index
    %81 = vector.load %arg7[%c0_35, %c0_36] : memref<8x4096xbf16, #tpu.memory_space<vmem>>, vector<8x4096xbf16>
    %c0_37 = arith.constant 0 : index
    %c0_38 = arith.constant 0 : index
    %82 = vector.load %arg2[%c0_37, %c0_38] : memref<4096x512xbf16, #tpu.memory_space<vmem>>, vector<4096x512xbf16>
    %cst = arith.constant dense<0.000000e+00> : vector<8x512xf32>
    %83 = tpu.matmul %81, %82, %cst {dimension_numbers = #tpu.dot_dimension_numbers<[1], [0], [0], [1], [0, 0, 1, 1], [], []>} : vector<8x4096xbf16>, vector<4096x512xbf16>, vector<8x512xf32> -> vector<8x512xf32>
    %c0_39 = arith.constant 0 : index
    %c0_40 = arith.constant 0 : index
    %84 = vector.load %arg3[%c0_39, %c0_40] : memref<1x512xf32, #tpu.memory_space<vmem>>, vector<1x512xf32>
    %85 = vector.broadcast %84 : vector<1x512xf32> to vector<8x512xf32>
    %86 = arith.addf %83, %85 : vector<8x512xf32>
    %cst_41 = arith.constant 0.000000e+00 : f32
    %87 = vector.broadcast %cst_41 : f32 to vector<8x512xf32>
    %88 = arith.maximumf %86, %87 : vector<8x512xf32>
    %89 = arith.truncf %88 : vector<8x512xf32> to vector<8x512xbf16>
    %c0_42 = arith.constant 0 : index
    %c0_43 = arith.constant 0 : index
    %90 = vector.load %arg4[%c0_42, %c0_43] : memref<512x256xbf16, #tpu.memory_space<vmem>>, vector<512x256xbf16>
    %cst_44 = arith.constant dense<0.000000e+00> : vector<8x256xf32>
    %91 = tpu.matmul %89, %90, %cst_44 {dimension_numbers = #tpu.dot_dimension_numbers<[1], [0], [0], [1], [0, 0, 1, 1], [], []>} : vector<8x512xbf16>, vector<512x256xbf16>, vector<8x256xf32> -> vector<8x256xf32>
    %c0_45 = arith.constant 0 : index
    %c0_46 = arith.constant 0 : index
    %92 = vector.load %arg5[%c0_45, %c0_46] : memref<1x256xf32, #tpu.memory_space<vmem>>, vector<1x256xf32>
    %93 = vector.broadcast %92 : vector<1x256xf32> to vector<8x256xf32>
    %94 = arith.addf %91, %93 : vector<8x256xf32>
    %c0_47 = arith.constant 0 : index
    %c0_48 = arith.constant 0 : index
    %95 = vector.load %arg6[%c0_47, %c0_48] : memref<8x256xf32, #tpu.memory_space<vmem>>, vector<8x256xf32>
    tpu.vector_store %arg6[%c0_47, %c0_48], %94 {strides = array<i32>} : memref<8x256xf32, #tpu.memory_space<vmem>>, vector<8x256xf32>,
    return
  }
  func.func @transform_0(%arg0: i32) -> (i32, i32, i32) {
    %c0_i32 = arith.constant 0 : i32
    %c0_i32_0 = arith.constant 0 : i32
    %c0_i32_1 = arith.constant 0 : i32
    return %c0_i32, %arg0, %c0_i32_0 : i32, i32, i32
  }
  func.func @transform_1(%arg0: i32) -> (i32, i32) {
    %c0_i32 = arith.constant 0 : i32
    %c0_i32_0 = arith.constant 0 : i32
    %c0_i32_1 = arith.constant 0 : i32
    return %c0_i32, %c0_i32_0 : i32, i32
  }
  func.func @transform_2(%arg0: i32) -> (i32, i32) {
    %c0_i32 = arith.constant 0 : i32
    %c0_i32_0 = arith.constant 0 : i32
    %c0_i32_1 = arith.constant 0 : i32
    return %c0_i32, %c0_i32_0 : i32, i32
  }
  func.func @transform_3(%arg0: i32) -> (i32, i32) {
    %c0_i32 = arith.constant 0 : i32
    %c0_i32_0 = arith.constant 0 : i32
    %c0_i32_1 = arith.constant 0 : i32
    return %c0_i32, %c0_i32_0 : i32, i32
  }
  func.func @transform_4(%arg0: i32) -> (i32, i32) {
    %c0_i32 = arith.constant 0 : i32
    %c0_i32_0 = arith.constant 0 : i32
    %c0_i32_1 = arith.constant 0 : i32
    return %c0_i32, %c0_i32_0 : i32, i32
  }
  func.func @transform_5(%arg0: i32) -> (i32, i32) {
    %c0_i32 = arith.constant 0 : i32
    %c0_i32_0 = arith.constant 0 : i32
    return %arg0, %c0_i32 : i32, i32
  }
}

</mosaic_0001>

<bundles_post_ra>
// kernel: tpu_custom_call.1
= control target key start
LH: loop header
LB: loop body
LE: loop exit
PB: predicated region body
PF: predicated region fallthrough
CT: control target
= control target key end

     0   :  { %10 = vsyncpa [#allocation4], 0  ;;  %s13033_s0 = inlined_call_operand.hbm [shape: bf16[16,8,2048], index: 0, kind: input, shape index: {}]   ;;  %s13034_s1 = inlined_call_operand.hbm [shape: bf16[4096,512], index: 1, kind: input, shape index: {}]   ;;  %s13035_s2 = inlined_call_operand.hbm [shape: f32[1,512], index: 2, kind: input, shape index: {}]   ;;  %s13036_s3 = inlined_call_operand.hbm [shape: bf16[512,256], index: 3, kind: input, shape index: {}]   ;;  %s13037_s4 = inlined_call_operand.hbm [shape: f32[1,256], index: 4, kind: input, shape index: {}]   ;;  %s13038_s5 = inlined_call_operand.hbm [shape: f32[8,256], index: 5, kind: output, shape index: {}]  }
   0x1   :  { %11 = vsyncpa [#allocation7], 0 }
   0x2   :  { %12 = vsyncpa [#allocation10], 0 }
   0x3   :  { %13 = vsyncpa [#allocation5], 0  ;;  %s12227_s18 = smov [#allocation6]   ;;  %s12087_s22 = scalar_lea.hbm %s13034_s1, 131072 }
   0x4   :  { %s31_s19 = sshll.u32 %s12227_s18, 4  ;;  %p12088_p0 = scmp.ne.s32.totalorder %s13034_s1, %s12087_s22  ;;  %s32_s19 = int_to_ptr.vmem [resolvable:$true] %s31_s19 }
   0x5   :  { %p12091_p1 = scmp.lt.u32.totalorder %s12087_s22, %s13034_s1 }
   0x7   :  { %p12093_p2 = pnand %p12091_p1, %p12088_p0 }
   0x9   :  { %12096 = shalt.err (!%p12093_p2)
}
   0xa   :  { %s12097_s27 = scalar_lea.vmem %s32_s19, 131072  ;;  %p12102_p4 = scmp.lt.s32.totalorder %s32_s19, %s32_s19 }
   0xb   :  { %p12098_p3 = scmp.ne.s32.totalorder %s32_s19, %s12097_s27  ;;  %p12103_p5 = scmp.lt.s32.totalorder %s12097_s27, %s12097_s27 }
   0xd   :  { %p12104_p6 = por %p12103_p5, %p12102_p4 }
   0xf   :  { %p12105_p7 = pnand %p12104_p6, %p12098_p3 }
  0x11   :  { %12108 = shalt.err (!%p12105_p7)
}
  0x12   :  { %s12228_s28 = smov 256   ;;  %s12229_s29 = smov 16  }
  0x13   :  { %37 = dma.hbm_to_vmem [thread:$0]  %s13034_s1, 131072, %s32_s19, [#allocation7], %s12228_s28, %s12228_s28, %s12229_s29  }
  0x14   :  { %s12230_s7 = smov [#allocation9]   ;;  %s12109_s11 = scalar_lea.hbm %s13036_s3, 8192 }
  0x15   :  { %s53_s8 = sshll.u32 %s12230_s7, 4  ;;  %p12110_p8 = scmp.ne.s32.totalorder %s13036_s3, %s12109_s11  ;;  %s54_s8 = int_to_ptr.vmem [resolvable:$true] %s53_s8 }
  0x16   :  { %p12113_p9 = scmp.lt.u32.totalorder %s12109_s11, %s13036_s3 }
  0x18   :  { %p12115_p10 = pnand %p12113_p9, %p12110_p8 }
  0x1a   :  { %12118 = shalt.err (!%p12115_p10)
}
  0x1b   :  { %s12119_s16 = scalar_lea.vmem %s54_s8, 8192  ;;  %p12124_p12 = scmp.lt.s32.totalorder %s54_s8, %s54_s8 }
  0x1c   :  { %p12120_p11 = scmp.ne.s32.totalorder %s54_s8, %s12119_s16  ;;  %p12125_p13 = scmp.lt.s32.totalorder %s12119_s16, %s12119_s16 }
  0x1e   :  { %p12126_p0 = por %p12125_p13, %p12124_p12 }
  0x20   :  { %p12127_p1 = pnand %p12126_p0, %p12120_p11 }
  0x22   :  { %12130 = shalt.err (!%p12127_p1)
}
  0x23   :  { %s12231_s1 = smov 128   ;;  %s12232_s17 = smov 8  }
  0x24   :  { %59 = dma.hbm_to_vmem [thread:$0]  %s13036_s3, 8192, %s54_s8, [#allocation10], %s12231_s1, %s12231_s1, %s12232_s17  }
  0x25   :  { %s12233_s20 = smov [#allocation3]   ;;  %s12131_s24 = scalar_lea.hbm %s13033_s0, 16384 }
  0x26   :  { %s19_s21 = sshll.u32 %s12233_s20, 4  ;;  %p12132_p2 = scmp.ne.s32.totalorder %s13033_s0, %s12131_s24  ;;  %s20_s21 = int_to_ptr.vmem [resolvable:$true] %s19_s21 }
  0x27   :  { %p12135_p3 = scmp.lt.u32.totalorder %s12131_s24, %s13033_s0 }
  0x29   :  { %p12137_p4 = pnand %p12135_p3, %p12132_p2 }
  0x2b   :  { %12140 = shalt.err (!%p12137_p4)
}
  0x2c   :  { %s12141_s29 = scalar_lea.vmem %s20_s21, 16384  ;;  %p12146_p6 = scmp.lt.s32.totalorder %s20_s21, %s20_s21 }
  0x2d   :  { %p12142_p5 = scmp.ne.s32.totalorder %s20_s21, %s12141_s29  ;;  %p12147_p7 = scmp.lt.s32.totalorder %s12141_s29, %s12141_s29 }
  0x2f   :  { %p12148_p8 = por %p12147_p7, %p12146_p6 }
  0x31   :  { %p12149_p9 = pnand %p12148_p8, %p12142_p5 }
  0x33   :  { %12152 = shalt.err (!%p12149_p9)
}
  0x34   :  { %s12234_s3 = smov 1024   ;;  %s12235_s30 = smov 64  }
  0x35   :  { %25 = dma.hbm_to_vmem [thread:$0]  %s13033_s0, 16384, %s20_s21, [#allocation4], %s12234_s3, %s12234_s3, %s12235_s30  }
  0x36   :  { %s12236_s8 = smov [#allocation8]   ;;  %s12237_s10 = smov [#allocation11]  }
  0x37   :  { %s44_s9 = sshll.u32 %s12236_s8, 4  ;;  %s66_s11 = sshll.u32 %s12237_s10, 4  ;;  %s45_s9 = int_to_ptr.vmem [resolvable:$true] %s44_s9  ;;  %s67_s11 = int_to_ptr.vmem [resolvable:$true] %s66_s11 }
  0x38   :  { %s12153_s14 = scalar_lea.hbm %s13035_s2, 64 }
  0x39   :  { %p12154_p10 = scmp.ne.s32.totalorder %s13035_s2, %s12153_s14  ;;  %p12157_p11 = scmp.lt.u32.totalorder %s12153_s14, %s13035_s2 }
  0x3b   :  { %p12159_p12 = pnand %p12157_p11, %p12154_p10 }
  0x3d   :  { %12162 = shalt.err (!%p12159_p12)
}
  0x3e   :  { %s12163_s0 = scalar_lea.vmem %s45_s9, 64  ;;  %p12168_p0 = scmp.lt.s32.totalorder %s45_s9, %s45_s9 }
  0x3f   :  { %p12164_p13 = scmp.ne.s32.totalorder %s45_s9, %s12163_s0  ;;  %p12169_p1 = scmp.lt.s32.totalorder %s12163_s0, %s12163_s0 }
  0x41   :  { %p12170_p2 = por %p12169_p1, %p12168_p0 }
  0x43   :  { %p12171_p3 = pnand %p12170_p2, %p12164_p13 }
  0x45   :  { %12174 = shalt.err (!%p12171_p3)
}
  0x46   :  { %47 = dma.hbm_to_vmem [thread:$0]  %s13035_s2, 64, %s45_s9, [#allocation7]  }
  0x47   :  { %s12175_s22 = scalar_lea.hbm %s13037_s4, 32 }
  0x48   :  { %p12176_p4 = scmp.ne.s32.totalorder %s13037_s4, %s12175_s22  ;;  %p12179_p5 = scmp.lt.u32.totalorder %s12175_s22, %s13037_s4 }
  0x4a   :  { %p12181_p6 = pnand %p12179_p5, %p12176_p4 }
  0x4c   :  { %12184 = shalt.err (!%p12181_p6)
}
  0x4d   :  { %s12185_s27 = scalar_lea.vmem %s67_s11, 32  ;;  %p12190_p8 = scmp.lt.s32.totalorder %s67_s11, %s67_s11 }
  0x4e   :  { %p12186_p7 = scmp.ne.s32.totalorder %s67_s11, %s12185_s27  ;;  %p12191_p9 = scmp.lt.s32.totalorder %s12185_s27, %s12185_s27 }
  0x50   :  { %p12192_p10 = por %p12191_p9, %p12190_p8 }
  0x52   :  { %p12193_p11 = pnand %p12192_p10, %p12186_p7 }
  0x54   :  { %12196 = shalt.err (!%p12193_p11)
}
  0x55   :  { %69 = dma.hbm_to_vmem [thread:$0]  %s13037_s4, 32, %s67_s11, [#allocation10]  }
  0x56   :  { %12219 = dma.done.wait [#allocation4], 16384  }
  0x57   :  { %12220 = vsyncadd [#allocation4], 4294950912 }
  0x58   :  { %12221 = dma.done.wait [#allocation7], 131136  }
  0x59   :  { %12222 = vsyncadd [#allocation7], 4294836160 }
  0x5a   :  { %12223 = dma.done.wait [#allocation10], 8224  }
  0x5b   :  { %12224 = vsyncadd [#allocation10], 4294959072  ;;  %v10327_v0 = vld [vmem:[#allocation6 + $0x4] ss:$16 sps:$4 sm:$0xff]   ;;  %v10331_v2 = vld [vmem:[#allocation6] ss:$16 sps:$4 sm:$0xff]  }
  0x5c   :  { %v10329_v1 = vld [vmem:[#allocation6 + $0x204] ss:$16 sps:$4 sm:$0xff]   ;;  %7218 = vmatprep.subr.bf16.mxu1 %v10327_v0  ;;  %v10332_v3 = vld [vmem:[#allocation6 + $0x200] ss:$16 sps:$4 sm:$0xff]   ;;  %v86_v60 = vld [vmem:[#allocation3 + $0x8] sm:$0xff]  ;;  %s12238_s4 = smov [#allocation12]  }
  0x5d   :  { %7259 = vmatprep.subr.bf16.mxu0 %v10329_v1  ;;  %v10333_v4 = vld [vmem:[#allocation6 + $0x24] ss:$16 sps:$4 sm:$0xff]   ;;  %7219 = vmatpush1.bf16.msra.mxu1 %v10331_v2  ;;  %v10337_v6 = vld [vmem:[#allocation6 + $0x20] ss:$16 sps:$4 sm:$0xff]   ;;  %v111_v61 = vld [vmem:[#allocation3 + $0x48] sm:$0xff]  ;;  %s9024_s29 = sshll.u32 %s12238_s4, 4  ;;  %s9025_s29 = int_to_ptr.vmem [resolvable:$true] %s9024_s29 }
  0x5e   :  { %7260 = vmatpush1.bf16.msra.mxu0 %v10332_v3  ;;  %v10335_v5 = vld [vmem:[#allocation6 + $0x224] ss:$16 sps:$4 sm:$0xff]   ;;  %7220 = vmatprep.subr.bf16.mxu1 %v10333_v4  ;;  %v10338_v7 = vld [vmem:[#allocation6 + $0x220] ss:$16 sps:$4 sm:$0xff]   ;;  %v160_v62 = vld [vmem:[#allocation3 + $0x88] sm:$0xff]  ;;  %v119_v2 = vmax.bf16 %v111_v61, %v86_v60  ;;  %s12197_s3 = scalar_lea.vmem %s9025_s29, 256  ;;  %p12202_p13 = scmp.lt.s32.totalorder %s9025_s29, %s9025_s29 }
  0x5f   :  { %7261 = vmatprep.subr.bf16.mxu0 %v10335_v5  ;;  %v10339_v8 = vld [vmem:[#allocation6 + $0x44] ss:$16 sps:$4 sm:$0xff]   ;;  %v10343_v10 = vld [vmem:[#allocation6 + $0x40] ss:$16 sps:$4 sm:$0xff]   ;;  %v209_v4 = vld [vmem:[#allocation3 + $0xc8] sm:$0xff]  ;;  %p12198_p12 = scmp.ne.s32.totalorder %s9025_s29, %s12197_s3  ;;  %p12203_p0 = scmp.lt.s32.totalorder %s12197_s3, %s12197_s3 }
  0x60   :  { %v10341_v9 = vld [vmem:[#allocation6 + $0x244] ss:$16 sps:$4 sm:$0xff]   ;;  %v10344_v11 = vld [vmem:[#allocation6 + $0x240] ss:$16 sps:$4 sm:$0xff]  }
  0x61   :  { %7221 = vmatpush1.bf16.msra.mxu1 %v10337_v6  ;;  %v10345_v12 = vld [vmem:[#allocation6 + $0x64] ss:$16 sps:$4 sm:$0xff]   ;;  %v10349_v14 = vld [vmem:[#allocation6 + $0x60] ss:$16 sps:$4 sm:$0xff]   ;;  %p12204_p1 = por %p12203_p0, %p12202_p13 }
  0x62   :  { %7262 = vmatpush1.bf16.msra.mxu0 %v10338_v7  ;;  %7222 = vmatprep.subr.bf16.mxu1 %v10339_v8  ;;  %v10347_v13 = vld [vmem:[#allocation6 + $0x264] ss:$16 sps:$4 sm:$0xff]   ;;  %v10350_v15 = vld [vmem:[#allocation6 + $0x260] ss:$16 sps:$4 sm:$0xff]   ;;  %v168_v8 = vmax.bf16 %v160_v62, %v119_v2  ;;  %v10434_v2 = vld [vmem:[#allocation6 + $0x2c] ss:$16 sps:$4 sm:$0xff]  }
  0x63   :  { %7263 = vmatprep.subr.bf16.mxu0 %v10341_v9  ;;  %v10351_v16 = vld [vmem:[#allocation6 + $0x84] ss:$16 sps:$4 sm:$0xff]   ;;  %v10355_v18 = vld [vmem:[#allocation6 + $0x80] ss:$16 sps:$4 sm:$0xff]   ;;  %p12205_p2 = pnand %p12204_p1, %p12198_p12 }
  0x64   :  { %v10353_v17 = vld [vmem:[#allocation6 + $0x284] ss:$16 sps:$4 sm:$0xff]   ;;  %v10356_v19 = vld [vmem:[#allocation6 + $0x280] ss:$16 sps:$4 sm:$0xff]  }
  0x65   :  { %7223 = vmatpush1.bf16.msra.mxu1 %v10343_v10  ;;  %v10357_v20 = vld [vmem:[#allocation6 + $0xa4] ss:$16 sps:$4 sm:$0xff]   ;;  %v10361_v22 = vld [vmem:[#allocation6 + $0xa0] ss:$16 sps:$4 sm:$0xff]  }
  0x66   :  { %7264 = vmatpush1.bf16.msra.mxu0 %v10344_v11  ;;  %7224 = vmatprep.subr.bf16.mxu1 %v10345_v12  ;;  %v10359_v21 = vld [vmem:[#allocation6 + $0x2a4] ss:$16 sps:$4 sm:$0xff]   ;;  %v10362_v23 = vld [vmem:[#allocation6 + $0x2a0] ss:$16 sps:$4 sm:$0xff]   ;;  %v258_v12 = vld [vmem:[#allocation3 + $0x108] sm:$0xff] }
  0x67   :  { %7265 = vmatprep.subr.bf16.mxu0 %v10347_v13  ;;  %v10363_v24 = vld [vmem:[#allocation6 + $0xc4] ss:$16 sps:$4 sm:$0xff]   ;;  %v10367_v26 = vld [vmem:[#allocation6 + $0xc0] ss:$16 sps:$4 sm:$0xff]  }
  0x68   :  { %v10365_v25 = vld [vmem:[#allocation6 + $0x2c4] ss:$16 sps:$4 sm:$0xff]   ;;  %v10368_v27 = vld [vmem:[#allocation6 + $0x2c0] ss:$16 sps:$4 sm:$0xff]  }
  0x69   :  { %7225 = vmatpush1.bf16.msra.mxu1 %v10349_v14  ;;  %v10369_v28 = vld [vmem:[#allocation6 + $0xe4] ss:$16 sps:$4 sm:$0xff]   ;;  %v10373_v30 = vld [vmem:[#allocation6 + $0xe0] ss:$16 sps:$4 sm:$0xff]   ;;  %v217_v14 = vmax.bf16 %v209_v4, %v168_v8  ;;  %v10432_v4 = vld [vmem:[#allocation6 + $0x28] ss:$16 sps:$4 sm:$0xff]  }
  0x6a   :  { %7266 = vmatpush1.bf16.msra.mxu0 %v10350_v15  ;;  %7226 = vmatprep.subr.bf16.mxu1 %v10351_v16  ;;  %v10371_v29 = vld [vmem:[#allocation6 + $0x2e4] ss:$16 sps:$4 sm:$0xff]   ;;  %v10374_v31 = vld [vmem:[#allocation6 + $0x2e0] ss:$16 sps:$4 sm:$0xff]   ;;  %v10440_v8 = vld [vmem:[#allocation6 + $0x4c] ss:$16 sps:$4 sm:$0xff]  }
  0x6b   :  { %7267 = vmatprep.subr.bf16.mxu0 %v10353_v17  ;;  %v10375_v32 = vld [vmem:[#allocation6 + $0x104] ss:$16 sps:$4 sm:$0xff]   ;;  %v10379_v34 = vld [vmem:[#allocation6 + $0x100] ss:$16 sps:$4 sm:$0xff]  }
  0x6c   :  { %v10377_v33 = vld [vmem:[#allocation6 + $0x304] ss:$16 sps:$4 sm:$0xff]   ;;  %v10380_v35 = vld [vmem:[#allocation6 + $0x300] ss:$16 sps:$4 sm:$0xff]  }
  0x6d   :  { %7227 = vmatpush1.bf16.msra.mxu1 %v10355_v18  ;;  %v10381_v36 = vld [vmem:[#allocation6 + $0x124] ss:$16 sps:$4 sm:$0xff]   ;;  %v10385_v38 = vld [vmem:[#allocation6 + $0x120] ss:$16 sps:$4 sm:$0xff]   ;;  %v307_v18 = vld [vmem:[#allocation3 + $0x148] sm:$0xff] }
  0x6e   :  { %7268 = vmatpush1.bf16.msra.mxu0 %v10356_v19  ;;  %7228 = vmatprep.subr.bf16.mxu1 %v10357_v20  ;;  %v10383_v37 = vld [vmem:[#allocation6 + $0x324] ss:$16 sps:$4 sm:$0xff]   ;;  %v10386_v39 = vld [vmem:[#allocation6 + $0x320] ss:$16 sps:$4 sm:$0xff]  }
  0x6f   :  { %7269 = vmatprep.subr.bf16.mxu0 %v10359_v21  ;;  %v10387_v40 = vld [vmem:[#allocation6 + $0x144] ss:$16 sps:$4 sm:$0xff]   ;;  %v10391_v42 = vld [vmem:[#allocation6 + $0x140] ss:$16 sps:$4 sm:$0xff]  }
  0x70   :  { %v10389_v41 = vld [vmem:[#allocation6 + $0x344] ss:$16 sps:$4 sm:$0xff]   ;;  %v10392_v43 = vld [vmem:[#allocation6 + $0x340] ss:$16 sps:$4 sm:$0xff]  }
  0x71   :  { %7229 = vmatpush1.bf16.msra.mxu1 %v10361_v22  ;;  %v10393_v44 = vld [vmem:[#allocation6 + $0x164] ss:$16 sps:$4 sm:$0xff]   ;;  %v10397_v49 = vld [vmem:[#allocation6 + $0x160] ss:$16 sps:$4 sm:$0xff]   ;;  %v266_v22 = vmax.bf16 %v258_v12, %v217_v14  ;;  %v10446_v12 = vld [vmem:[#allocation6 + $0x6c] ss:$16 sps:$4 sm:$0xff]  }
  0x72   :  { %7270 = vmatpush1.bf16.msra.mxu0 %v10362_v23  ;;  %7230 = vmatprep.subr.bf16.mxu1 %v10363_v24  ;;  %v10395_v45 = vld [vmem:[#allocation6 + $0x364] ss:$16 sps:$4 sm:$0xff]   ;;  %v10398_v50 = vld [vmem:[#allocation6 + $0x360] ss:$16 sps:$4 sm:$0xff]   ;;  %v356_v24 = vld [vmem:[#allocation3 + $0x188] sm:$0xff] }
  0x73   :  { %7271 = vmatprep.subr.bf16.mxu0 %v10365_v25  ;;  %v85_v46 = vld [vmem:[#allocation3] sm:$0xff]  ;;  %v10444_v14 = vld [vmem:[#allocation6 + $0x68] ss:$16 sps:$4 sm:$0xff]  }
  0x74   :  { %v110_v47 = vld [vmem:[#allocation3 + $0x40] sm:$0xff] }
  0x75   :  { %7231 = vmatpush1.bf16.msra.mxu1 %v10367_v26  ;;  %v159_v48 = vld [vmem:[#allocation3 + $0x80] sm:$0xff]  ;;  %v118_v51 = vmax.bf16 %v110_v47, %v85_v46  ;;  %v315_v26 = vmax.bf16 %v307_v18, %v266_v22  ;;  %v10450_v18 = vld [vmem:[#allocation6 + $0x88] ss:$16 sps:$4 sm:$0xff]  }
  0x76   :  { %7272 = vmatpush1.bf16.msra.mxu0 %v10368_v27  ;;  %7232 = vmatprep.subr.bf16.mxu1 %v10369_v28  ;;  %v10399_v52 = vld [vmem:[#allocation6 + $0x184] ss:$16 sps:$4 sm:$0xff]   ;;  %v10403_v56 = vld [vmem:[#allocation6 + $0x180] ss:$16 sps:$4 sm:$0xff]  }
  0x77   :  { %7273 = vmatprep.subr.bf16.mxu0 %v10371_v29  ;;  %v10401_v53 = vld [vmem:[#allocation6 + $0x384] ss:$16 sps:$4 sm:$0xff]   ;;  %v167_v55 = vmax.bf16 %v159_v48, %v118_v51  ;;  %v10404_v57 = vld [vmem:[#allocation6 + $0x380] ss:$16 sps:$4 sm:$0xff]   ;;  %v601_v48 = vld [vmem:[#allocation3 + $0x2c8] sm:$0xff] }
  0x78   :  { %v208_v54 = vld [vmem:[#allocation3 + $0xc0] sm:$0xff] }
  0x79   :  { %7233 = vmatpush1.bf16.msra.mxu1 %v10373_v30  ;;  %v257_v58 = vld [vmem:[#allocation3 + $0x100] sm:$0xff]  ;;  %v216_v59 = vmax.bf16 %v208_v54, %v167_v55 }
  0x7a   :  { %7274 = vmatpush1.bf16.msra.mxu0 %v10374_v31  ;;  %7234 = vmatprep.subr.bf16.mxu1 %v10375_v32  ;;  %v10405_v63 = vld [vmem:[#allocation6 + $0x1a4] ss:$16 sps:$4 sm:$0xff]   ;;  %v10409_v5 = vld [vmem:[#allocation6 + $0x1a0] ss:$16 sps:$4 sm:$0xff]   ;;  %v405_v31 = vld [vmem:[#allocation3 + $0x1c8] sm:$0xff] }
  0x7b   :  { %7275 = vmatprep.subr.bf16.mxu0 %v10377_v33  ;;  %v10407_v0 = vld [vmem:[#allocation6 + $0x3a4] ss:$16 sps:$4 sm:$0xff]   ;;  %v265_v3 = vmax.bf16 %v257_v58, %v216_v59  ;;  %v10410_v6 = vld [vmem:[#allocation6 + $0x3a0] ss:$16 sps:$4 sm:$0xff]   ;;  %v364_v33 = vmax.bf16 %v356_v24, %v315_v26  ;;  %v748_v59 = vld [vmem:[#allocation3 + $0x388] sm:$0xff] }
  0x7c   :  { %v306_v1 = vld [vmem:[#allocation3 + $0x140] sm:$0xff]  ;;  %v87_v26 = vld [vmem:[#allocation3 + $0x10] sm:$0xff] }
  0x7d   :  { %7235 = vmatpush1.bf16.msra.mxu1 %v10379_v34  ;;  %v355_v7 = vld [vmem:[#allocation3 + $0x180] sm:$0xff]  ;;  %v314_v11 = vmax.bf16 %v306_v1, %v265_v3  ;;  %v454_v34 = vld [vmem:[#allocation3 + $0x208] sm:$0xff] }
  0x7e   :  { %7276 = vmatpush1.bf16.msra.mxu0 %v10380_v35  ;;  %7236 = vmatprep.subr.bf16.mxu1 %v10381_v36  ;;  %v10411_v9 = vld [vmem:[#allocation6 + $0x1c4] ss:$16 sps:$4 sm:$0xff]   ;;  %v10415_v15 = vld [vmem:[#allocation6 + $0x1c0] ss:$16 sps:$4 sm:$0xff]  }
  0x7f   :  { %7277 = vmatprep.subr.bf16.mxu0 %v10383_v37  ;;  %v10413_v10 = vld [vmem:[#allocation6 + $0x3c4] ss:$16 sps:$4 sm:$0xff]   ;;  %v10416_v16 = vld [vmem:[#allocation6 + $0x3c0] ss:$16 sps:$4 sm:$0xff]   ;;  %v363_v17 = vmax.bf16 %v355_v7, %v314_v11  ;;  %v413_v37 = vmax.bf16 %v405_v31, %v364_v33  ;;  %v10470_v33 = vld [vmem:[#allocation6 + $0xec] ss:$16 sps:$4 sm:$0xff]  }
  0x80   :  { %v404_v13 = vld [vmem:[#allocation3 + $0x1c0] sm:$0xff]  ;;  %v210_v31 = vld [vmem:[#allocation3 + $0xd0] sm:$0xff] }
  0x81   :  { %7237 = vmatpush1.bf16.msra.mxu1 %v10385_v38  ;;  %v10417_v19 = vld [vmem:[#allocation6 + $0x1e4] ss:$16 sps:$4 sm:$0xff]   ;;  %v412_v23 = vmax.bf16 %v404_v13, %v363_v17  ;;  %v10421_v27 = vld [vmem:[#allocation6 + $0x1e0] ss:$16 sps:$4 sm:$0xff]   ;;  %v10428_v38 = vld [vmem:[#allocation6 + $0xc] ss:$16 sps:$4 sm:$0xff]  }
  0x82   :  { %7278 = vmatpush1.bf16.msra.mxu0 %v10386_v39  ;;  %7238 = vmatprep.subr.bf16.mxu1 %v10387_v40  ;;  %v10419_v20 = vld [vmem:[#allocation6 + $0x3e4] ss:$16 sps:$4 sm:$0xff]   ;;  %v10422_v28 = vld [vmem:[#allocation6 + $0x3e0] ss:$16 sps:$4 sm:$0xff]   ;;  %v503_v40 = vld [vmem:[#allocation3 + $0x248] sm:$0xff] }
  0x83   :  { %7279 = vmatprep.subr.bf16.mxu0 %v10389_v41  ;;  %v453_v21 = vld [vmem:[#allocation3 + $0x200] sm:$0xff] }
  0x84   :  { %v502_v25 = vld [vmem:[#allocation3 + $0x240] sm:$0xff]  ;;  %v461_v29 = vmax.bf16 %v453_v21, %v412_v23  ;;  %v10456_v23 = vld [vmem:[#allocation6 + $0xa8] ss:$16 sps:$4 sm:$0xff]  }
  0x85   :  { %7239 = vmatpush1.bf16.msra.mxu1 %v10391_v42  ;;  %v551_v30 = vld [vmem:[#allocation3 + $0x280] sm:$0xff]  ;;  %v462_v42 = vmax.bf16 %v454_v34, %v413_v37 }
  0x86   :  { %7280 = vmatpush1.bf16.msra.mxu0 %v10392_v43  ;;  %7240 = vmatprep.subr.bf16.mxu1 %v10393_v44  ;;  %v600_v32 = vld [vmem:[#allocation3 + $0x2c0] sm:$0xff]  ;;  %v510_v35 = vmax.bf16 %v502_v25, %v461_v29  ;;  %v552_v44 = vld [vmem:[#allocation3 + $0x288] sm:$0xff] }
  0x87   :  { %7281 = vmatprep.subr.bf16.mxu0 %v10395_v45  ;;  %v10425_v36 = vld [vmem:[#allocation6 + $0x404] ss:$16 sps:$4 sm:$0xff]   ;;  %v511_v46 = vmax.bf16 %v503_v40, %v462_v42  ;;  %v10429_v11 = vld [vmem:[#allocation6 + $0x420] ss:$16 sps:$4 sm:$0xff]   ;;  %v10464_v25 = vld [vmem:[#allocation6 + $0xcc] ss:$16 sps:$4 sm:$0xff]  }
  0x88   :  { %v559_v39 = vmax.bf16 %v551_v30, %v510_v35  ;;  %v649_v41 = vld [vmem:[#allocation3 + $0x300] sm:$0xff]  ;;  %v10462_v30 = vld [vmem:[#allocation6 + $0xc8] ss:$16 sps:$4 sm:$0xff]   ;;  %v308_v40 = vld [vmem:[#allocation3 + $0x150] sm:$0xff] }
  0x89   :  { %7241 = vmatpush1.bf16.msra.mxu1 %v10397_v49  ;;  %v698_v45 = vld [vmem:[#allocation3 + $0x340] sm:$0xff]  ;;  %v10476_v42 = vld [vmem:[#allocation6 + $0x10c] ss:$16 sps:$4 sm:$0xff]  }
  0x8a   :  { %7282 = vmatpush1.bf16.msra.mxu0 %v10398_v50  ;;  %7242 = vmatprep.subr.bf16.mxu1 %v10399_v52  ;;  %v608_v43 = vmax.bf16 %v600_v32, %v559_v39  ;;  %v747_v49 = vld [vmem:[#allocation3 + $0x380] sm:$0xff]  ;;  %v560_v50 = vmax.bf16 %v552_v44, %v511_v46  ;;  %v650_v52 = vld [vmem:[#allocation3 + $0x308] sm:$0xff]  ;;  %v357_v44 = vld [vmem:[#allocation3 + $0x190] sm:$0xff] }
  0x8b   :  { %7283 = vmatprep.subr.bf16.mxu0 %v10401_v53  ;;  %v796_v53 = vld [vmem:[#allocation3 + $0x3c0] sm:$0xff]  ;;  %v10468_v39 = vld [vmem:[#allocation6 + $0xe8] ss:$16 sps:$4 sm:$0xff]  }
  0x8c   :  { %v657_v47 = vmax.bf16 %v649_v41, %v608_v43  ;;  %v609_v54 = vmax.bf16 %v601_v48, %v560_v50  ;;  %v10437_v13 = vld [vmem:[#allocation6 + $0x444] ss:$16 sps:$4 sm:$0xff]   ;;  %v10447_v22 = vld [vmem:[#allocation6 + $0x480] ss:$16 sps:$4 sm:$0xff]   ;;  %v10482_v50 = vld [vmem:[#allocation6 + $0x12c] ss:$16 sps:$4 sm:$0xff]  }
  0x8d   :  { %7243 = vmatpush1.bf16.msra.mxu1 %v10403_v56  ;;  %v699_v56 = vld [vmem:[#allocation3 + $0x348] sm:$0xff]  ;;  %v10443_v17 = vld [vmem:[#allocation6 + $0x464] ss:$16 sps:$4 sm:$0xff]   ;;  %v10453_v32 = vld [vmem:[#allocation6 + $0x4a0] ss:$16 sps:$4 sm:$0xff]  }
  0x8e   :  { %7284 = vmatpush1.bf16.msra.mxu0 %v10404_v57  ;;  %7244 = vmatprep.subr.bf16.mxu1 %v10405_v63  ;;  %v706_v51 = vmax.bf16 %v698_v45, %v657_v47  ;;  %v658_v57 = vmax.bf16 %v650_v52, %v609_v54  ;;  %v797_v63 = vld [vmem:[#allocation3 + $0x3c8] sm:$0xff]  ;;  %v10449_v21 = vld [vmem:[#allocation6 + $0x484] ss:$16 sps:$4 sm:$0xff]   ;;  %v10459_v37 = vld [vmem:[#allocation6 + $0x4c0] ss:$16 sps:$4 sm:$0xff]  }
  0x8f   :  { %7285 = vmatprep.subr.bf16.mxu0 %v10407_v0  ;;  %v10426_v0 = vld [vmem:[#allocation6 + $0x8] ss:$16 sps:$4 sm:$0xff]   ;;  %v10455_v24 = vld [vmem:[#allocation6 + $0x4a4] ss:$16 sps:$4 sm:$0xff]   ;;  %v10465_v45 = vld [vmem:[#allocation6 + $0x4e0] ss:$16 sps:$4 sm:$0xff]  }
  0x90   :  { %v755_v55 = vmax.bf16 %v747_v49, %v706_v51  ;;  %v707_v60 = vmax.bf16 %v699_v56, %v658_v57  ;;  %v10461_v35 = vld [vmem:[#allocation6 + $0x4c4] ss:$16 sps:$4 sm:$0xff]   ;;  %v10474_v47 = vld [vmem:[#allocation6 + $0x108] ss:$16 sps:$4 sm:$0xff]  }
  0x91   :  { %7245 = vmatpush1.bf16.msra.mxu1 %v10409_v5  ;;  %v10467_v41 = vld [vmem:[#allocation6 + $0x4e4] ss:$16 sps:$4 sm:$0xff]  }
  0x92   :  { %7286 = vmatpush1.bf16.msra.mxu0 %v10410_v6  ;;  %7246 = vmatprep.subr.bf16.mxu1 %v10411_v9  ;;  %v804_v58 = vmax.bf16 %v796_v53, %v755_v55  ;;  %v756_v1 = vmax.bf16 %v748_v59, %v707_v60  ;;  %v10423_v6 = vld [vmem:[#allocation6 + $0x400] ss:$16 sps:$4 sm:$0xff]   ;;  %v10431_v9 = vld [vmem:[#allocation6 + $0x424] ss:$16 sps:$4 sm:$0xff]   ;;  %v10480_v55 = vld [vmem:[#allocation6 + $0x128] ss:$16 sps:$4 sm:$0xff]  }
  0x93   :  { %7287 = vmatprep.subr.bf16.mxu0 %v10413_v10  ;;  %v10438_v10 = vld [vmem:[#allocation6 + $0x48] ss:$16 sps:$4 sm:$0xff]   ;;  %v406_v48 = vld [vmem:[#allocation3 + $0x1d0] sm:$0xff] }
  0x94   :  { %v9044_v61 = vcombine.high %v804_v58, %v804_v58  ;;  %v12329_v62 = vcombine.low %v804_v58, %v804_v58  ;;  %v805_v3 = vmax.bf16 %v797_v63, %v756_v1  ;;  %v10473_v49 = vld [vmem:[#allocation6 + $0x504] ss:$16 sps:$4 sm:$0xff]   ;;  %v10471_v53 = vld [vmem:[#allocation6 + $0x500] ss:$16 sps:$4 sm:$0xff]   ;;  %v10488_v58 = vld [vmem:[#allocation6 + $0x14c] ss:$16 sps:$4 sm:$0xff]  }
  0x95   :  { %7247 = vmatpush1.bf16.msra.mxu1 %v10415_v15  ;;  %v10435_v15 = vld [vmem:[#allocation6 + $0x440] ss:$16 sps:$4 sm:$0xff]   ;;  %v10479_v57 = vld [vmem:[#allocation6 + $0x524] ss:$16 sps:$4 sm:$0xff]  }
  0x96   :  { %7288 = vmatpush1.bf16.msra.mxu0 %v10416_v16  ;;  %7248 = vmatprep.subr.bf16.mxu1 %v10417_v19  ;;  %v12332_v5 = vcombine.high %v805_v3, %v805_v3  ;;  %v12334_v7 = vcombine.low %v805_v3, %v805_v3  ;;  %v10452_v16 = vld [vmem:[#allocation6 + $0x8c] ss:$16 sps:$4 sm:$0xff]   ;;  %v10441_v19 = vld [vmem:[#allocation6 + $0x460] ss:$16 sps:$4 sm:$0xff]  }
  0x97   :  { %7289 = vmatprep.subr.bf16.mxu0 %v10419_v20  ;;  %7250 = vmatprep.mubr.bf16.mxu1 %v9044_v61  ;;  %v10458_v20 = vld [vmem:[#allocation6 + $0xac] ss:$16 sps:$4 sm:$0xff]   ;;  %v455_v52 = vld [vmem:[#allocation3 + $0x210] sm:$0xff] }
  0x98   :  { %7291 = vmatprep.mubr.bf16.mxu0 %v12332_v5  ;;  %v504_v56 = vld [vmem:[#allocation3 + $0x250] sm:$0xff]  ;;  %v10494_v3 = vld [vmem:[#allocation6 + $0x16c] ss:$16 sps:$4 sm:$0xff]  }
  0x99   :  { %7249 = vmatpush1.bf16.msra.mxu1 %v10421_v27  ;;  %v112_v27 = vld [vmem:[#allocation3 + $0x50] sm:$0xff] }
  0x9a   :  { %7290 = vmatpush1.bf16.msra.mxu0 %v10422_v28  ;;  %7874 = vmatprep.subr.bf16.mxu1 %v10428_v38  ;;  %v161_v28 = vld [vmem:[#allocation3 + $0x90] sm:$0xff]  ;;  %v120_v29 = vmax.bf16 %v112_v27, %v87_v26  ;;  %v10512_v26 = vld [vmem:[#allocation6 + $0x1cc] ss:$16 sps:$4 sm:$0xff]  }
  0x9b   :  { %7300 = vmatprep.subr.bf16.mxu0 %v10425_v36  ;;  %v259_v36 = vld [vmem:[#allocation3 + $0x110] sm:$0xff] }
  0x9c   :  { %7251 = vmatmul.mubr.bf16.vlgmr.msra.gmra.mrb[0].mxu1 %v12329_v62  ;;  %v169_v34 = vmax.bf16 %v161_v28, %v120_v29  ;;  %v553_v60 = vld [vmem:[#allocation3 + $0x290] sm:$0xff]  ;;  %v10510_v29 = vld [vmem:[#allocation6 + $0x1c8] ss:$16 sps:$4 sm:$0xff]  }
  0x9d   :  { %7875 = vmatpush1.bf16.msra.mxu1 %v10426_v0  ;;  %7906 = vmatprep.mubr.bf16.mxu1 %v9044_v61  ;;  %v10477_v61 = vld [vmem:[#allocation6 + $0x520] ss:$16 sps:$4 sm:$0xff]   ;;  %v10486_v0 = vld [vmem:[#allocation6 + $0x148] ss:$16 sps:$4 sm:$0xff]   ;;  %v10503_v28 = vld [vmem:[#allocation6 + $0x5a4] ss:$16 sps:$4 sm:$0xff]  }
  0x9e   :  { %7876 = vmatprep.subr.bf16.mxu1 %v10434_v2  ;;  %7292 = vmatmul.mubr.bf16.vlgmr.msra.gmra.mrb[0].mxu0 %v12334_v7  ;;  %v218_v38 = vmax.bf16 %v210_v31, %v169_v34  ;;  %v602_v1 = vld [vmem:[#allocation3 + $0x2d0] sm:$0xff]  ;;  %v10518_v31 = vld [vmem:[#allocation6 + $0x1ec] ss:$16 sps:$4 sm:$0xff]  }
  0x9f   :  { %7301 = vmatpush1.bf16.msra.mxu0 %v10423_v6  ;;  %v10485_v2 = vld [vmem:[#allocation6 + $0x544] ss:$16 sps:$4 sm:$0xff]   ;;  %v10507_v34 = vld [vmem:[#allocation6 + $0x5c0] ss:$16 sps:$4 sm:$0xff]  }
  0xa0   :  { %7302 = vmatprep.subr.bf16.mxu0 %v10431_v9  ;;  %v267_v43 = vmax.bf16 %v259_v36, %v218_v38  ;;  %v651_v6 = vld [vmem:[#allocation3 + $0x310] sm:$0xff] }
  0xa1   :  { %7877 = vmatpush1.bf16.msra.mxu1 %v10432_v4  ;;  %v10515_v36 = vld [vmem:[#allocation6 + $0x5e4] ss:$16 sps:$4 sm:$0xff]   ;;  %v10513_v38 = vld [vmem:[#allocation6 + $0x5e0] ss:$16 sps:$4 sm:$0xff]  }
  0xa2   :  { %7878 = vmatprep.subr.bf16.mxu1 %v10440_v8  ;;  %v316_v46 = vmax.bf16 %v308_v40, %v267_v43  ;;  %v10483_v8 = vld [vmem:[#allocation6 + $0x540] ss:$16 sps:$4 sm:$0xff]   ;;  %v10521_v40 = vld [vmem:[#allocation6 + $0x604] ss:$16 sps:$4 sm:$0xff]   ;;  %v10528_v43 = vld [vmem:[#allocation6 + $0x228] ss:$16 sps:$4 sm:$0xff]  }
  0xa3   :  { %7303 = vmatpush1.bf16.msra.mxu0 %v10429_v11  ;;  %v700_v11 = vld [vmem:[#allocation3 + $0x350] sm:$0xff] }
  0xa4   :  { %7304 = vmatprep.subr.bf16.mxu0 %v10437_v13  ;;  %v365_v51 = vmax.bf16 %v357_v44, %v316_v46  ;;  %v10500_v13 = vld [vmem:[#allocation6 + $0x18c] ss:$16 sps:$4 sm:$0xff]   ;;  %v10527_v44 = vld [vmem:[#allocation6 + $0x624] ss:$16 sps:$4 sm:$0xff]  }
  0xa5   :  { %7879 = vmatpush1.bf16.msra.mxu1 %v10438_v10  ;;  %v10492_v10 = vld [vmem:[#allocation6 + $0x168] ss:$16 sps:$4 sm:$0xff]  }
  0xa6   :  { %7880 = vmatprep.subr.bf16.mxu1 %v10446_v12  ;;  %v414_v54 = vmax.bf16 %v406_v48, %v365_v51  ;;  %v10491_v12 = vld [vmem:[#allocation6 + $0x564] ss:$16 sps:$4 sm:$0xff]   ;;  %v88_v46 = vld [vmem:[#allocation3 + $0x18] sm:$0xff]  ;;  %v10525_v51 = vld [vmem:[#allocation6 + $0x620] ss:$16 sps:$4 sm:$0xff]  }
  0xa7   :  { %7305 = vmatpush1.bf16.msra.mxu0 %v10435_v15  ;;  %v749_v15 = vld [vmem:[#allocation3 + $0x390] sm:$0xff]  ;;  %v162_v48 = vld [vmem:[#allocation3 + $0x98] sm:$0xff] }
  0xa8   :  { %7306 = vmatprep.subr.bf16.mxu0 %v10443_v17  ;;  %v463_v59 = vmax.bf16 %v455_v52, %v414_v54  ;;  %v10498_v17 = vld [vmem:[#allocation6 + $0x188] ss:$16 sps:$4 sm:$0xff]   ;;  %v10542_v52 = vld [vmem:[#allocation6 + $0x26c] ss:$16 sps:$4 sm:$0xff]  }
  0xa9   :  { %7881 = vmatpush1.bf16.msra.mxu1 %v10444_v14  ;;  %v260_v54 = vld [vmem:[#allocation3 + $0x118] sm:$0xff] }
  0xaa   :  { %7882 = vmatprep.subr.bf16.mxu1 %v10452_v16  ;;  %v512_v63 = vmax.bf16 %v504_v56, %v463_v59  ;;  %v10539_v59 = vld [vmem:[#allocation6 + $0x664] ss:$16 sps:$4 sm:$0xff]  }
  0xab   :  { %7307 = vmatpush1.bf16.msra.mxu0 %v10441_v19  ;;  %v10489_v19 = vld [vmem:[#allocation6 + $0x560] ss:$16 sps:$4 sm:$0xff]  }
  0xac   :  { %7308 = vmatprep.subr.bf16.mxu0 %v10449_v21  ;;  %v561_v4 = vmax.bf16 %v553_v60, %v512_v63  ;;  %v10548_v60 = vld [vmem:[#allocation6 + $0x28c] ss:$16 sps:$4 sm:$0xff]  }
  0xad   :  { %7883 = vmatpush1.bf16.msra.mxu1 %v10450_v18  ;;  %v798_v18 = vld [vmem:[#allocation3 + $0x3d0] sm:$0xff]  ;;  %v358_v63 = vld [vmem:[#allocation3 + $0x198] sm:$0xff] }
  0xae   :  { %7884 = vmatprep.subr.bf16.mxu1 %v10458_v20  ;;  %v610_v9 = vmax.bf16 %v602_v1, %v561_v4  ;;  %v10506_v20 = vld [vmem:[#allocation6 + $0x1ac] ss:$16 sps:$4 sm:$0xff]   ;;  %v10545_v4 = vld [vmem:[#allocation6 + $0x684] ss:$16 sps:$4 sm:$0xff]  }
  0xaf   :  { %7309 = vmatpush1.bf16.msra.mxu0 %v10447_v22  ;;  %v10497_v22 = vld [vmem:[#allocation6 + $0x584] ss:$16 sps:$4 sm:$0xff]  }
  0xb0   :  { %7310 = vmatprep.subr.bf16.mxu0 %v10455_v24  ;;  %v659_v14 = vmax.bf16 %v651_v6, %v610_v9  ;;  %v10504_v24 = vld [vmem:[#allocation6 + $0x1a8] ss:$16 sps:$4 sm:$0xff]   ;;  %v10554_v6 = vld [vmem:[#allocation6 + $0x2ac] ss:$16 sps:$4 sm:$0xff]  }
  0xb1   :  { %7885 = vmatpush1.bf16.msra.mxu1 %v10456_v23  ;;  %v456_v9 = vld [vmem:[#allocation3 + $0x218] sm:$0xff] }
  0xb2   :  { %7886 = vmatprep.subr.bf16.mxu1 %v10464_v25  ;;  %v708_v16 = vmax.bf16 %v700_v11, %v659_v14  ;;  %v10495_v25 = vld [vmem:[#allocation6 + $0x580] ss:$16 sps:$4 sm:$0xff]   ;;  %v10551_v14 = vld [vmem:[#allocation6 + $0x6a4] ss:$16 sps:$4 sm:$0xff]  }
  0xb3   :  { %7311 = vmatpush1.bf16.msra.mxu0 %v10453_v32  ;;  %v10509_v32 = vld [vmem:[#allocation6 + $0x5c4] ss:$16 sps:$4 sm:$0xff]  }
  0xb4   :  { %7312 = vmatprep.subr.bf16.mxu0 %v10461_v35  ;;  %v757_v21 = vmax.bf16 %v749_v15, %v708_v16  ;;  %v10524_v35 = vld [vmem:[#allocation6 + $0x20c] ss:$16 sps:$4 sm:$0xff]  }
  0xb5   :  { %7887 = vmatpush1.bf16.msra.mxu1 %v10462_v30  ;;  %v10501_v30 = vld [vmem:[#allocation6 + $0x5a0] ss:$16 sps:$4 sm:$0xff]   ;;  %v10560_v15 = vld [vmem:[#allocation6 + $0x2cc] ss:$16 sps:$4 sm:$0xff]  }
  0xb6   :  { %7888 = vmatprep.subr.bf16.mxu1 %v10470_v33  ;;  %v806_v23 = vmax.bf16 %v798_v18, %v757_v21  ;;  %v10516_v33 = vld [vmem:[#allocation6 + $0x1e8] ss:$16 sps:$4 sm:$0xff]   ;;  %v10549_v18 = vld [vmem:[#allocation6 + $0x6a0] ss:$16 sps:$4 sm:$0xff]  }
  0xb7   :  { %7313 = vmatpush1.bf16.msra.mxu0 %v10459_v37  ;;  %v10522_v37 = vld [vmem:[#allocation6 + $0x208] ss:$16 sps:$4 sm:$0xff]  }
  0xb8   :  { %7314 = vmatprep.subr.bf16.mxu0 %v10467_v41  ;;  %v12338_v27 = vcombine.high %v806_v23, %v806_v23  ;;  %v10519_v41 = vld [vmem:[#allocation6 + $0x600] ss:$16 sps:$4 sm:$0xff]   ;;  %v603_v21 = vld [vmem:[#allocation3 + $0x2d8] sm:$0xff] }
  0xb9   :  { %7889 = vmatpush1.bf16.msra.mxu1 %v10468_v39  ;;  %v10530_v39 = vld [vmem:[#allocation6 + $0x22c] ss:$16 sps:$4 sm:$0xff]  }
  0xba   :  { %7890 = vmatprep.subr.bf16.mxu1 %v10476_v42  ;;  %7332 = vmatprep.mubr.bf16.mxu0 %v12338_v27  ;;  %v12342_v42 = vcombine.low %v806_v23, %v806_v23  ;;  %v10566_v23 = vld [vmem:[#allocation6 + $0x2ec] ss:$16 sps:$4 sm:$0xff]  }
  0xbb   :  { %7315 = vmatpush1.bf16.msra.mxu0 %v10465_v45  ;;  %v10536_v45 = vld [vmem:[#allocation6 + $0x24c] ss:$16 sps:$4 sm:$0xff]  }
  0xbc   :  { %7316 = vmatprep.subr.bf16.mxu0 %v10473_v49 }
  0xbd   :  { %7891 = vmatpush1.bf16.msra.mxu1 %v10474_v47  ;;  %v113_v47 = vld [vmem:[#allocation3 + $0x58] sm:$0xff] }
  0xbe   :  { %7892 = vmatprep.subr.bf16.mxu1 %v10482_v50  ;;  %v121_v49 = vmax.bf16 %v113_v47, %v88_v46  ;;  %v211_v50 = vld [vmem:[#allocation3 + $0xd8] sm:$0xff] }
  0xbf   :  { %7317 = vmatpush1.bf16.msra.mxu0 %v10471_v53  ;;  %v10584_v46 = vld [vmem:[#allocation6 + $0x34c] ss:$16 sps:$4 sm:$0xff]  }
  0xc0   :  { %7318 = vmatprep.subr.bf16.mxu0 %v10479_v57  ;;  %v170_v53 = vmax.bf16 %v162_v48, %v121_v49  ;;  %v10540_v57 = vld [vmem:[#allocation6 + $0x268] ss:$16 sps:$4 sm:$0xff]   ;;  %v10575_v48 = vld [vmem:[#allocation6 + $0x724] ss:$16 sps:$4 sm:$0xff]  }
  0xc1   :  { %7893 = vmatpush1.bf16.msra.mxu1 %v10480_v55  ;;  %v10531_v55 = vld [vmem:[#allocation6 + $0x640] ss:$16 sps:$4 sm:$0xff]   ;;  %v10582_v49 = vld [vmem:[#allocation6 + $0x348] ss:$16 sps:$4 sm:$0xff]  }
  0xc2   :  { %7894 = vmatprep.subr.bf16.mxu1 %v10488_v58  ;;  %v219_v56 = vmax.bf16 %v211_v50, %v170_v53  ;;  %v309_v58 = vld [vmem:[#allocation3 + $0x158] sm:$0xff]  ;;  %v10579_v53 = vld [vmem:[#allocation6 + $0x740] ss:$16 sps:$4 sm:$0xff]  }
  0xc3   :  { %7319 = vmatpush1.bf16.msra.mxu0 %v10477_v61  ;;  %v10590_v50 = vld [vmem:[#allocation6 + $0x36c] ss:$16 sps:$4 sm:$0xff]  }
  0xc4   :  { %7320 = vmatprep.subr.bf16.mxu0 %v10485_v2  ;;  %v268_v61 = vmax.bf16 %v260_v54, %v219_v56  ;;  %v10546_v2 = vld [vmem:[#allocation6 + $0x288] ss:$16 sps:$4 sm:$0xff]   ;;  %v10587_v54 = vld [vmem:[#allocation6 + $0x764] ss:$16 sps:$4 sm:$0xff]   ;;  %v10585_v56 = vld [vmem:[#allocation6 + $0x760] ss:$16 sps:$4 sm:$0xff]  }
  0xc5   :  { %7895 = vmatpush1.bf16.msra.mxu1 %v10486_v0  ;;  %v10537_v0 = vld [vmem:[#allocation6 + $0x660] ss:$16 sps:$4 sm:$0xff]  }
  0xc6   :  { %7896 = vmatprep.subr.bf16.mxu1 %v10494_v3  ;;  %v317_v1 = vmax.bf16 %v309_v58, %v268_v61  ;;  %v407_v3 = vld [vmem:[#allocation3 + $0x1d8] sm:$0xff]  ;;  %v10593_v58 = vld [vmem:[#allocation6 + $0x784] ss:$16 sps:$4 sm:$0xff]  }
  0xc7   :  { %7321 = vmatpush1.bf16.msra.mxu0 %v10483_v8  ;;  %v10599_v61 = vld [vmem:[#allocation6 + $0x7a4] ss:$16 sps:$4 sm:$0xff]  }
  0xc8   :  { %7322 = vmatprep.subr.bf16.mxu0 %v10491_v12  ;;  %v366_v8 = vmax.bf16 %v358_v63, %v317_v1  ;;  %v10552_v12 = vld [vmem:[#allocation6 + $0x2a8] ss:$16 sps:$4 sm:$0xff]   ;;  %v10608_v63 = vld [vmem:[#allocation6 + $0x3cc] ss:$16 sps:$4 sm:$0xff]   ;;  %v114_v1 = vld [vmem:[#allocation3 + $0x60] sm:$0xff] }
  0xc9   :  { %7897 = vmatpush1.bf16.msra.mxu1 %v10492_v10  ;;  %v10543_v10 = vld [vmem:[#allocation6 + $0x680] ss:$16 sps:$4 sm:$0xff]  }
  0xca   :  { %7898 = vmatprep.subr.bf16.mxu1 %v10500_v13  ;;  %v415_v11 = vmax.bf16 %v407_v3, %v366_v8  ;;  %v505_v13 = vld [vmem:[#allocation3 + $0x258] sm:$0xff]  ;;  %v10597_v8 = vld [vmem:[#allocation6 + $0x7a0] ss:$16 sps:$4 sm:$0xff]  }
  0xcb   :  { %7323 = vmatpush1.bf16.msra.mxu0 %v10489_v19 }
  0xcc   :  { %7324 = vmatprep.subr.bf16.mxu0 %v10497_v22  ;;  %v464_v16 = vmax.bf16 %v456_v9, %v415_v11  ;;  %v10557_v22 = vld [vmem:[#allocation6 + $0x6c4] ss:$16 sps:$4 sm:$0xff]   ;;  %v10614_v9 = vld [vmem:[#allocation6 + $0x3ec] ss:$16 sps:$4 sm:$0xff]  }
  0xcd   :  { %7899 = vmatpush1.bf16.msra.mxu1 %v10498_v17  ;;  %v554_v17 = vld [vmem:[#allocation3 + $0x298] sm:$0xff]  ;;  %v10605_v11 = vld [vmem:[#allocation6 + $0x7c4] ss:$16 sps:$4 sm:$0xff]  }
  0xce   :  { %7900 = vmatprep.subr.bf16.mxu1 %v10506_v20  ;;  %v513_v19 = vmax.bf16 %v505_v13, %v464_v16  ;;  %v10558_v20 = vld [vmem:[#allocation6 + $0x2c8] ss:$16 sps:$4 sm:$0xff]   ;;  %v10603_v13 = vld [vmem:[#allocation6 + $0x7c0] ss:$16 sps:$4 sm:$0xff]  }
  0xcf   :  { %7325 = vmatpush1.bf16.msra.mxu0 %v10495_v25  ;;  %v652_v25 = vld [vmem:[#allocation3 + $0x318] sm:$0xff]  ;;  %v310_v16 = vld [vmem:[#allocation3 + $0x160] sm:$0xff] }
  0xd0   :  { %7326 = vmatprep.subr.bf16.mxu0 %v10503_v28 }
  0xd1   :  { %7901 = vmatpush1.bf16.msra.mxu1 %v10504_v24  ;;  %v562_v24 = vmax.bf16 %v554_v17, %v513_v19  ;;  %v10611_v17 = vld [vmem:[#allocation6 + $0x7e4] ss:$16 sps:$4 sm:$0xff]  }
  0xd2   :  { %7902 = vmatprep.subr.bf16.mxu1 %v10512_v26  ;;  %v10555_v26 = vld [vmem:[#allocation6 + $0x6c0] ss:$16 sps:$4 sm:$0xff]  }
  0xd3   :  { %7327 = vmatpush1.bf16.msra.mxu0 %v10501_v30  ;;  %v611_v28 = vmax.bf16 %v603_v21, %v562_v24  ;;  %v701_v30 = vld [vmem:[#allocation3 + $0x358] sm:$0xff]  ;;  %v10609_v21 = vld [vmem:[#allocation6 + $0x7e0] ss:$16 sps:$4 sm:$0xff]  }
  0xd4   :  { %7328 = vmatprep.subr.bf16.mxu0 %v10509_v32  ;;  %v10572_v32 = vld [vmem:[#allocation6 + $0x30c] ss:$16 sps:$4 sm:$0xff]   ;;  %v408_v24 = vld [vmem:[#allocation3 + $0x1e0] sm:$0xff] }
  0xd5   :  { %7903 = vmatpush1.bf16.msra.mxu1 %v10510_v29  ;;  %v10564_v29 = vld [vmem:[#allocation6 + $0x2e8] ss:$16 sps:$4 sm:$0xff]  }
  0xd6   :  { %7904 = vmatprep.subr.bf16.mxu1 %v10518_v31  ;;  %v10563_v31 = vld [vmem:[#allocation6 + $0x6e4] ss:$16 sps:$4 sm:$0xff]  }
  0xd7   :  { %7329 = vmatpush1.bf16.msra.mxu0 %v10507_v34  ;;  %v750_v34 = vld [vmem:[#allocation3 + $0x398] sm:$0xff] }
  0xd8   :  { %7330 = vmatprep.subr.bf16.mxu0 %v10515_v36  ;;  %v10570_v36 = vld [vmem:[#allocation6 + $0x308] ss:$16 sps:$4 sm:$0xff]  }
  0xd9   :  { %7905 = vmatpush1.bf16.msra.mxu1 %v10516_v33  ;;  %v660_v33 = vmax.bf16 %v652_v25, %v611_v28  ;;  %v10617_v25 = vld [vmem:[#allocation6 + $0x804] ss:$16 sps:$4 sm:$0xff]  }
  0xda   :  { %7915 = vmatprep.subr.bf16.mxu1 %v10524_v35 }
  0xdb   :  { %7331 = vmatpush1.bf16.msra.mxu0 %v10513_v38  ;;  %v709_v35 = vmax.bf16 %v701_v30, %v660_v33  ;;  %v10561_v38 = vld [vmem:[#allocation6 + $0x6e0] ss:$16 sps:$4 sm:$0xff]   ;;  %v10624_v33 = vld [vmem:[#allocation6 + $0x428] ss:$16 sps:$4 sm:$0xff]  }
  0xdc   :  { %7907 = vmatmul.mubr.bf16.vlgmr.msra.gmra.mrb[4].mxu1 %v12329_v62  ;;  %7341 = vmatprep.subr.bf16.mxu0 %v10521_v40  ;;  %v10534_v62 = vld [vmem:[#allocation6 + $0x248] ss:$16 sps:$4 sm:$0xff]   ;;  %v10615_v30 = vld [vmem:[#allocation6 + $0x800] ss:$16 sps:$4 sm:$0xff]  }
  0xdd   :  { %7916 = vmatpush1.bf16.msra.mxu1 %v10522_v37  ;;  %7947 = vmatprep.mubr.bf16.mxu1 %v12332_v5  ;;  %v10533_v5 = vld [vmem:[#allocation6 + $0x644] ss:$16 sps:$4 sm:$0xff]   ;;  %v799_v37 = vld [vmem:[#allocation3 + $0x3d8] sm:$0xff]  ;;  %v758_v40 = vmax.bf16 %v750_v34, %v709_v35 }
  0xde   :  { %7917 = vmatprep.subr.bf16.mxu1 %v10530_v39  ;;  %7333 = vmatmul.mubr.bf16.vlgmr.msra.gmra.mrb[0].mxu0 %v12342_v42  ;;  %v10578_v39 = vld [vmem:[#allocation6 + $0x32c] ss:$16 sps:$4 sm:$0xff]   ;;  %v506_v34 = vld [vmem:[#allocation3 + $0x260] sm:$0xff] }
  0xdf   :  { %7342 = vmatpush1.bf16.msra.mxu0 %v10519_v41  ;;  %v10569_v41 = vld [vmem:[#allocation6 + $0x704] ss:$16 sps:$4 sm:$0xff]  }
  0xe0   :  { %7343 = vmatprep.subr.bf16.mxu0 %v10527_v44  ;;  %v10576_v44 = vld [vmem:[#allocation6 + $0x328] ss:$16 sps:$4 sm:$0xff]   ;;  %v10623_v35 = vld [vmem:[#allocation6 + $0x824] ss:$16 sps:$4 sm:$0xff]  }
  0xe1   :  { %7918 = vmatpush1.bf16.msra.mxu1 %v10528_v43  ;;  %v12346_v43 = vmax.bf16 %v799_v37, %v758_v40 }
  0xe2   :  { %7919 = vmatprep.subr.bf16.mxu1 %v10536_v45  ;;  %v10567_v45 = vld [vmem:[#allocation6 + $0x700] ss:$16 sps:$4 sm:$0xff]  }
  0xe3   :  { %7344 = vmatpush1.bf16.msra.mxu0 %v10525_v51  ;;  %v12350_v47 = vcombine.high %v12346_v43, %v12346_v43  ;;  %v10581_v51 = vld [vmem:[#allocation6 + $0x744] ss:$16 sps:$4 sm:$0xff]  }
  0xe4   :  { %7345 = vmatprep.subr.bf16.mxu0 %v10533_v5  ;;  %v10596_v5 = vld [vmem:[#allocation6 + $0x38c] ss:$16 sps:$4 sm:$0xff]  }
  0xe5   :  { %7920 = vmatpush1.bf16.msra.mxu1 %v10534_v62  ;;  %7373 = vmatprep.mubr.bf16.mxu0 %v12350_v47  ;;  %v10573_v62 = vld [vmem:[#allocation6 + $0x720] ss:$16 sps:$4 sm:$0xff]  }
  0xe6   :  { %7921 = vmatprep.subr.bf16.mxu1 %v10542_v52  ;;  %v10588_v52 = vld [vmem:[#allocation6 + $0x368] ss:$16 sps:$4 sm:$0xff]  }
  0xe7   :  { %7346 = vmatpush1.bf16.msra.mxu0 %v10531_v55  ;;  %v10594_v55 = vld [vmem:[#allocation6 + $0x388] ss:$16 sps:$4 sm:$0xff]  }
  0xe8   :  { %7347 = vmatprep.subr.bf16.mxu0 %v10539_v59  ;;  %v10591_v59 = vld [vmem:[#allocation6 + $0x780] ss:$16 sps:$4 sm:$0xff]  }
  0xe9   :  { %7922 = vmatpush1.bf16.msra.mxu1 %v10540_v57  ;;  %v10602_v57 = vld [vmem:[#allocation6 + $0x3ac] ss:$16 sps:$4 sm:$0xff]  }
  0xea   :  { %7923 = vmatprep.subr.bf16.mxu1 %v10548_v60  ;;  %v10600_v60 = vld [vmem:[#allocation6 + $0x3a8] ss:$16 sps:$4 sm:$0xff]  }
  0xeb   :  { %7348 = vmatpush1.bf16.msra.mxu0 %v10537_v0  ;;  %v89_v0 = vld [vmem:[#allocation3 + $0x20] sm:$0xff] }
  0xec   :  { %7349 = vmatprep.subr.bf16.mxu0 %v10545_v4  ;;  %v122_v3 = vmax.bf16 %v114_v1, %v89_v0  ;;  %v10606_v4 = vld [vmem:[#allocation6 + $0x3c8] ss:$16 sps:$4 sm:$0xff]   ;;  %v10656_v0 = vld [vmem:[#allocation6 + $0x4cc] ss:$16 sps:$4 sm:$0xff]  }
  0xed   :  { %7924 = vmatpush1.bf16.msra.mxu1 %v10546_v2  ;;  %v163_v2 = vld [vmem:[#allocation3 + $0xa0] sm:$0xff] }
  0xee   :  { %7925 = vmatprep.subr.bf16.mxu1 %v10554_v6  ;;  %v212_v6 = vld [vmem:[#allocation3 + $0xe0] sm:$0xff] }
  0xef   :  { %7350 = vmatpush1.bf16.msra.mxu0 %v10543_v10  ;;  %v171_v10 = vmax.bf16 %v163_v2, %v122_v3  ;;  %v10647_v2 = vld [vmem:[#allocation6 + $0x8a4] ss:$16 sps:$4 sm:$0xff]   ;;  %v10645_v3 = vld [vmem:[#allocation6 + $0x8a0] ss:$16 sps:$4 sm:$0xff]  }
  0xf0   :  { %7351 = vmatprep.subr.bf16.mxu0 %v10551_v14 }
  0xf1   :  { %7926 = vmatpush1.bf16.msra.mxu1 %v10552_v12  ;;  %v261_v12 = vld [vmem:[#allocation3 + $0x120] sm:$0xff]  ;;  %v220_v14 = vmax.bf16 %v212_v6, %v171_v10  ;;  %v10662_v6 = vld [vmem:[#allocation6 + $0x4ec] ss:$16 sps:$4 sm:$0xff]   ;;  %v10660_v10 = vld [vmem:[#allocation6 + $0x4e8] ss:$16 sps:$4 sm:$0xff]  }
  0xf2   :  { %7927 = vmatprep.subr.bf16.mxu1 %v10560_v15  ;;  %v10612_v15 = vld [vmem:[#allocation6 + $0x3e8] ss:$16 sps:$4 sm:$0xff]  }
  0xf3   :  { %7352 = vmatpush1.bf16.msra.mxu0 %v10549_v18  ;;  %v10620_v18 = vld [vmem:[#allocation6 + $0x40c] ss:$16 sps:$4 sm:$0xff]   ;;  %v269_v19 = vmax.bf16 %v261_v12, %v220_v14  ;;  %v10659_v12 = vld [vmem:[#allocation6 + $0x8e4] ss:$16 sps:$4 sm:$0xff]   ;;  %v10666_v14 = vld [vmem:[#allocation6 + $0x508] ss:$16 sps:$4 sm:$0xff]  }
  0xf4   :  { %7353 = vmatprep.subr.bf16.mxu0 %v10557_v22 }
  0xf5   :  { %7928 = vmatpush1.bf16.msra.mxu1 %v10558_v20  ;;  %v359_v20 = vld [vmem:[#allocation3 + $0x1a0] sm:$0xff]  ;;  %v318_v22 = vmax.bf16 %v310_v16, %v269_v19  ;;  %v10680_v19 = vld [vmem:[#allocation6 + $0x54c] ss:$16 sps:$4 sm:$0xff]  }
  0xf6   :  { %7929 = vmatprep.subr.bf16.mxu1 %v10566_v23  ;;  %v10618_v23 = vld [vmem:[#allocation6 + $0x408] ss:$16 sps:$4 sm:$0xff]   ;;  %v10665_v16 = vld [vmem:[#allocation6 + $0x904] ss:$16 sps:$4 sm:$0xff]  }
  0xf7   :  { %7354 = vmatpush1.bf16.msra.mxu0 %v10555_v26  ;;  %v10626_v26 = vld [vmem:[#allocation6 + $0x42c] ss:$16 sps:$4 sm:$0xff]   ;;  %v367_v28 = vmax.bf16 %v359_v20, %v318_v22  ;;  %v10671_v20 = vld [vmem:[#allocation6 + $0x924] ss:$16 sps:$4 sm:$0xff]  }
  0xf8   :  { %7355 = vmatprep.subr.bf16.mxu0 %v10563_v31  ;;  %v115_v22 = vld [vmem:[#allocation3 + $0x68] sm:$0xff] }
  0xf9   :  { %7930 = vmatpush1.bf16.msra.mxu1 %v10564_v29  ;;  %v457_v29 = vld [vmem:[#allocation3 + $0x220] sm:$0xff]  ;;  %v416_v31 = vmax.bf16 %v408_v24, %v367_v28  ;;  %v164_v24 = vld [vmem:[#allocation3 + $0xa8] sm:$0xff] }
  0xfa   :  { %7931 = vmatprep.subr.bf16.mxu1 %v10572_v32  ;;  %v12356_v32 = vcombine.low %v12346_v43, %v12346_v43  ;;  %v604_v43 = vld [vmem:[#allocation3 + $0x2e0] sm:$0xff] }
  0xfb   :  { %7356 = vmatpush1.bf16.msra.mxu0 %v10561_v38  ;;  %v465_v37 = vmax.bf16 %v457_v29, %v416_v31  ;;  %v555_v38 = vld [vmem:[#allocation3 + $0x2a0] sm:$0xff]  ;;  %v10686_v29 = vld [vmem:[#allocation6 + $0x56c] ss:$16 sps:$4 sm:$0xff]  }
  0xfc   :  { %7357 = vmatprep.subr.bf16.mxu0 %v10569_v41  ;;  %v10630_v41 = vld [vmem:[#allocation6 + $0x448] ss:$16 sps:$4 sm:$0xff]   ;;  %v10669_v28 = vld [vmem:[#allocation6 + $0x920] ss:$16 sps:$4 sm:$0xff]   ;;  %v10677_v31 = vld [vmem:[#allocation6 + $0x944] ss:$16 sps:$4 sm:$0xff]  }
  0xfd   :  { %7932 = vmatpush1.bf16.msra.mxu1 %v10570_v36  ;;  %v10632_v36 = vld [vmem:[#allocation6 + $0x44c] ss:$16 sps:$4 sm:$0xff]   ;;  %v514_v40 = vmax.bf16 %v506_v34, %v465_v37  ;;  %v10675_v34 = vld [vmem:[#allocation6 + $0x940] ss:$16 sps:$4 sm:$0xff]   ;;  %v10684_v37 = vld [vmem:[#allocation6 + $0x568] ss:$16 sps:$4 sm:$0xff]  }
  0xfe   :  { %7933 = vmatprep.subr.bf16.mxu1 %v10578_v39  ;;  %v10621_v39 = vld [vmem:[#allocation6 + $0x820] ss:$16 sps:$4 sm:$0xff]  }
  0xff   :  { %7358 = vmatpush1.bf16.msra.mxu0 %v10567_v45  ;;  %v563_v45 = vmax.bf16 %v555_v38, %v514_v40  ;;  %v311_v38 = vld [vmem:[#allocation3 + $0x168] sm:$0xff] }
 0x100   :  { %7359 = vmatprep.subr.bf16.mxu0 %v10575_v48 }
 0x101   :  { %7934 = vmatpush1.bf16.msra.mxu1 %v10576_v44  ;;  %v10638_v44 = vld [vmem:[#allocation6 + $0x46c] ss:$16 sps:$4 sm:$0xff]   ;;  %v612_v48 = vmax.bf16 %v604_v43, %v563_v45  ;;  %v10690_v45 = vld [vmem:[#allocation6 + $0x588] ss:$16 sps:$4 sm:$0xff]  }
 0x102   :  { %7935 = vmatprep.subr.bf16.mxu1 %v10584_v46  ;;  %v10627_v46 = vld [vmem:[#allocation6 + $0x840] ss:$16 sps:$4 sm:$0xff]  }
 0x103   :  { %7360 = vmatpush1.bf16.msra.mxu0 %v10573_v62  ;;  %v10636_v62 = vld [vmem:[#allocation6 + $0x468] ss:$16 sps:$4 sm:$0xff]  }
 0x104   :  { %7361 = vmatprep.subr.bf16.mxu0 %v10581_v51  ;;  %v10644_v51 = vld [vmem:[#allocation6 + $0x48c] ss:$16 sps:$4 sm:$0xff]  }
 0x105   :  { %7936 = vmatpush1.bf16.msra.mxu1 %v10582_v49  ;;  %v10635_v49 = vld [vmem:[#allocation6 + $0x864] ss:$16 sps:$4 sm:$0xff]  }
 0x106   :  { %7937 = vmatprep.subr.bf16.mxu1 %v10590_v50  ;;  %v702_v50 = vld [vmem:[#allocation3 + $0x360] sm:$0xff] }
 0x107   :  { %7362 = vmatpush1.bf16.msra.mxu0 %v10579_v53  ;;  %v751_v53 = vld [vmem:[#allocation3 + $0x3a0] sm:$0xff] }
 0x108   :  { %7363 = vmatprep.subr.bf16.mxu0 %v10587_v54 }
 0x109   :  { %7938 = vmatpush1.bf16.msra.mxu1 %v10588_v52 }
 0x10a   :  { %7939 = vmatprep.subr.bf16.mxu1 %v10596_v5  ;;  %v10633_v5 = vld [vmem:[#allocation6 + $0x860] ss:$16 sps:$4 sm:$0xff]  }
 0x10b   :  { %7364 = vmatpush1.bf16.msra.mxu0 %v10585_v56  ;;  %v800_v56 = vld [vmem:[#allocation3 + $0x3e0] sm:$0xff] }
 0x10c   :  { %7365 = vmatprep.subr.bf16.mxu0 %v10593_v58 }
 0x10d   :  { %7940 = vmatpush1.bf16.msra.mxu1 %v10594_v55  ;;  %v10642_v55 = vld [vmem:[#allocation6 + $0x488] ss:$16 sps:$4 sm:$0xff]  }
 0x10e   :  { %7941 = vmatprep.subr.bf16.mxu1 %v10602_v57  ;;  %v10650_v57 = vld [vmem:[#allocation6 + $0x4ac] ss:$16 sps:$4 sm:$0xff]  }
 0x10f   :  { %7366 = vmatpush1.bf16.msra.mxu0 %v10591_v59  ;;  %v10641_v59 = vld [vmem:[#allocation6 + $0x884] ss:$16 sps:$4 sm:$0xff]  }
 0x110   :  { %7367 = vmatprep.subr.bf16.mxu0 %v10599_v61  ;;  %v10639_v61 = vld [vmem:[#allocation6 + $0x880] ss:$16 sps:$4 sm:$0xff]  }
 0x111   :  { %7942 = vmatpush1.bf16.msra.mxu1 %v10600_v60 }
 0x112   :  { %7943 = vmatprep.subr.bf16.mxu1 %v10608_v63  ;;  %v10648_v63 = vld [vmem:[#allocation6 + $0x4a8] ss:$16 sps:$4 sm:$0xff]  }
 0x113   :  { %7368 = vmatpush1.bf16.msra.mxu0 %v10597_v8  ;;  %v10653_v8 = vld [vmem:[#allocation6 + $0x8c4] ss:$16 sps:$4 sm:$0xff]  }
 0x114   :  { %7369 = vmatprep.subr.bf16.mxu0 %v10605_v11  ;;  %v10668_v11 = vld [vmem:[#allocation6 + $0x50c] ss:$16 sps:$4 sm:$0xff]  }
 0x115   :  { %7944 = vmatpush1.bf16.msra.mxu1 %v10606_v4  ;;  %v10654_v4 = vld [vmem:[#allocation6 + $0x4c8] ss:$16 sps:$4 sm:$0xff]  }
 0x116   :  { %7945 = vmatprep.subr.bf16.mxu1 %v10614_v9  ;;  %v10651_v9 = vld [vmem:[#allocation6 + $0x8c0] ss:$16 sps:$4 sm:$0xff]  }
 0x117   :  { %7370 = vmatpush1.bf16.msra.mxu0 %v10603_v13  ;;  %v10657_v13 = vld [vmem:[#allocation6 + $0x8e0] ss:$16 sps:$4 sm:$0xff]  }
 0x118   :  { %7371 = vmatprep.subr.bf16.mxu0 %v10611_v17  ;;  %v10663_v17 = vld [vmem:[#allocation6 + $0x900] ss:$16 sps:$4 sm:$0xff]  }
 0x119   :  { %7946 = vmatpush1.bf16.msra.mxu1 %v10612_v15  ;;  %v10674_v15 = vld [vmem:[#allocation6 + $0x52c] ss:$16 sps:$4 sm:$0xff]  }
 0x11a   :  { %7956 = vmatprep.subr.bf16.mxu1 %v10620_v18  ;;  %v10672_v18 = vld [vmem:[#allocation6 + $0x528] ss:$16 sps:$4 sm:$0xff]  }
 0x11b   :  { %7372 = vmatpush1.bf16.msra.mxu0 %v10609_v21  ;;  %v90_v21 = vld [vmem:[#allocation3 + $0x28] sm:$0xff] }
 0x11c   :  { %7948 = vmatmul.mubr.bf16.vlgmr.msra.gmra.mrb[4].mxu1 %v12334_v7  ;;  %7382 = vmatprep.subr.bf16.mxu0 %v10617_v25  ;;  %v10629_v7 = vld [vmem:[#allocation6 + $0x844] ss:$16 sps:$4 sm:$0xff]   ;;  %v10678_v25 = vld [vmem:[#allocation6 + $0x548] ss:$16 sps:$4 sm:$0xff]  }
 0x11d   :  { %7957 = vmatpush1.bf16.msra.mxu1 %v10618_v23  ;;  %7988 = vmatprep.mubr.bf16.mxu1 %v12338_v27  ;;  %v653_v27 = vld [vmem:[#allocation3 + $0x320] sm:$0xff]  ;;  %v123_v23 = vmax.bf16 %v115_v22, %v90_v21 }
 0x11e   :  { %7958 = vmatprep.subr.bf16.mxu1 %v10626_v26  ;;  %7374 = vmatmul.mubr.bf16.vlgmr.msra.gmra.mrb[0].mxu0 %v12356_v32  ;;  %v661_v52 = vmax.bf16 %v653_v27, %v612_v48  ;;  %v213_v26 = vld [vmem:[#allocation3 + $0xe8] sm:$0xff]  ;;  %v10711_v21 = vld [vmem:[#allocation6 + $0xa00] ss:$16 sps:$4 sm:$0xff]  }
 0x11f   :  { %7383 = vmatpush1.bf16.msra.mxu0 %v10615_v30  ;;  %v172_v30 = vmax.bf16 %v164_v24, %v123_v23  ;;  %v409_v27 = vld [vmem:[#allocation3 + $0x1e8] sm:$0xff] }
 0x120   :  { %7384 = vmatprep.subr.bf16.mxu0 %v10623_v35  ;;  %v710_v54 = vmax.bf16 %v702_v50, %v661_v52  ;;  %v10696_v52 = vld [vmem:[#allocation6 + $0x5a8] ss:$16 sps:$4 sm:$0xff]   ;;  %v10728_v24 = vld [vmem:[#allocation6 + $0x64c] ss:$16 sps:$4 sm:$0xff]  }
 0x121   :  { %7959 = vmatpush1.bf16.msra.mxu1 %v10624_v33  ;;  %v262_v33 = vld [vmem:[#allocation3 + $0x128] sm:$0xff]  ;;  %v221_v35 = vmax.bf16 %v213_v26, %v172_v30 }
 0x122   :  { %7960 = vmatprep.subr.bf16.mxu1 %v10632_v36  ;;  %v759_v58 = vmax.bf16 %v751_v53, %v710_v54  ;;  %v10683_v36 = vld [vmem:[#allocation6 + $0x964] ss:$16 sps:$4 sm:$0xff]   ;;  %v507_v53 = vld [vmem:[#allocation3 + $0x268] sm:$0xff] }
 0x123   :  { %7385 = vmatpush1.bf16.msra.mxu0 %v10621_v39  ;;  %v10692_v39 = vld [vmem:[#allocation6 + $0x58c] ss:$16 sps:$4 sm:$0xff]   ;;  %v270_v40 = vmax.bf16 %v262_v33, %v221_v35  ;;  %v10720_v23 = vld [vmem:[#allocation6 + $0x628] ss:$16 sps:$4 sm:$0xff]   ;;  %v10731_v33 = vld [vmem:[#allocation6 + $0xa64] ss:$16 sps:$4 sm:$0xff]  }
 0x124   :  { %7386 = vmatprep.subr.bf16.mxu0 %v10629_v7  ;;  %v12360_v60 = vmax.bf16 %v800_v56, %v759_v58  ;;  %v360_v7 = vld [vmem:[#allocation3 + $0x1a8] sm:$0xff]  ;;  %v10693_v56 = vld [vmem:[#allocation6 + $0x9a0] ss:$16 sps:$4 sm:$0xff]   ;;  %v10701_v58 = vld [vmem:[#allocation6 + $0x9c4] ss:$16 sps:$4 sm:$0xff]  }
 0x125   :  { %7961 = vmatpush1.bf16.msra.mxu1 %v10630_v41  ;;  %v10681_v41 = vld [vmem:[#allocation6 + $0x960] ss:$16 sps:$4 sm:$0xff]   ;;  %v319_v43 = vmax.bf16 %v311_v38, %v270_v40  ;;  %v10732_v30 = vld [vmem:[#allocation6 + $0x668] ss:$16 sps:$4 sm:$0xff]   ;;  %v10752_v40 = vld [vmem:[#allocation6 + $0x6cc] ss:$16 sps:$4 sm:$0xff]  }
 0x126   :  { %7962 = vmatprep.subr.bf16.mxu1 %v10638_v44  ;;  %v12364_v1 = vcombine.high %v12360_v60, %v12360_v60  ;;  %v10689_v44 = vld [vmem:[#allocation6 + $0x984] ss:$16 sps:$4 sm:$0xff]   ;;  %v12372_v22 = vcombine.low %v12360_v60, %v12360_v60  ;;  %v10734_v60 = vld [vmem:[#allocation6 + $0x66c] ss:$16 sps:$4 sm:$0xff]   ;;  %v10738_v35 = vld [vmem:[#allocation6 + $0x688] ss:$16 sps:$4 sm:$0xff]  }
 0x127   :  { %7387 = vmatpush1.bf16.msra.mxu0 %v10627_v46  ;;  %v10698_v46 = vld [vmem:[#allocation6 + $0x5ac] ss:$16 sps:$4 sm:$0xff]   ;;  %v368_v48 = vmax.bf16 %v360_v7, %v319_v43  ;;  %v10735_v38 = vld [vmem:[#allocation6 + $0xa80] ss:$16 sps:$4 sm:$0xff]  }
 0x128   :  { %7388 = vmatprep.subr.bf16.mxu0 %v10635_v49  ;;  %7414 = vmatprep.mubr.bf16.mxu0 %v12364_v1  ;;  %v458_v49 = vld [vmem:[#allocation3 + $0x228] sm:$0xff]  ;;  %v91_v43 = vld [vmem:[#allocation3 + $0x30] sm:$0xff] }
 0x129   :  { %7963 = vmatpush1.bf16.msra.mxu1 %v10636_v62  ;;  %v10687_v62 = vld [vmem:[#allocation6 + $0x980] ss:$16 sps:$4 sm:$0xff]   ;;  %v417_v50 = vmax.bf16 %v409_v27, %v368_v48 }
 0x12a   :  { %7964 = vmatprep.subr.bf16.mxu1 %v10644_v51  ;;  %v10695_v51 = vld [vmem:[#allocation6 + $0x9a4] ss:$16 sps:$4 sm:$0xff]  }
 0x12b   :  { %7389 = vmatpush1.bf16.msra.mxu0 %v10633_v5  ;;  %v10704_v5 = vld [vmem:[#allocation6 + $0x5cc] ss:$16 sps:$4 sm:$0xff]   ;;  %v466_v54 = vmax.bf16 %v458_v49, %v417_v50  ;;  %v10750_v49 = vld [vmem:[#allocation6 + $0x6c8] ss:$16 sps:$4 sm:$0xff]   ;;  %v10741_v50 = vld [vmem:[#allocation6 + $0xaa0] ss:$16 sps:$4 sm:$0xff]  }
 0x12c   :  { %7390 = vmatprep.subr.bf16.mxu0 %v10641_v59  ;;  %v10702_v59 = vld [vmem:[#allocation6 + $0x5c8] ss:$16 sps:$4 sm:$0xff]  }
 0x12d   :  { %7965 = vmatpush1.bf16.msra.mxu1 %v10642_v55  ;;  %v556_v55 = vld [vmem:[#allocation3 + $0x2a8] sm:$0xff] }
 0x12e   :  { %7966 = vmatprep.subr.bf16.mxu1 %v10650_v57  ;;  %v515_v57 = vmax.bf16 %v507_v53, %v466_v54  ;;  %v263_v54 = vld [vmem:[#allocation3 + $0x130] sm:$0xff] }
 0x12f   :  { %7391 = vmatpush1.bf16.msra.mxu0 %v10639_v61  ;;  %v605_v61 = vld [vmem:[#allocation3 + $0x2e8] sm:$0xff] }
 0x130   :  { %7392 = vmatprep.subr.bf16.mxu0 %v10647_v2  ;;  %v654_v2 = vld [vmem:[#allocation3 + $0x328] sm:$0xff] }
 0x131   :  { %7967 = vmatpush1.bf16.msra.mxu1 %v10648_v63  ;;  %v10710_v63 = vld [vmem:[#allocation6 + $0x5ec] ss:$16 sps:$4 sm:$0xff]  }
 0x132   :  { %7968 = vmatprep.subr.bf16.mxu1 %v10656_v0  ;;  %v564_v0 = vmax.bf16 %v556_v55, %v515_v57  ;;  %v10747_v55 = vld [vmem:[#allocation6 + $0xac0] ss:$16 sps:$4 sm:$0xff]   ;;  %v10755_v57 = vld [vmem:[#allocation6 + $0xae4] ss:$16 sps:$4 sm:$0xff]  }
 0x133   :  { %7393 = vmatpush1.bf16.msra.mxu0 %v10645_v3  ;;  %v10699_v3 = vld [vmem:[#allocation6 + $0x9c0] ss:$16 sps:$4 sm:$0xff]  }
 0x134   :  { %7394 = vmatprep.subr.bf16.mxu0 %v10653_v8  ;;  %v10708_v8 = vld [vmem:[#allocation6 + $0x5e8] ss:$16 sps:$4 sm:$0xff]  }
 0x135   :  { %7969 = vmatpush1.bf16.msra.mxu1 %v10654_v4  ;;  %v613_v4 = vmax.bf16 %v605_v61, %v564_v0  ;;  %v10764_v61 = vld [vmem:[#allocation6 + $0x70c] ss:$16 sps:$4 sm:$0xff]   ;;  %v361_v0 = vld [vmem:[#allocation3 + $0x1b0] sm:$0xff] }
 0x136   :  { %7970 = vmatprep.subr.bf16.mxu1 %v10662_v6  ;;  %v10707_v6 = vld [vmem:[#allocation6 + $0x9e4] ss:$16 sps:$4 sm:$0xff]  }
 0x137   :  { %7395 = vmatpush1.bf16.msra.mxu0 %v10651_v9  ;;  %v703_v9 = vld [vmem:[#allocation3 + $0x368] sm:$0xff] }
 0x138   :  { %7396 = vmatprep.subr.bf16.mxu0 %v10659_v12  ;;  %v752_v12 = vld [vmem:[#allocation3 + $0x3a8] sm:$0xff] }
 0x139   :  { %7971 = vmatpush1.bf16.msra.mxu1 %v10660_v10  ;;  %v10716_v10 = vld [vmem:[#allocation6 + $0x60c] ss:$16 sps:$4 sm:$0xff]  }
 0x13a   :  { %7972 = vmatprep.subr.bf16.mxu1 %v10668_v11  ;;  %v662_v11 = vmax.bf16 %v654_v2, %v613_v4  ;;  %v10753_v2 = vld [vmem:[#allocation6 + $0xae0] ss:$16 sps:$4 sm:$0xff]   ;;  %v10762_v4 = vld [vmem:[#allocation6 + $0x708] ss:$16 sps:$4 sm:$0xff]  }
 0x13b   :  { %7397 = vmatpush1.bf16.msra.mxu0 %v10657_v13  ;;  %v10705_v13 = vld [vmem:[#allocation6 + $0x9e0] ss:$16 sps:$4 sm:$0xff]  }
 0x13c   :  { %7398 = vmatprep.subr.bf16.mxu0 %v10665_v16  ;;  %v801_v16 = vld [vmem:[#allocation3 + $0x3e8] sm:$0xff] }
 0x13d   :  { %7973 = vmatpush1.bf16.msra.mxu1 %v10666_v14  ;;  %v711_v14 = vmax.bf16 %v703_v9, %v662_v11 }
 0x13e   :  { %7974 = vmatprep.subr.bf16.mxu1 %v10674_v15  ;;  %v10714_v15 = vld [vmem:[#allocation6 + $0x608] ss:$16 sps:$4 sm:$0xff]  }
 0x13f   :  { %7399 = vmatpush1.bf16.msra.mxu0 %v10663_v17  ;;  %v10722_v17 = vld [vmem:[#allocation6 + $0x62c] ss:$16 sps:$4 sm:$0xff]  }
 0x140   :  { %7400 = vmatprep.subr.bf16.mxu0 %v10671_v20 }
 0x141   :  { %7975 = vmatpush1.bf16.msra.mxu1 %v10672_v18  ;;  %v760_v18 = vmax.bf16 %v752_v12, %v711_v14  ;;  %v459_v12 = vld [vmem:[#allocation3 + $0x230] sm:$0xff]  ;;  %v10768_v14 = vld [vmem:[#allocation6 + $0x728] ss:$16 sps:$4 sm:$0xff]  }
 0x142   :  { %7976 = vmatprep.subr.bf16.mxu1 %v10680_v19  ;;  %v10713_v19 = vld [vmem:[#allocation6 + $0xa04] ss:$16 sps:$4 sm:$0xff]  }
 0x143   :  { %7401 = vmatpush1.bf16.msra.mxu0 %v10669_v28  ;;  %v12368_v20 = vmax.bf16 %v801_v16, %v760_v18  ;;  %v10726_v28 = vld [vmem:[#allocation6 + $0x648] ss:$16 sps:$4 sm:$0xff]   ;;  %v10767_v16 = vld [vmem:[#allocation6 + $0xb24] ss:$16 sps:$4 sm:$0xff]  }
 0x144   :  { %7402 = vmatprep.subr.bf16.mxu0 %v10677_v31  ;;  %v10740_v31 = vld [vmem:[#allocation6 + $0x68c] ss:$16 sps:$4 sm:$0xff]   ;;  %v508_v18 = vld [vmem:[#allocation3 + $0x270] sm:$0xff] }
 0x145   :  { %7977 = vmatpush1.bf16.msra.mxu1 %v10678_v25  ;;  %v10719_v25 = vld [vmem:[#allocation6 + $0xa24] ss:$16 sps:$4 sm:$0xff]   ;;  %v12377_v26 = vcombine.high %v12368_v20, %v12368_v20 }
 0x146   :  { %7978 = vmatprep.subr.bf16.mxu1 %v10686_v29  ;;  %v10725_v29 = vld [vmem:[#allocation6 + $0xa44] ss:$16 sps:$4 sm:$0xff]  }
 0x147   :  { %7403 = vmatpush1.bf16.msra.mxu0 %v10675_v34  ;;  %v10729_v34 = vld [vmem:[#allocation6 + $0xa60] ss:$16 sps:$4 sm:$0xff]  }
 0x148   :  { %7404 = vmatprep.subr.bf16.mxu0 %v10683_v36  ;;  %v10746_v36 = vld [vmem:[#allocation6 + $0x6ac] ss:$16 sps:$4 sm:$0xff]  }
 0x149   :  { %7979 = vmatpush1.bf16.msra.mxu1 %v10684_v37  ;;  %v10737_v37 = vld [vmem:[#allocation6 + $0xa84] ss:$16 sps:$4 sm:$0xff]  }
 0x14a   :  { %7980 = vmatprep.subr.bf16.mxu1 %v10692_v39  ;;  %v10744_v39 = vld [vmem:[#allocation6 + $0x6a8] ss:$16 sps:$4 sm:$0xff]  }
 0x14b   :  { %7405 = vmatpush1.bf16.msra.mxu0 %v10681_v41  ;;  %v10743_v41 = vld [vmem:[#allocation6 + $0xaa4] ss:$16 sps:$4 sm:$0xff]  }
 0x14c   :  { %7406 = vmatprep.subr.bf16.mxu0 %v10689_v44  ;;  %v116_v44 = vld [vmem:[#allocation3 + $0x70] sm:$0xff] }
 0x14d   :  { %7981 = vmatpush1.bf16.msra.mxu1 %v10690_v45  ;;  %v124_v27 = vmax.bf16 %v116_v44, %v91_v43  ;;  %v10791_v43 = vld [vmem:[#allocation6 + $0xba4] ss:$16 sps:$4 sm:$0xff]  }
 0x14e   :  { %7982 = vmatprep.subr.bf16.mxu1 %v10698_v46  ;;  %v165_v46 = vld [vmem:[#allocation3 + $0xb0] sm:$0xff] }
 0x14f   :  { %7407 = vmatpush1.bf16.msra.mxu0 %v10687_v62  ;;  %v214_v62 = vld [vmem:[#allocation3 + $0xf0] sm:$0xff]  ;;  %v173_v53 = vmax.bf16 %v165_v46, %v124_v27 }
 0x150   :  { %7408 = vmatprep.subr.bf16.mxu0 %v10695_v51  ;;  %v704_v27 = vld [vmem:[#allocation3 + $0x370] sm:$0xff] }
 0x151   :  { %7983 = vmatpush1.bf16.msra.mxu1 %v10696_v52  ;;  %v10758_v52 = vld [vmem:[#allocation6 + $0x6ec] ss:$16 sps:$4 sm:$0xff]   ;;  %v10789_v46 = vld [vmem:[#allocation6 + $0xba0] ss:$16 sps:$4 sm:$0xff]  }
 0x152   :  { %7984 = vmatprep.subr.bf16.mxu1 %v10704_v5  ;;  %v10749_v5 = vld [vmem:[#allocation6 + $0xac4] ss:$16 sps:$4 sm:$0xff]  }
 0x153   :  { %7409 = vmatpush1.bf16.msra.mxu0 %v10693_v56  ;;  %v222_v56 = vmax.bf16 %v214_v62, %v173_v53  ;;  %v10797_v62 = vld [vmem:[#allocation6 + $0xbc4] ss:$16 sps:$4 sm:$0xff]   ;;  %v10804_v53 = vld [vmem:[#allocation6 + $0x7e8] ss:$16 sps:$4 sm:$0xff]  }
 0x154   :  { %7410 = vmatprep.subr.bf16.mxu0 %v10701_v58  ;;  %v10756_v58 = vld [vmem:[#allocation6 + $0x6e8] ss:$16 sps:$4 sm:$0xff]  }
 0x155   :  { %7985 = vmatpush1.bf16.msra.mxu1 %v10702_v59  ;;  %v312_v59 = vld [vmem:[#allocation3 + $0x170] sm:$0xff] }
 0x156   :  { %7986 = vmatprep.subr.bf16.mxu1 %v10710_v63  ;;  %v271_v63 = vmax.bf16 %v263_v54, %v222_v56  ;;  %v10803_v54 = vld [vmem:[#allocation6 + $0xbe4] ss:$16 sps:$4 sm:$0xff]  }
 0x157   :  { %7411 = vmatpush1.bf16.msra.mxu0 %v10699_v3  ;;  %v802_v56 = vld [vmem:[#allocation3 + $0x3f0] sm:$0xff] }
 0x158   :  { %7412 = vmatprep.subr.bf16.mxu0 %v10707_v6  ;;  %v320_v3 = vmax.bf16 %v312_v59, %v271_v63  ;;  %v410_v6 = vld [vmem:[#allocation3 + $0x1f0] sm:$0xff]  ;;  %v10818_v59 = vld [vmem:[#allocation6 + $0x82c] ss:$16 sps:$4 sm:$0xff]  }
 0x159   :  { %7987 = vmatpush1.bf16.msra.mxu1 %v10708_v8  ;;  %v10770_v8 = vld [vmem:[#allocation6 + $0x72c] ss:$16 sps:$4 sm:$0xff]  }
 0x15a   :  { %7997 = vmatprep.subr.bf16.mxu1 %v10716_v10  ;;  %v369_v9 = vmax.bf16 %v361_v0, %v320_v3  ;;  %v10761_v10 = vld [vmem:[#allocation6 + $0xb04] ss:$16 sps:$4 sm:$0xff]   ;;  %v10807_v0 = vld [vmem:[#allocation6 + $0xc00] ss:$16 sps:$4 sm:$0xff]   ;;  %v10816_v3 = vld [vmem:[#allocation6 + $0x828] ss:$16 sps:$4 sm:$0xff]  }
 0x15b   :  { %7413 = vmatpush1.bf16.msra.mxu0 %v10705_v13  ;;  %v10759_v13 = vld [vmem:[#allocation6 + $0xb00] ss:$16 sps:$4 sm:$0xff]  }
 0x15c   :  { %7989 = vmatmul.mubr.bf16.vlgmr.msra.gmra.mrb[4].mxu1 %v12342_v42  ;;  %7423 = vmatprep.subr.bf16.mxu0 %v10713_v19  ;;  %v10717_v42 = vld [vmem:[#allocation6 + $0xa20] ss:$16 sps:$4 sm:$0xff]   ;;  %v418_v11 = vmax.bf16 %v410_v6, %v369_v9  ;;  %v10815_v6 = vld [vmem:[#allocation6 + $0xc24] ss:$16 sps:$4 sm:$0xff]   ;;  %v92_v9 = vld [vmem:[#allocation3 + $0x38] sm:$0xff] }
 0x15d   :  { %7998 = vmatpush1.bf16.msra.mxu1 %v10714_v15  ;;  %8029 = vmatprep.mubr.bf16.mxu1 %v12350_v47  ;;  %v10723_v47 = vld [vmem:[#allocation6 + $0xa40] ss:$16 sps:$4 sm:$0xff]   ;;  %v10776_v15 = vld [vmem:[#allocation6 + $0x74c] ss:$16 sps:$4 sm:$0xff]  }
 0x15e   :  { %7999 = vmatprep.subr.bf16.mxu1 %v10722_v17  ;;  %7415 = vmatmul.mubr.bf16.vlgmr.msra.gmra.mrb[0].mxu0 %v12372_v22  ;;  %v467_v17 = vmax.bf16 %v459_v12, %v418_v11  ;;  %v10765_v19 = vld [vmem:[#allocation6 + $0xb20] ss:$16 sps:$4 sm:$0xff]   ;;  %v10830_v11 = vld [vmem:[#allocation6 + $0x86c] ss:$16 sps:$4 sm:$0xff]  }
 0x15f   :  { %7424 = vmatpush1.bf16.msra.mxu0 %v10711_v21  ;;  %7455 = vmatprep.mubr.bf16.mxu0 %v12377_v26  ;;  %v10774_v21 = vld [vmem:[#allocation6 + $0x748] ss:$16 sps:$4 sm:$0xff]  }
 0x160   :  { %7425 = vmatprep.subr.bf16.mxu0 %v10719_v25  ;;  %v516_v25 = vmax.bf16 %v508_v18, %v467_v17  ;;  %v10827_v17 = vld [vmem:[#allocation6 + $0xc64] ss:$16 sps:$4 sm:$0xff]  }
 0x161   :  { %8000 = vmatpush1.bf16.msra.mxu1 %v10720_v23  ;;  %v10782_v23 = vld [vmem:[#allocation6 + $0x76c] ss:$16 sps:$4 sm:$0xff]  }
 0x162   :  { %8001 = vmatprep.subr.bf16.mxu1 %v10728_v24  ;;  %v10773_v24 = vld [vmem:[#allocation6 + $0xb44] ss:$16 sps:$4 sm:$0xff]  }
 0x163   :  { %7426 = vmatpush1.bf16.msra.mxu0 %v10717_v42  ;;  %v557_v42 = vld [vmem:[#allocation3 + $0x2b0] sm:$0xff] }
 0x164   :  { %7427 = vmatprep.subr.bf16.mxu0 %v10725_v29  ;;  %v10788_v29 = vld [vmem:[#allocation6 + $0x78c] ss:$16 sps:$4 sm:$0xff]  }
 0x165   :  { %8002 = vmatpush1.bf16.msra.mxu1 %v10726_v28  ;;  %v10771_v28 = vld [vmem:[#allocation6 + $0xb40] ss:$16 sps:$4 sm:$0xff]  }
 0x166   :  { %8003 = vmatprep.subr.bf16.mxu1 %v10734_v60  ;;  %v10780_v60 = vld [vmem:[#allocation6 + $0x768] ss:$16 sps:$4 sm:$0xff]  }
 0x167   :  { %7428 = vmatpush1.bf16.msra.mxu0 %v10723_v47  ;;  %v10779_v47 = vld [vmem:[#allocation6 + $0xb64] ss:$16 sps:$4 sm:$0xff]  }
 0x168   :  { %7429 = vmatprep.subr.bf16.mxu0 %v10731_v33  ;;  %v10777_v33 = vld [vmem:[#allocation6 + $0xb60] ss:$16 sps:$4 sm:$0xff]  }
 0x169   :  { %8004 = vmatpush1.bf16.msra.mxu1 %v10732_v30  ;;  %v565_v30 = vmax.bf16 %v557_v42, %v516_v25  ;;  %v10833_v25 = vld [vmem:[#allocation6 + $0xc84] ss:$16 sps:$4 sm:$0xff]  }
 0x16a   :  { %8005 = vmatprep.subr.bf16.mxu1 %v10740_v31  ;;  %v606_v31 = vld [vmem:[#allocation3 + $0x2f0] sm:$0xff] }
 0x16b   :  { %7430 = vmatpush1.bf16.msra.mxu0 %v10729_v34  ;;  %v10786_v34 = vld [vmem:[#allocation6 + $0x788] ss:$16 sps:$4 sm:$0xff]  }
 0x16c   :  { %7431 = vmatprep.subr.bf16.mxu0 %v10737_v37  ;;  %v614_v37 = vmax.bf16 %v606_v31, %v565_v30  ;;  %v10839_v30 = vld [vmem:[#allocation6 + $0xca4] ss:$16 sps:$4 sm:$0xff]  }
 0x16d   :  { %8006 = vmatpush1.bf16.msra.mxu1 %v10738_v35  ;;  %v10794_v35 = vld [vmem:[#allocation6 + $0x7ac] ss:$16 sps:$4 sm:$0xff]  }
 0x16e   :  { %8007 = vmatprep.subr.bf16.mxu1 %v10746_v36  ;;  %v10785_v36 = vld [vmem:[#allocation6 + $0xb84] ss:$16 sps:$4 sm:$0xff]  }
 0x16f   :  { %v12381_v7 = vpop.f32.mrb[0].mxu1  ;;  %7432 = vmatpush1.bf16.msra.mxu0 %v10735_v38  ;;  %v655_v38 = vld [vmem:[#allocation3 + $0x330] sm:$0xff] }
 0x170   :  { %v12383_v45 = vpop.f32.mrb[1].mxu1  ;;  %7433 = vmatprep.subr.bf16.mxu0 %v10743_v41  ;;  %v10800_v41 = vld [vmem:[#allocation6 + $0x7cc] ss:$16 sps:$4 sm:$0xff]   ;;  %v663_v44 = vmax.bf16 %v655_v38, %v614_v37  ;;  %v10845_v37 = vld [vmem:[#allocation6 + $0xcc4] ss:$16 sps:$4 sm:$0xff]  }
 0x171   :  { %v7256_v48 = vpop.f32.mrb[2].mxu1  ;;  %8008 = vmatpush1.bf16.msra.mxu1 %v10744_v39  ;;  %v10783_v39 = vld [vmem:[#allocation6 + $0xb80] ss:$16 sps:$4 sm:$0xff]  }
 0x172   :  { %v7257_v51 = vpop.f32.mrb[3].mxu1  ;;  %8009 = vmatprep.subr.bf16.mxu1 %v10752_v40  ;;  %v10792_v40 = vld [vmem:[#allocation6 + $0x7a8] ss:$16 sps:$4 sm:$0xff]  }
 0x173   :  { %7434 = vmatpush1.bf16.msra.mxu0 %v10741_v50  ;;  %v10798_v48 = vld [vmem:[#allocation6 + $0x7c8] ss:$16 sps:$4 sm:$0xff]   ;;  %v712_v50 = vmax.bf16 %v704_v27, %v663_v44  ;;  %v753_v51 = vld [vmem:[#allocation3 + $0x3b0] sm:$0xff]  ;;  %v10860_v44 = vld [vmem:[#allocation6 + $0x90c] ss:$16 sps:$4 sm:$0xff]  }
 0x174   :  { %7435 = vmatprep.subr.bf16.mxu0 %v10749_v5  ;;  %v10812_v5 = vld [vmem:[#allocation6 + $0x80c] ss:$16 sps:$4 sm:$0xff]   ;;  %v10858_v27 = vld [vmem:[#allocation6 + $0x908] ss:$16 sps:$4 sm:$0xff]  }
 0x175   :  { %8010 = vmatpush1.bf16.msra.mxu1 %v10750_v49  ;;  %v10806_v49 = vld [vmem:[#allocation6 + $0x7ec] ss:$16 sps:$4 sm:$0xff]  }
 0x176   :  { %8011 = vmatprep.subr.bf16.mxu1 %v10758_v52  ;;  %v10795_v52 = vld [vmem:[#allocation6 + $0xbc0] ss:$16 sps:$4 sm:$0xff]  }
 0x177   :  { %7436 = vmatpush1.bf16.msra.mxu0 %v10747_v55  ;;  %v761_v55 = vmax.bf16 %v753_v51, %v712_v50  ;;  %v10866_v50 = vld [vmem:[#allocation6 + $0x92c] ss:$16 sps:$4 sm:$0xff]   ;;  %v10864_v51 = vld [vmem:[#allocation6 + $0x928] ss:$16 sps:$4 sm:$0xff]  }
 0x178   :  { %7437 = vmatprep.subr.bf16.mxu0 %v10755_v57  ;;  %v10801_v57 = vld [vmem:[#allocation6 + $0xbe0] ss:$16 sps:$4 sm:$0xff]  }
 0x179   :  { %8012 = vmatpush1.bf16.msra.mxu1 %v10756_v58  ;;  %v10810_v58 = vld [vmem:[#allocation6 + $0x808] ss:$16 sps:$4 sm:$0xff]   ;;  %v12385_v63 = vmax.bf16 %v802_v56, %v761_v55  ;;  %v10872_v55 = vld [vmem:[#allocation6 + $0x94c] ss:$16 sps:$4 sm:$0xff]  }
 0x17a   :  { %8013 = vmatprep.subr.bf16.mxu1 %v10764_v61  ;;  %v10809_v61 = vld [vmem:[#allocation6 + $0xc04] ss:$16 sps:$4 sm:$0xff]   ;;  %v10870_v56 = vld [vmem:[#allocation6 + $0x948] ss:$16 sps:$4 sm:$0xff]  }
 0x17b   :  { %7438 = vmatpush1.bf16.msra.mxu0 %v10753_v2  ;;  %v12390_v2 = vcombine.low %v12368_v20, %v12368_v20  ;;  %v10822_v20 = vld [vmem:[#allocation6 + $0x848] ss:$16 sps:$4 sm:$0xff]  }
 0x17c   :  { %7439 = vmatprep.subr.bf16.mxu0 %v10761_v10  ;;  %v10813_v10 = vld [vmem:[#allocation6 + $0xc20] ss:$16 sps:$4 sm:$0xff]  }
 0x17d   :  { %8014 = vmatpush1.bf16.msra.mxu1 %v10762_v4  ;;  %v10824_v4 = vld [vmem:[#allocation6 + $0x84c] ss:$16 sps:$4 sm:$0xff]  }
 0x17e   :  { %8015 = vmatprep.subr.bf16.mxu1 %v10770_v8  ;;  %v12395_v8 = vcombine.high %v12385_v63, %v12385_v63 }
 0x17f   :  { %7440 = vmatpush1.bf16.msra.mxu0 %v10759_v13  ;;  %v166_v13 = vld [vmem:[#allocation3 + $0xb8] sm:$0xff] }
 0x180   :  { %7441 = vmatprep.subr.bf16.mxu0 %v10767_v16  ;;  %v10836_v16 = vld [vmem:[#allocation6 + $0x88c] ss:$16 sps:$4 sm:$0xff]  }
 0x181   :  { %8016 = vmatpush1.bf16.msra.mxu1 %v10768_v14  ;;  %v10819_v14 = vld [vmem:[#allocation6 + $0xc40] ss:$16 sps:$4 sm:$0xff]  }
 0x182   :  { %8017 = vmatprep.subr.bf16.mxu1 %v10776_v15  ;;  %v10828_v15 = vld [vmem:[#allocation6 + $0x868] ss:$16 sps:$4 sm:$0xff]  }
 0x183   :  { %7442 = vmatpush1.bf16.msra.mxu0 %v10765_v19  ;;  %v215_v19 = vld [vmem:[#allocation3 + $0xf8] sm:$0xff] }
 0x184   :  { %7443 = vmatprep.subr.bf16.mxu0 %v10773_v24  ;;  %v10842_v24 = vld [vmem:[#allocation6 + $0x8ac] ss:$16 sps:$4 sm:$0xff]  }
 0x185   :  { %8018 = vmatpush1.bf16.msra.mxu1 %v10774_v21  ;;  %v10825_v21 = vld [vmem:[#allocation6 + $0xc60] ss:$16 sps:$4 sm:$0xff]  }
 0x186   :  { %8019 = vmatprep.subr.bf16.mxu1 %v10782_v23  ;;  %v10834_v23 = vld [vmem:[#allocation6 + $0x888] ss:$16 sps:$4 sm:$0xff]  }
 0x187   :  { %7444 = vmatpush1.bf16.msra.mxu0 %v10771_v28  ;;  %v264_v28 = vld [vmem:[#allocation3 + $0x138] sm:$0xff] }
 0x188   :  { %7445 = vmatprep.subr.bf16.mxu0 %v10779_v47  ;;  %v10848_v47 = vld [vmem:[#allocation6 + $0x8cc] ss:$16 sps:$4 sm:$0xff]  }
 0x189   :  { %8020 = vmatpush1.bf16.msra.mxu1 %v10780_v60  ;;  %v10831_v60 = vld [vmem:[#allocation6 + $0xc80] ss:$16 sps:$4 sm:$0xff]  }
 0x18a   :  { %8021 = vmatprep.subr.bf16.mxu1 %v10788_v29  ;;  %v10840_v29 = vld [vmem:[#allocation6 + $0x8a8] ss:$16 sps:$4 sm:$0xff]  }
 0x18b   :  { %7446 = vmatpush1.bf16.msra.mxu0 %v10777_v33  ;;  %v313_v33 = vld [vmem:[#allocation3 + $0x178] sm:$0xff] }
 0x18c   :  { %7447 = vmatprep.subr.bf16.mxu0 %v10785_v36  ;;  %v10854_v36 = vld [vmem:[#allocation6 + $0x8ec] ss:$16 sps:$4 sm:$0xff]  }
 0x18d   :  { %8022 = vmatpush1.bf16.msra.mxu1 %v10786_v34  ;;  %v10837_v34 = vld [vmem:[#allocation6 + $0xca0] ss:$16 sps:$4 sm:$0xff]  }
 0x18e   :  { %8023 = vmatprep.subr.bf16.mxu1 %v10794_v35  ;;  %v10846_v35 = vld [vmem:[#allocation6 + $0x8c8] ss:$16 sps:$4 sm:$0xff]  }
 0x18f   :  { %7448 = vmatpush1.bf16.msra.mxu0 %v10783_v39  ;;  %v10843_v39 = vld [vmem:[#allocation6 + $0xcc0] ss:$16 sps:$4 sm:$0xff]  }
 0x190   :  { %7449 = vmatprep.subr.bf16.mxu0 %v10791_v43  ;;  %v10851_v43 = vld [vmem:[#allocation6 + $0xce4] ss:$16 sps:$4 sm:$0xff]  }
 0x191   :  { %8024 = vmatpush1.bf16.msra.mxu1 %v10792_v40  ;;  %v10852_v40 = vld [vmem:[#allocation6 + $0x8e8] ss:$16 sps:$4 sm:$0xff]  }
 0x192   :  { %8025 = vmatprep.subr.bf16.mxu1 %v10800_v41  ;;  %v362_v41 = vld [vmem:[#allocation3 + $0x1b8] sm:$0xff] }
 0x193   :  { %7450 = vmatpush1.bf16.msra.mxu0 %v10789_v46 }
 0x194   :  { %7451 = vmatprep.subr.bf16.mxu0 %v10797_v62  ;;  %v10857_v62 = vld [vmem:[#allocation6 + $0xd04] ss:$16 sps:$4 sm:$0xff]  }
 0x195   :  { %8026 = vmatpush1.bf16.msra.mxu1 %v10798_v48  ;;  %v411_v48 = vld [vmem:[#allocation3 + $0x1f8] sm:$0xff] }
 0x196   :  { %8027 = vmatprep.subr.bf16.mxu1 %v10806_v49  ;;  %v10849_v49 = vld [vmem:[#allocation6 + $0xce0] ss:$16 sps:$4 sm:$0xff]  }
 0x197   :  { %7452 = vmatpush1.bf16.msra.mxu0 %v10795_v52 }
 0x198   :  { %7453 = vmatprep.subr.bf16.mxu0 %v10803_v54  ;;  %v10863_v54 = vld [vmem:[#allocation6 + $0xd24] ss:$16 sps:$4 sm:$0xff]  }
 0x199   :  { %8028 = vmatpush1.bf16.msra.mxu1 %v10804_v53  ;;  %v460_v53 = vld [vmem:[#allocation3 + $0x238] sm:$0xff] }
 0x19a   :  { %8038 = vmatprep.subr.bf16.mxu1 %v10812_v5  ;;  %v10855_v5 = vld [vmem:[#allocation6 + $0xd00] ss:$16 sps:$4 sm:$0xff]  }
 0x19b   :  { %7454 = vmatpush1.bf16.msra.mxu0 %v10801_v57 }
 0x19c   :  { %8030 = vmatmul.mubr.bf16.vlgmr.msra.gmra.mrb[4].mxu1 %v12356_v32  ;;  %7464 = vmatprep.subr.bf16.mxu0 %v10809_v61  ;;  %v117_v32 = vld [vmem:[#allocation3 + $0x78] sm:$0xff]  ;;  %v10869_v61 = vld [vmem:[#allocation6 + $0xd44] ss:$16 sps:$4 sm:$0xff]  }
 0x19d   :  { %8039 = vmatpush1.bf16.msra.mxu1 %v10810_v58  ;;  %8070 = vmatprep.mubr.bf16.mxu1 %v12364_v1  ;;  %v10821_v1 = vld [vmem:[#allocation6 + $0xc44] ss:$16 sps:$4 sm:$0xff]   ;;  %v125_v12 = vmax.bf16 %v117_v32, %v92_v9  ;;  %v509_v58 = vld [vmem:[#allocation3 + $0x278] sm:$0xff]  ;;  %v10867_v9 = vld [vmem:[#allocation6 + $0xd40] ss:$16 sps:$4 sm:$0xff]  }
 0x19e   :  { %8040 = vmatprep.subr.bf16.mxu1 %v10818_v59  ;;  %7456 = vmatmul.mubr.bf16.vlgmr.msra.gmra.mrb[0].mxu0 %v12390_v2  ;;  %v10861_v59 = vld [vmem:[#allocation6 + $0xd20] ss:$16 sps:$4 sm:$0xff]   ;;  %v10875_v32 = vld [vmem:[#allocation6 + $0xd64] ss:$16 sps:$4 sm:$0xff]  }
 0x19f   :  { %7465 = vmatpush1.bf16.msra.mxu0 %v10807_v0  ;;  %7496 = vmatprep.mubr.bf16.mxu0 %v12395_v8  ;;  %v174_v18 = vmax.bf16 %v166_v13, %v125_v12  ;;  %v10878_v0 = vld [vmem:[#allocation6 + $0x96c] ss:$16 sps:$4 sm:$0xff]   ;;  %v10873_v12 = vld [vmem:[#allocation6 + $0xd60] ss:$16 sps:$4 sm:$0xff]   ;;  %v10881_v13 = vld [vmem:[#allocation6 + $0xd84] ss:$16 sps:$4 sm:$0xff]  }
 0x1a0   :  { %7466 = vmatprep.subr.bf16.mxu0 %v10815_v6  ;;  %v558_v6 = vld [vmem:[#allocation3 + $0x2b8] sm:$0xff] }
 0x1a1   :  { %8041 = vmatpush1.bf16.msra.mxu1 %v10816_v3  ;;  %v223_v42 = vmax.bf16 %v215_v19, %v174_v18  ;;  %v10876_v3 = vld [vmem:[#allocation6 + $0x968] ss:$16 sps:$4 sm:$0xff]   ;;  %v10879_v18 = vld [vmem:[#allocation6 + $0xd80] ss:$16 sps:$4 sm:$0xff]   ;;  %v10887_v19 = vld [vmem:[#allocation6 + $0xda4] ss:$16 sps:$4 sm:$0xff]  }
 0x1a2   :  { %8042 = vmatprep.subr.bf16.mxu1 %v10824_v4 }
 0x1a3   :  { %7467 = vmatpush1.bf16.msra.mxu0 %v10813_v10  ;;  %v272_v31 = vmax.bf16 %v264_v28, %v223_v42  ;;  %v10882_v10 = vld [vmem:[#allocation6 + $0x988] ss:$16 sps:$4 sm:$0xff]   ;;  %v10885_v42 = vld [vmem:[#allocation6 + $0xda0] ss:$16 sps:$4 sm:$0xff]   ;;  %v10893_v28 = vld [vmem:[#allocation6 + $0xdc4] ss:$16 sps:$4 sm:$0xff]  }
 0x1a4   :  { %7468 = vmatprep.subr.bf16.mxu0 %v10821_v1  ;;  %v607_v1 = vld [vmem:[#allocation3 + $0x2f8] sm:$0xff] }
 0x1a5   :  { %8043 = vmatpush1.bf16.msra.mxu1 %v10822_v20  ;;  %v321_v38 = vmax.bf16 %v313_v33, %v272_v31  ;;  %v10884_v20 = vld [vmem:[#allocation6 + $0x98c] ss:$16 sps:$4 sm:$0xff]   ;;  %v10891_v31 = vld [vmem:[#allocation6 + $0xdc0] ss:$16 sps:$4 sm:$0xff]   ;;  %v10899_v33 = vld [vmem:[#allocation6 + $0xde4] ss:$16 sps:$4 sm:$0xff]  }
 0x1a6   :  { %8044 = vmatprep.subr.bf16.mxu1 %v10830_v11 }
 0x1a7   :  { %7469 = vmatpush1.bf16.msra.mxu0 %v10819_v14  ;;  %v370_v46 = vmax.bf16 %v362_v41, %v321_v38  ;;  %v10890_v14 = vld [vmem:[#allocation6 + $0x9ac] ss:$16 sps:$4 sm:$0xff]   ;;  %v10897_v38 = vld [vmem:[#allocation6 + $0xde0] ss:$16 sps:$4 sm:$0xff]   ;;  %v10912_v41 = vld [vmem:[#allocation6 + $0xa28] ss:$16 sps:$4 sm:$0xff]  }
 0x1a8   :  { %7470 = vmatprep.subr.bf16.mxu0 %v10827_v17  ;;  %v656_v17 = vld [vmem:[#allocation3 + $0x338] sm:$0xff] }
 0x1a9   :  { %8045 = vmatpush1.bf16.msra.mxu1 %v10828_v15  ;;  %v419_v52 = vmax.bf16 %v411_v48, %v370_v46  ;;  %v10888_v15 = vld [vmem:[#allocation6 + $0x9a8] ss:$16 sps:$4 sm:$0xff]   ;;  %v10920_v46 = vld [vmem:[#allocation6 + $0xa4c] ss:$16 sps:$4 sm:$0xff]   ;;  %v10911_v48 = vld [vmem:[#allocation6 + $0xe24] ss:$16 sps:$4 sm:$0xff]  }
 0x1aa   :  { %8046 = vmatprep.subr.bf16.mxu1 %v10836_v16 }
 0x1ab   :  { %7471 = vmatpush1.bf16.msra.mxu0 %v10825_v21  ;;  %v468_v57 = vmax.bf16 %v460_v53, %v419_v52  ;;  %v10896_v21 = vld [vmem:[#allocation6 + $0x9cc] ss:$16 sps:$4 sm:$0xff]   ;;  %v10917_v53 = vld [vmem:[#allocation6 + $0xe44] ss:$16 sps:$4 sm:$0xff]  }
 0x1ac   :  { %7472 = vmatprep.subr.bf16.mxu0 %v10833_v25  ;;  %v705_v25 = vld [vmem:[#allocation3 + $0x378] sm:$0xff] }
 0x1ad   :  { %8047 = vmatpush1.bf16.msra.mxu1 %v10834_v23  ;;  %v517_v4 = vmax.bf16 %v509_v58, %v468_v57  ;;  %v10894_v23 = vld [vmem:[#allocation6 + $0x9c8] ss:$16 sps:$4 sm:$0xff]   ;;  %v10926_v52 = vld [vmem:[#allocation6 + $0xa6c] ss:$16 sps:$4 sm:$0xff]   ;;  %v10915_v57 = vld [vmem:[#allocation6 + $0xe40] ss:$16 sps:$4 sm:$0xff]  }
 0x1ae   :  { %8048 = vmatprep.subr.bf16.mxu1 %v10842_v24  ;;  %v10932_v58 = vld [vmem:[#allocation6 + $0xa8c] ss:$16 sps:$4 sm:$0xff]  }
 0x1af   :  { %7473 = vmatpush1.bf16.msra.mxu0 %v10831_v60  ;;  %v566_v11 = vmax.bf16 %v558_v6, %v517_v4  ;;  %v10902_v60 = vld [vmem:[#allocation6 + $0x9ec] ss:$16 sps:$4 sm:$0xff]   ;;  %v10921_v6 = vld [vmem:[#allocation6 + $0xe60] ss:$16 sps:$4 sm:$0xff]  }
 0x1b0   :  { %7474 = vmatprep.subr.bf16.mxu0 %v10839_v30  ;;  %v754_v30 = vld [vmem:[#allocation3 + $0x3b8] sm:$0xff] }
 0x1b1   :  { %8049 = vmatpush1.bf16.msra.mxu1 %v10840_v29  ;;  %v615_v16 = vmax.bf16 %v607_v1, %v566_v11  ;;  %v10900_v29 = vld [vmem:[#allocation6 + $0x9e8] ss:$16 sps:$4 sm:$0xff]   ;;  %v12425_v11 = vld [vmem:[#allocation3 + $0x100] sm:$0xff] }
 0x1b2   :  { %8050 = vmatprep.subr.bf16.mxu1 %v10848_v47  ;;  %v274_v1 = vunpack.c.h.bf16 %v12425_v11 }
 0x1b3   :  { %7475 = vmatpush1.bf16.msra.mxu0 %v10837_v34  ;;  %v664_v24 = vmax.bf16 %v656_v17, %v615_v16  ;;  %v10908_v34 = vld [vmem:[#allocation6 + $0xa0c] ss:$16 sps:$4 sm:$0xff]   ;;  %v12428_v17 = vld [vmem:[#allocation3 + $0x140] sm:$0xff] }
 0x1b4   :  { %7476 = vmatprep.subr.bf16.mxu0 %v10845_v37  ;;  %v803_v37 = vld [vmem:[#allocation3 + $0x3f8] sm:$0xff] }
 0x1b5   :  { %8051 = vmatpush1.bf16.msra.mxu1 %v10846_v35  ;;  %v713_v47 = vmax.bf16 %v705_v25, %v664_v24  ;;  %v10906_v35 = vld [vmem:[#allocation6 + $0xa08] ss:$16 sps:$4 sm:$0xff]  }
 0x1b6   :  { %8052 = vmatprep.subr.bf16.mxu1 %v10854_v36  ;;  %v10948_v24 = vld [vmem:[#allocation6 + $0xae8] ss:$16 sps:$4 sm:$0xff]  }
 0x1b7   :  { %7477 = vmatpush1.bf16.msra.mxu0 %v10843_v39  ;;  %v762_v36 = vmax.bf16 %v754_v30, %v713_v47  ;;  %v10914_v39 = vld [vmem:[#allocation6 + $0xa2c] ss:$16 sps:$4 sm:$0xff]   ;;  %v10947_v47 = vld [vmem:[#allocation6 + $0xee4] ss:$16 sps:$4 sm:$0xff]   ;;  %v10954_v30 = vld [vmem:[#allocation6 + $0xb08] ss:$16 sps:$4 sm:$0xff]  }
 0x1b8   :  { %7478 = vmatprep.subr.bf16.mxu0 %v10851_v43 }
 0x1b9   :  { %8053 = vmatpush1.bf16.msra.mxu1 %v10852_v40  ;;  %v10905_v40 = vld [vmem:[#allocation6 + $0xe04] ss:$16 sps:$4 sm:$0xff]   ;;  %v12399_v43 = vmax.bf16 %v803_v37, %v762_v36  ;;  %v10962_v36 = vld [vmem:[#allocation6 + $0xb2c] ss:$16 sps:$4 sm:$0xff]  }
 0x1ba   :  { %8054 = vmatprep.subr.bf16.mxu1 %v10860_v44  ;;  %v12404_v44 = vcombine.low %v12385_v63, %v12385_v63  ;;  %v12414_v63 = vld [vmem:[#allocation3 + $0x40] sm:$0xff] }
 0x1bb   :  { %7479 = vmatpush1.bf16.msra.mxu0 %v10849_v49  ;;  %v10918_v49 = vld [vmem:[#allocation6 + $0xa48] ss:$16 sps:$4 sm:$0xff]   ;;  %v10953_v37 = vld [vmem:[#allocation6 + $0xf04] ss:$16 sps:$4 sm:$0xff]  }
 0x1bc   :  { %7480 = vmatprep.subr.bf16.mxu0 %v10857_v62  ;;  %v12409_v62 = vcombine.high %v12399_v43, %v12399_v43 }
 0x1bd   :  { %8055 = vmatpush1.bf16.msra.mxu1 %v10858_v27  ;;  %v10903_v27 = vld [vmem:[#allocation6 + $0xe00] ss:$16 sps:$4 sm:$0xff]  }
 0x1be   :  { %8056 = vmatprep.subr.bf16.mxu1 %v10866_v50  ;;  %v12411_v50 = vld [vmem:[#allocation3] sm:$0xff] }
 0x1bf   :  { %7481 = vmatpush1.bf16.msra.mxu0 %v10855_v5  ;;  %v10924_v5 = vld [vmem:[#allocation6 + $0xa68] ss:$16 sps:$4 sm:$0xff]  }
 0x1c0   :  { %7482 = vmatprep.subr.bf16.mxu0 %v10863_v54 }
 0x1c1   :  { %8057 = vmatpush1.bf16.msra.mxu1 %v10864_v51  ;;  %v127_v51 = vunpack.c.h.bf16 %v12414_v63 }
 0x1c2   :  { %8058 = vmatprep.subr.bf16.mxu1 %v10872_v55  ;;  %v12419_v55 = vld [vmem:[#allocation3 + $0x80] sm:$0xff] }
 0x1c3   :  { %7483 = vmatpush1.bf16.msra.mxu0 %v10861_v59  ;;  %v10923_v59 = vld [vmem:[#allocation6 + $0xe64] ss:$16 sps:$4 sm:$0xff]  }
 0x1c4   :  { %7484 = vmatprep.subr.bf16.mxu0 %v10869_v61  ;;  %v10930_v61 = vld [vmem:[#allocation6 + $0xa88] ss:$16 sps:$4 sm:$0xff]  }
 0x1c5   :  { %8059 = vmatpush1.bf16.msra.mxu1 %v10870_v56  ;;  %v176_v56 = vunpack.c.h.bf16 %v12419_v55 }
 0x1c6   :  { %8060 = vmatprep.subr.bf16.mxu1 %v10878_v0 }
 0x1c7   :  { %7485 = vmatpush1.bf16.msra.mxu0 %v10867_v9  ;;  %v10938_v9 = vld [vmem:[#allocation6 + $0xaac] ss:$16 sps:$4 sm:$0xff]  }
 0x1c8   :  { %7486 = vmatprep.subr.bf16.mxu0 %v10875_v32  ;;  %v10929_v32 = vld [vmem:[#allocation6 + $0xe84] ss:$16 sps:$4 sm:$0xff]  }
 0x1c9   :  { %8061 = vmatpush1.bf16.msra.mxu1 %v10876_v3  ;;  %v12422_v3 = vld [vmem:[#allocation3 + $0xc0] sm:$0xff] }
 0x1ca   :  { %8062 = vmatprep.subr.bf16.mxu1 %v10884_v20  ;;  %v225_v4 = vunpack.c.h.bf16 %v12422_v3  ;;  %v10936_v20 = vld [vmem:[#allocation6 + $0xaa8] ss:$16 sps:$4 sm:$0xff]  }
 0x1cb   :  { %7487 = vmatpush1.bf16.msra.mxu0 %v10873_v12  ;;  %v10927_v12 = vld [vmem:[#allocation6 + $0xe80] ss:$16 sps:$4 sm:$0xff]  }
 0x1cc   :  { %7488 = vmatprep.subr.bf16.mxu0 %v10881_v13  ;;  %v10944_v13 = vld [vmem:[#allocation6 + $0xacc] ss:$16 sps:$4 sm:$0xff]  }
 0x1cd   :  { %8063 = vmatpush1.bf16.msra.mxu1 %v10882_v10 }
 0x1ce   :  { %8064 = vmatprep.subr.bf16.mxu1 %v10890_v14  ;;  %v10935_v14 = vld [vmem:[#allocation6 + $0xea4] ss:$16 sps:$4 sm:$0xff]  }
 0x1cf   :  { %7489 = vmatpush1.bf16.msra.mxu0 %v10879_v18  ;;  %v323_v18 = vunpack.c.h.bf16 %v12428_v17 }
 0x1d0   :  { %7490 = vmatprep.subr.bf16.mxu0 %v10887_v19  ;;  %v10933_v19 = vld [vmem:[#allocation6 + $0xea0] ss:$16 sps:$4 sm:$0xff]  }
 0x1d1   :  { %8065 = vmatpush1.bf16.msra.mxu1 %v10888_v15  ;;  %v10942_v15 = vld [vmem:[#allocation6 + $0xac8] ss:$16 sps:$4 sm:$0xff]  }
 0x1d2   :  { %8066 = vmatprep.subr.bf16.mxu1 %v10896_v21  ;;  %v10950_v21 = vld [vmem:[#allocation6 + $0xaec] ss:$16 sps:$4 sm:$0xff]  }
 0x1d3   :  { %7491 = vmatpush1.bf16.msra.mxu0 %v10885_v42  ;;  %v12431_v42 = vld [vmem:[#allocation3 + $0x180] sm:$0xff] }
 0x1d4   :  { %7492 = vmatprep.subr.bf16.mxu0 %v10893_v28  ;;  %v372_v28 = vunpack.c.h.bf16 %v12431_v42 }
 0x1d5   :  { %8067 = vmatpush1.bf16.msra.mxu1 %v10894_v23  ;;  %v10941_v23 = vld [vmem:[#allocation6 + $0xec4] ss:$16 sps:$4 sm:$0xff]  }
 0x1d6   :  { %8068 = vmatprep.subr.bf16.mxu1 %v10902_v60  ;;  %v10939_v60 = vld [vmem:[#allocation6 + $0xec0] ss:$16 sps:$4 sm:$0xff]  }
 0x1d7   :  { %7493 = vmatpush1.bf16.msra.mxu0 %v10891_v31 }
 0x1d8   :  { %7494 = vmatprep.subr.bf16.mxu0 %v10899_v33  ;;  %v12434_v33 = vld [vmem:[#allocation3 + $0x1c0] sm:$0xff] }
 0x1d9   :  { %8069 = vmatpush1.bf16.msra.mxu1 %v10900_v29  ;;  %v10956_v29 = vld [vmem:[#allocation6 + $0xb0c] ss:$16 sps:$4 sm:$0xff]  }
 0x1da   :  { %8079 = vmatprep.subr.bf16.mxu1 %v10908_v34  ;;  %v421_v34 = vunpack.c.h.bf16 %v12434_v33 }
 0x1db   :  { %7495 = vmatpush1.bf16.msra.mxu0 %v10897_v38  ;;  %v10960_v38 = vld [vmem:[#allocation6 + $0xb28] ss:$16 sps:$4 sm:$0xff]  }
 0x1dc   :  { %8071 = vmatmul.mubr.bf16.vlgmr.msra.gmra.mrb[4].mxu1 %v12372_v22  ;;  %7505 = vmatprep.subr.bf16.mxu0 %v10905_v40  ;;  %v94_v22 = vunpack.c.h.bf16 %v12411_v50  ;;  %v12437_v40 = vld [vmem:[#allocation3 + $0x200] sm:$0xff] }
 0x1dd   :  { %8080 = vmatpush1.bf16.msra.mxu1 %v10906_v35  ;;  %8111 = vmatprep.mubr.bf16.mxu1 %v12377_v26  ;;  %v10909_v26 = vld [vmem:[#allocation6 + $0xe20] ss:$16 sps:$4 sm:$0xff]  }
 0x1de   :  { %8081 = vmatprep.subr.bf16.mxu1 %v10914_v39  ;;  %7497 = vmatmul.mubr.bf16.vlgmr.msra.gmra.mrb[0].mxu0 %v12404_v44  ;;  %v143_v54 = vadd.f32 %v127_v51, %v94_v22  ;;  %v10945_v35 = vld [vmem:[#allocation6 + $0xee0] ss:$16 sps:$4 sm:$0xff]  }
 0x1df   :  { %7506 = vmatpush1.bf16.msra.mxu0 %v10903_v27  ;;  %7537 = vmatprep.mubr.bf16.mxu0 %v12409_v62  ;;  %v10951_v27 = vld [vmem:[#allocation6 + $0xf00] ss:$16 sps:$4 sm:$0xff]  }
 0x1e0   :  { %7507 = vmatprep.subr.bf16.mxu0 %v10911_v48  ;;  %v192_v0 = vadd.f32 %v176_v56, %v143_v54  ;;  %v10959_v48 = vld [vmem:[#allocation6 + $0xf24] ss:$16 sps:$4 sm:$0xff]   ;;  %v10972_v54 = vld [vmem:[#allocation6 + $0xb68] ss:$16 sps:$4 sm:$0xff]  }
 0x1e1   :  { %8082 = vmatpush1.bf16.msra.mxu1 %v10912_v41  ;;  %v470_v41 = vunpack.c.h.bf16 %v12437_v40  ;;  %v12440_v51 = vld [vmem:[#allocation3 + $0x240] sm:$0xff] }
 0x1e2   :  { %8083 = vmatprep.subr.bf16.mxu1 %v10920_v46  ;;  %v241_v10 = vadd.f32 %v225_v4, %v192_v0  ;;  %v10968_v46 = vld [vmem:[#allocation6 + $0xb4c] ss:$16 sps:$4 sm:$0xff]   ;;  %v10971_v0 = vld [vmem:[#allocation6 + $0xf64] ss:$16 sps:$4 sm:$0xff]   ;;  %v10978_v4 = vld [vmem:[#allocation6 + $0xb88] ss:$16 sps:$4 sm:$0xff]  }
 0x1e3   :  { %7508 = vmatpush1.bf16.msra.mxu0 %v10909_v26  ;;  %v519_v26 = vunpack.c.h.bf16 %v12440_v51 }
 0x1e4   :  { %7509 = vmatprep.subr.bf16.mxu0 %v10917_v53  ;;  %v290_v16 = vadd.f32 %v274_v1, %v241_v10  ;;  %v10974_v53 = vld [vmem:[#allocation6 + $0xb6c] ss:$16 sps:$4 sm:$0xff]   ;;  %v10977_v1 = vld [vmem:[#allocation6 + $0xf84] ss:$16 sps:$4 sm:$0xff]  }
 0x1e5   :  { %8084 = vmatpush1.bf16.msra.mxu1 %v10918_v49  ;;  %v10966_v49 = vld [vmem:[#allocation6 + $0xb48] ss:$16 sps:$4 sm:$0xff]   ;;  %v10986_v10 = vld [vmem:[#allocation6 + $0xbac] ss:$16 sps:$4 sm:$0xff]  }
 0x1e6   :  { %8085 = vmatprep.subr.bf16.mxu1 %v10926_v52  ;;  %v339_v25 = vadd.f32 %v323_v18, %v290_v16  ;;  %v10957_v52 = vld [vmem:[#allocation6 + $0xf20] ss:$16 sps:$4 sm:$0xff]   ;;  %v10992_v18 = vld [vmem:[#allocation6 + $0xbcc] ss:$16 sps:$4 sm:$0xff]  }
 0x1e7   :  { %7510 = vmatpush1.bf16.msra.mxu0 %v10915_v57  ;;  %v12443_v57 = vld [vmem:[#allocation3 + $0x280] sm:$0xff] }
 0x1e8   :  { %7511 = vmatprep.subr.bf16.mxu0 %v10923_v59  ;;  %v388_v31 = vadd.f32 %v372_v28, %v339_v25  ;;  %v10963_v59 = vld [vmem:[#allocation6 + $0xf40] ss:$16 sps:$4 sm:$0xff]  }
 0x1e9   :  { %8086 = vmatpush1.bf16.msra.mxu1 %v10924_v5  ;;  %v10965_v5 = vld [vmem:[#allocation6 + $0xf44] ss:$16 sps:$4 sm:$0xff]   ;;  %v10975_v16 = vld [vmem:[#allocation6 + $0xf80] ss:$16 sps:$4 sm:$0xff]  }
 0x1ea   :  { %8087 = vmatprep.subr.bf16.mxu1 %v10932_v58  ;;  %v437_v39 = vadd.f32 %v421_v34, %v388_v31  ;;  %v568_v58 = vunpack.c.h.bf16 %v12443_v57  ;;  %v10981_v28 = vld [vmem:[#allocation6 + $0xfa0] ss:$16 sps:$4 sm:$0xff]  }
 0x1eb   :  { %7512 = vmatpush1.bf16.msra.mxu0 %v10921_v6  ;;  %v12455_v31 = vld [vmem:[#allocation3 + $0x380] sm:$0xff] }
 0x1ec   :  { %7513 = vmatprep.subr.bf16.mxu0 %v10929_v32  ;;  %v486_v22 = vadd.f32 %v470_v41, %v437_v39  ;;  %v764_v34 = vunpack.c.h.bf16 %v12455_v31  ;;  %v12458_v41 = vld [vmem:[#allocation3 + $0x3c0] sm:$0xff] }
 0x1ed   :  { %8088 = vmatpush1.bf16.msra.mxu1 %v10930_v61  ;;  %v10980_v61 = vld [vmem:[#allocation6 + $0xb8c] ss:$16 sps:$4 sm:$0xff]  }
 0x1ee   :  { %8089 = vmatprep.subr.bf16.mxu1 %v10938_v9  ;;  %v535_v56 = vadd.f32 %v519_v26, %v486_v22  ;;  %v12446_v9 = vld [vmem:[#allocation3 + $0x2c0] sm:$0xff]  ;;  %v11008_v22 = vld [vmem:[#allocation6 + $0xc28] ss:$16 sps:$4 sm:$0xff]  }
 0x1ef   :  { %7514 = vmatpush1.bf16.msra.mxu0 %v10927_v12  ;;  %v617_v32 = vunpack.c.h.bf16 %v12446_v9  ;;  %v10984_v12 = vld [vmem:[#allocation6 + $0xba8] ss:$16 sps:$4 sm:$0xff]  }
 0x1f0   :  { %7515 = vmatprep.subr.bf16.mxu0 %v10935_v14  ;;  %v584_v6 = vadd.f32 %v568_v58, %v535_v56  ;;  %v12449_v14 = vld [vmem:[#allocation3 + $0x300] sm:$0xff]  ;;  %v11016_v56 = vld [vmem:[#allocation6 + $0xc4c] ss:$16 sps:$4 sm:$0xff]  }
 0x1f1   :  { %8090 = vmatpush1.bf16.msra.mxu1 %v10936_v20  ;;  %v10969_v20 = vld [vmem:[#allocation6 + $0xf60] ss:$16 sps:$4 sm:$0xff]   ;;  %v11007_v58 = vld [vmem:[#allocation6 + $0x1024] ss:$16 sps:$4 sm:$0xff]  }
 0x1f2   :  { %8091 = vmatprep.subr.bf16.mxu1 %v10944_v13  ;;  %v633_v13 = vadd.f32 %v617_v32, %v584_v6  ;;  %v11022_v6 = vld [vmem:[#allocation6 + $0xc6c] ss:$16 sps:$4 sm:$0xff]   ;;  %v11013_v32 = vld [vmem:[#allocation6 + $0x1044] ss:$16 sps:$4 sm:$0xff]  }
 0x1f3   :  { %7516 = vmatpush1.bf16.msra.mxu0 %v10933_v19  ;;  %v10983_v19 = vld [vmem:[#allocation6 + $0xfa4] ss:$16 sps:$4 sm:$0xff]  }
 0x1f4   :  { %7517 = vmatprep.subr.bf16.mxu0 %v10941_v23 }
 0x1f5   :  { %8092 = vmatpush1.bf16.msra.mxu1 %v10942_v15  ;;  %v666_v15 = vunpack.c.h.bf16 %v12449_v14 }
 0x1f6   :  { %8093 = vmatprep.subr.bf16.mxu1 %v10950_v21  ;;  %v10990_v21 = vld [vmem:[#allocation6 + $0xbc8] ss:$16 sps:$4 sm:$0xff]  }
 0x1f7   :  { %7518 = vmatpush1.bf16.msra.mxu0 %v10939_v60  ;;  %v682_v23 = vadd.f32 %v666_v15, %v633_v13  ;;  %v10998_v60 = vld [vmem:[#allocation6 + $0xbec] ss:$16 sps:$4 sm:$0xff]   ;;  %v11011_v15 = vld [vmem:[#allocation6 + $0x1040] ss:$16 sps:$4 sm:$0xff]  }
 0x1f8   :  { %7519 = vmatprep.subr.bf16.mxu0 %v10947_v47  ;;  %v10996_v47 = vld [vmem:[#allocation6 + $0xbe8] ss:$16 sps:$4 sm:$0xff]  }
 0x1f9   :  { %8094 = vmatpush1.bf16.msra.mxu1 %v10948_v24  ;;  %v12452_v24 = vld [vmem:[#allocation3 + $0x340] sm:$0xff] }
 0x1fa   :  { %8095 = vmatprep.subr.bf16.mxu1 %v10956_v29  ;;  %v715_v25 = vunpack.c.h.bf16 %v12452_v24  ;;  %v10989_v29 = vld [vmem:[#allocation6 + $0xfc4] ss:$16 sps:$4 sm:$0xff]  }
 0x1fb   :  { %7520 = vmatpush1.bf16.msra.mxu0 %v10945_v35  ;;  %v10987_v35 = vld [vmem:[#allocation6 + $0xfc0] ss:$16 sps:$4 sm:$0xff]  }
 0x1fc   :  { %7521 = vmatprep.subr.bf16.mxu0 %v10953_v37  ;;  %v10995_v37 = vld [vmem:[#allocation6 + $0xfe4] ss:$16 sps:$4 sm:$0xff]  }
 0x1fd   :  { %8096 = vmatpush1.bf16.msra.mxu1 %v10954_v30  ;;  %v731_v30 = vadd.f32 %v715_v25, %v682_v23  ;;  %v12484_v23 = vld [vmem:[#allocation3 + $0xc8] sm:$0xff] }
 0x1fe   :  { %8097 = vmatprep.subr.bf16.mxu1 %v10962_v36  ;;  %v11004_v36 = vld [vmem:[#allocation6 + $0xc0c] ss:$16 sps:$4 sm:$0xff]   ;;  %v227_v25 = vunpack.c.h.bf16 %v12484_v23 }
 0x1ff   :  { %7522 = vmatpush1.bf16.msra.mxu0 %v10951_v27  ;;  %v780_v39 = vadd.f32 %v764_v34, %v731_v30  ;;  %v813_v27 = vunpack.c.h.bf16 %v12458_v41  ;;  %v11032_v30 = vld [vmem:[#allocation6 + $0xca8] ss:$16 sps:$4 sm:$0xff]  }
 0x200   :  { %7523 = vmatprep.subr.bf16.mxu0 %v10959_v48  ;;  %v11010_v48 = vld [vmem:[#allocation6 + $0xc2c] ss:$16 sps:$4 sm:$0xff]  }
 0x201   :  { %8098 = vmatpush1.bf16.msra.mxu1 %v10960_v38  ;;  %v11002_v38 = vld [vmem:[#allocation6 + $0xc08] ss:$16 sps:$4 sm:$0xff]   ;;  %v829_v26 = vadd.f32 %v813_v27, %v780_v39  ;;  %v11040_v39 = vld [vmem:[#allocation6 + $0xccc] ss:$16 sps:$4 sm:$0xff]   ;;  %v11031_v27 = vld [vmem:[#allocation6 + $0x10a4] ss:$16 sps:$4 sm:$0xff]  }
 0x202   :  { %8099 = vmatprep.subr.bf16.mxu1 %v10968_v46  ;;  %v10993_v46 = vld [vmem:[#allocation6 + $0xfe0] ss:$16 sps:$4 sm:$0xff]  }
 0x203   :  { %7524 = vmatpush1.bf16.msra.mxu0 %v10957_v52  ;;  %v93_v52 = vunpack.c.l.bf16 %v12411_v50 }
 0x204   :  { %7525 = vmatprep.subr.bf16.mxu0 %v10965_v5  ;;  %v12466_v5 = vcombine.low %v12399_v43, %v12399_v43 }
 0x205   :  { %8100 = vmatpush1.bf16.msra.mxu1 %v10966_v49  ;;  %v11001_v49 = vld [vmem:[#allocation6 + $0x1004] ss:$16 sps:$4 sm:$0xff]  }
 0x206   :  { %8101 = vmatprep.subr.bf16.mxu1 %v10974_v53  ;;  %v126_v53 = vunpack.c.l.bf16 %v12414_v63  ;;  %v12474_v63 = vld [vmem:[#allocation3 + $0x48] sm:$0xff] }
 0x207   :  { %7526 = vmatpush1.bf16.msra.mxu0 %v10963_v59  ;;  %v11014_v59 = vld [vmem:[#allocation6 + $0xc48] ss:$16 sps:$4 sm:$0xff]   ;;  %v129_v43 = vunpack.c.h.bf16 %v12474_v63 }
 0x208   :  { %7527 = vmatprep.subr.bf16.mxu0 %v10971_v0  ;;  %v175_v0 = vunpack.c.l.bf16 %v12419_v55  ;;  %v224_v55 = vunpack.c.l.bf16 %v12422_v3  ;;  %v11017_v3 = vld [vmem:[#allocation6 + $0x1060] ss:$16 sps:$4 sm:$0xff]  }
 0x209   :  { %8102 = vmatpush1.bf16.msra.mxu1 %v10972_v54  ;;  %v10999_v54 = vld [vmem:[#allocation6 + $0x1000] ss:$16 sps:$4 sm:$0xff]  }
 0x20a   :  { %8103 = vmatprep.subr.bf16.mxu1 %v10980_v61  ;;  %v12469_v61 = vpack.c.bf16 %v829_v26, %v829_v26  ;;  %v371_v26 = vunpack.c.l.bf16 %v12431_v42  ;;  %v11035_v42 = vld [vmem:[#allocation6 + $0x10c0] ss:$16 sps:$4 sm:$0xff]  }
 0x20b   :  { %7528 = vmatpush1.bf16.msra.mxu0 %v10969_v20  ;;  %v11020_v20 = vld [vmem:[#allocation6 + $0xc68] ss:$16 sps:$4 sm:$0xff]  }
 0x20c   :  { %7529 = vmatprep.subr.bf16.mxu0 %v10977_v1  ;;  %v12480_v1 = vld [vmem:[#allocation3 + $0x88] sm:$0xff] }
 0x20d   :  { %8104 = vmatpush1.bf16.msra.mxu1 %v10978_v4  ;;  %v11005_v4 = vld [vmem:[#allocation6 + $0x1020] ss:$16 sps:$4 sm:$0xff]  }
 0x20e   :  { %8105 = vmatprep.subr.bf16.mxu1 %v10986_v10 }
 0x20f   :  { %7530 = vmatpush1.bf16.msra.mxu0 %v10975_v16  ;;  %v11028_v16 = vld [vmem:[#allocation6 + $0xc8c] ss:$16 sps:$4 sm:$0xff]  }
 0x210   :  { %7531 = vmatprep.subr.bf16.mxu0 %v10983_v19  ;;  %v11026_v19 = vld [vmem:[#allocation6 + $0xc88] ss:$16 sps:$4 sm:$0xff]  }
 0x211   :  { %8106 = vmatpush1.bf16.msra.mxu1 %v10984_v12  ;;  %v178_v12 = vunpack.c.h.bf16 %v12480_v1 }
 0x212   :  { %8107 = vmatprep.subr.bf16.mxu1 %v10992_v18  ;;  %v11019_v18 = vld [vmem:[#allocation6 + $0x1064] ss:$16 sps:$4 sm:$0xff]  }
 0x213   :  { %7532 = vmatpush1.bf16.msra.mxu0 %v10981_v28  ;;  %v273_v28 = vunpack.c.l.bf16 %v12425_v11  ;;  %v11023_v11 = vld [vmem:[#allocation6 + $0x1080] ss:$16 sps:$4 sm:$0xff]  }
 0x214   :  { %7533 = vmatprep.subr.bf16.mxu0 %v10989_v29  ;;  %v11034_v29 = vld [vmem:[#allocation6 + $0xcac] ss:$16 sps:$4 sm:$0xff]  }
 0x215   :  { %8108 = vmatpush1.bf16.msra.mxu1 %v10990_v21 }
 0x216   :  { %8109 = vmatprep.subr.bf16.mxu1 %v10998_v60 }
 0x217   :  { %7534 = vmatpush1.bf16.msra.mxu0 %v10987_v35  ;;  %v12488_v35 = vld [vmem:[#allocation3 + $0x108] sm:$0xff] }
 0x218   :  { %7535 = vmatprep.subr.bf16.mxu0 %v10995_v37  ;;  %v322_v37 = vunpack.c.l.bf16 %v12428_v17  ;;  %v11029_v17 = vld [vmem:[#allocation6 + $0x10a0] ss:$16 sps:$4 sm:$0xff]  }
 0x219   :  { %8110 = vmatpush1.bf16.msra.mxu1 %v10996_v47  ;;  %v11025_v47 = vld [vmem:[#allocation6 + $0x1084] ss:$16 sps:$4 sm:$0xff]  }
 0x21a   :  { %8120 = vmatprep.subr.bf16.mxu1 %v11004_v36  ;;  %v276_v36 = vunpack.c.h.bf16 %v12488_v35 }
 0x21b   :  { %7536 = vmatpush1.bf16.msra.mxu0 %v10993_v46  ;;  %v11038_v46 = vld [vmem:[#allocation6 + $0xcc8] ss:$16 sps:$4 sm:$0xff]  }
 0x21c   :  { %8112 = vmatmul.mubr.bf16.vlgmr.msra.gmra.mrb[4].mxu1 %v12390_v2  ;;  %7546 = vmatprep.subr.bf16.mxu0 %v11001_v49  ;;  %v12471_v2 = vld [vmem:[#allocation3 + $0x8] sm:$0xff] }
 0x21d   :  { %8121 = vmatpush1.bf16.msra.mxu1 %v11002_v38  ;;  %8152 = vmatprep.mubr.bf16.mxu1 %v12395_v8  ;;  %v96_v50 = vunpack.c.h.bf16 %v12471_v2  ;;  %v142_v8 = vadd.f32 %v126_v53, %v93_v52  ;;  %v12492_v49 = vld [vmem:[#allocation3 + $0x148] sm:$0xff] }
 0x21e   :  { %8122 = vmatprep.subr.bf16.mxu1 %v11010_v48  ;;  %7538 = vmatmul.mubr.bf16.vlgmr.msra.gmra.mrb[0].mxu0 %v12466_v5  ;;  %v11046_v53 = vld [vmem:[#allocation6 + $0xcec] ss:$16 sps:$4 sm:$0xff]  }
 0x21f   :  { %7547 = vmatpush1.bf16.msra.mxu0 %v10999_v54  ;;  %7578 = vmatprep.mubr.bf16.mxu0 %v12469_v61  ;;  %v145_v10 = vadd.f32 %v129_v43, %v96_v50  ;;  %v191_v13 = vadd.f32 %v175_v0, %v142_v8  ;;  %v11037_v54 = vld [vmem:[#allocation6 + $0x10c4] ss:$16 sps:$4 sm:$0xff]   ;;  %v420_v43 = vunpack.c.l.bf16 %v12434_v33  ;;  %v11052_v8 = vld [vmem:[#allocation6 + $0xd0c] ss:$16 sps:$4 sm:$0xff]   ;;  %v11041_v33 = vld [vmem:[#allocation6 + $0x10e0] ss:$16 sps:$4 sm:$0xff]  }
 0x220   :  { %7548 = vmatprep.subr.bf16.mxu0 %v11007_v58 }
 0x221   :  { %8123 = vmatpush1.bf16.msra.mxu1 %v11008_v22  ;;  %v194_v21 = vadd.f32 %v178_v12, %v145_v10  ;;  %v240_v60 = vadd.f32 %v224_v55, %v191_v13  ;;  %v325_v22 = vunpack.c.h.bf16 %v12492_v49  ;;  %v469_v12 = vunpack.c.l.bf16 %v12437_v40  ;;  %v11058_v13 = vld [vmem:[#allocation6 + $0xd2c] ss:$16 sps:$4 sm:$0xff]   ;;  %v11047_v40 = vld [vmem:[#allocation6 + $0x1100] ss:$16 sps:$4 sm:$0xff]  }
 0x222   :  { %8124 = vmatprep.subr.bf16.mxu1 %v11016_v56  ;;  %v11044_v56 = vld [vmem:[#allocation6 + $0xce8] ss:$16 sps:$4 sm:$0xff]  }
 0x223   :  { %7549 = vmatpush1.bf16.msra.mxu0 %v11005_v4  ;;  %v243_v34 = vadd.f32 %v227_v25, %v194_v21  ;;  %v289_v38 = vadd.f32 %v273_v28, %v240_v60  ;;  %v11043_v4 = vld [vmem:[#allocation6 + $0x10e4] ss:$16 sps:$4 sm:$0xff]   ;;  %v518_v25 = vunpack.c.l.bf16 %v12440_v51  ;;  %v11064_v60 = vld [vmem:[#allocation6 + $0xd4c] ss:$16 sps:$4 sm:$0xff]   ;;  %v11053_v51 = vld [vmem:[#allocation6 + $0x1120] ss:$16 sps:$4 sm:$0xff]  }
 0x224   :  { %7550 = vmatprep.subr.bf16.mxu0 %v11013_v32 }
 0x225   :  { %8125 = vmatpush1.bf16.msra.mxu1 %v11014_v59  ;;  %v292_v48 = vadd.f32 %v276_v36, %v243_v34  ;;  %v338_v52 = vadd.f32 %v322_v37, %v289_v38  ;;  %v12496_v59 = vld [vmem:[#allocation3 + $0x188] sm:$0xff]  ;;  %v567_v36 = vunpack.c.l.bf16 %v12443_v57  ;;  %v11059_v57 = vld [vmem:[#allocation6 + $0x1140] ss:$16 sps:$4 sm:$0xff]  }
 0x226   :  { %8126 = vmatprep.subr.bf16.mxu1 %v11022_v6  ;;  %v374_v50 = vunpack.c.h.bf16 %v12496_v59  ;;  %v11050_v6 = vld [vmem:[#allocation6 + $0xd08] ss:$16 sps:$4 sm:$0xff]   ;;  %v11070_v38 = vld [vmem:[#allocation6 + $0xd6c] ss:$16 sps:$4 sm:$0xff]  }
 0x227   :  { %7551 = vmatpush1.bf16.msra.mxu0 %v11011_v15  ;;  %v341_v58 = vadd.f32 %v325_v22, %v292_v48  ;;  %v387_v0 = vadd.f32 %v371_v26, %v338_v52  ;;  %v11049_v15 = vld [vmem:[#allocation6 + $0x1104] ss:$16 sps:$4 sm:$0xff]   ;;  %v616_v22 = vunpack.c.l.bf16 %v12446_v9  ;;  %v11076_v52 = vld [vmem:[#allocation6 + $0xd8c] ss:$16 sps:$4 sm:$0xff]   ;;  %v11065_v9 = vld [vmem:[#allocation6 + $0x1160] ss:$16 sps:$4 sm:$0xff]  }
 0x228   :  { %7552 = vmatprep.subr.bf16.mxu0 %v11019_v18 }
 0x229   :  { %8127 = vmatpush1.bf16.msra.mxu1 %v11020_v20  ;;  %v390_v32 = vadd.f32 %v374_v50, %v341_v58  ;;  %v12500_v20 = vld [vmem:[#allocation3 + $0x1c8] sm:$0xff]  ;;  %v436_v55 = vadd.f32 %v420_v43, %v387_v0  ;;  %v665_v50 = vunpack.c.l.bf16 %v12449_v14  ;;  %v11071_v14 = vld [vmem:[#allocation6 + $0x1180] ss:$16 sps:$4 sm:$0xff]  }
 0x22a   :  { %8128 = vmatprep.subr.bf16.mxu1 %v11028_v16  ;;  %v423_v10 = vunpack.c.h.bf16 %v12500_v20  ;;  %v11056_v16 = vld [vmem:[#allocation6 + $0xd28] ss:$16 sps:$4 sm:$0xff]   ;;  %v11082_v0 = vld [vmem:[#allocation6 + $0xdac] ss:$16 sps:$4 sm:$0xff]  }
 0x22b   :  { %7553 = vmatpush1.bf16.msra.mxu0 %v11017_v3  ;;  %v485_v28 = vadd.f32 %v469_v12, %v436_v55  ;;  %v11055_v3 = vld [vmem:[#allocation6 + $0x1124] ss:$16 sps:$4 sm:$0xff]   ;;  %v11088_v55 = vld [vmem:[#allocation6 + $0xdcc] ss:$16 sps:$4 sm:$0xff]  }
 0x22c   :  { %7554 = vmatprep.subr.bf16.mxu0 %v11025_v47  ;;  %v439_v18 = vadd.f32 %v423_v10, %v390_v32  ;;  %v714_v10 = vunpack.c.l.bf16 %v12452_v24  ;;  %v11077_v24 = vld [vmem:[#allocation6 + $0x11a0] ss:$16 sps:$4 sm:$0xff]  }
 0x22d   :  { %8129 = vmatpush1.bf16.msra.mxu1 %v11026_v19  ;;  %v12504_v19 = vld [vmem:[#allocation3 + $0x208] sm:$0xff]  ;;  %v534_v37 = vadd.f32 %v518_v25, %v485_v28 }
 0x22e   :  { %8130 = vmatprep.subr.bf16.mxu1 %v11034_v29  ;;  %v472_v21 = vunpack.c.h.bf16 %v12504_v19  ;;  %v11062_v29 = vld [vmem:[#allocation6 + $0xd48] ss:$16 sps:$4 sm:$0xff]   ;;  %v11094_v28 = vld [vmem:[#allocation6 + $0xdec] ss:$16 sps:$4 sm:$0xff]  }
 0x22f   :  { %7555 = vmatpush1.bf16.msra.mxu0 %v11023_v11  ;;  %v11061_v11 = vld [vmem:[#allocation6 + $0x1144] ss:$16 sps:$4 sm:$0xff]   ;;  %v583_v26 = vadd.f32 %v567_v36, %v534_v37  ;;  %v11100_v37 = vld [vmem:[#allocation6 + $0xe0c] ss:$16 sps:$4 sm:$0xff]  }
 0x230   :  { %7556 = vmatprep.subr.bf16.mxu0 %v11031_v27  ;;  %v488_v47 = vadd.f32 %v472_v21, %v439_v18  ;;  %v763_v21 = vunpack.c.l.bf16 %v12455_v31  ;;  %v11083_v31 = vld [vmem:[#allocation6 + $0x11c0] ss:$16 sps:$4 sm:$0xff]  }
 0x231   :  { %8131 = vmatpush1.bf16.msra.mxu1 %v11032_v30  ;;  %v12508_v30 = vld [vmem:[#allocation3 + $0x248] sm:$0xff]  ;;  %v632_v43 = vadd.f32 %v616_v22, %v583_v26  ;;  %v11089_v22 = vld [vmem:[#allocation6 + $0x11e0] ss:$16 sps:$4 sm:$0xff]   ;;  %v11097_v26 = vld [vmem:[#allocation6 + $0x1204] ss:$16 sps:$4 sm:$0xff]  }
 0x232   :  { %8132 = vmatprep.subr.bf16.mxu1 %v11040_v39  ;;  %v521_v34 = vunpack.c.h.bf16 %v12508_v30  ;;  %v11068_v39 = vld [vmem:[#allocation6 + $0xd68] ss:$16 sps:$4 sm:$0xff]  }
 0x233   :  { %7557 = vmatpush1.bf16.msra.mxu0 %v11029_v17  ;;  %v11067_v17 = vld [vmem:[#allocation6 + $0x1164] ss:$16 sps:$4 sm:$0xff]   ;;  %v681_v12 = vadd.f32 %v665_v50, %v632_v43  ;;  %v11112_v50 = vld [vmem:[#allocation6 + $0xe4c] ss:$16 sps:$4 sm:$0xff]  }
 0x234   :  { %7558 = vmatprep.subr.bf16.mxu0 %v11037_v54  ;;  %v537_v27 = vadd.f32 %v521_v34, %v488_v47  ;;  %v812_v34 = vunpack.c.l.bf16 %v12458_v41  ;;  %v11106_v41 = vld [vmem:[#allocation6 + $0xe2c] ss:$16 sps:$4 sm:$0xff]   ;;  %v11103_v43 = vld [vmem:[#allocation6 + $0x1224] ss:$16 sps:$4 sm:$0xff]  }
 0x235   :  { %8133 = vmatpush1.bf16.msra.mxu1 %v11038_v46  ;;  %v12512_v46 = vld [vmem:[#allocation3 + $0x288] sm:$0xff]  ;;  %v730_v25 = vadd.f32 %v714_v10, %v681_v12  ;;  %v11109_v10 = vld [vmem:[#allocation6 + $0x1244] ss:$16 sps:$4 sm:$0xff]  }
 0x236   :  { %8134 = vmatprep.subr.bf16.mxu1 %v11046_v53  ;;  %v570_v48 = vunpack.c.h.bf16 %v12512_v46  ;;  %v11074_v53 = vld [vmem:[#allocation6 + $0xd88] ss:$16 sps:$4 sm:$0xff]  }
 0x237   :  { %7559 = vmatpush1.bf16.msra.mxu0 %v11035_v42  ;;  %v11073_v42 = vld [vmem:[#allocation6 + $0x1184] ss:$16 sps:$4 sm:$0xff]   ;;  %v779_v36 = vadd.f32 %v763_v21, %v730_v25  ;;  %v11116_v12 = vld [vmem:[#allocation6 + $0xe68] ss:$16 sps:$4 sm:$0xff]  }
 0x238   :  { %7560 = vmatprep.subr.bf16.mxu0 %v11043_v4  ;;  %v586_v54 = vadd.f32 %v570_v48, %v537_v27  ;;  %v11115_v21 = vld [vmem:[#allocation6 + $0x1264] ss:$16 sps:$4 sm:$0xff]   ;;  %v11122_v25 = vld [vmem:[#allocation6 + $0xe88] ss:$16 sps:$4 sm:$0xff]  }
 0x239   :  { %8135 = vmatpush1.bf16.msra.mxu1 %v11044_v56  ;;  %v12516_v56 = vld [vmem:[#allocation3 + $0x2c8] sm:$0xff]  ;;  %v828_v48 = vadd.f32 %v812_v34, %v779_v36  ;;  %v11121_v34 = vld [vmem:[#allocation6 + $0x1284] ss:$16 sps:$4 sm:$0xff]  }
 0x23a   :  { %8136 = vmatprep.subr.bf16.mxu1 %v11052_v8  ;;  %v619_v58 = vunpack.c.h.bf16 %v12516_v56  ;;  %v11080_v8 = vld [vmem:[#allocation6 + $0xda8] ss:$16 sps:$4 sm:$0xff]  }
 0x23b   :  { %7561 = vmatpush1.bf16.msra.mxu0 %v11041_v33  ;;  %v11079_v33 = vld [vmem:[#allocation6 + $0x11a4] ss:$16 sps:$4 sm:$0xff]   ;;  %v11128_v36 = vld [vmem:[#allocation6 + $0xea8] ss:$16 sps:$4 sm:$0xff]  }
 0x23c   :  { %7562 = vmatprep.subr.bf16.mxu0 %v11049_v15  ;;  %v635_v4 = vadd.f32 %v619_v58, %v586_v54  ;;  %v12538_v54 = vpack.c.bf16 %v828_v48, %v828_v48  ;;  %v11095_v58 = vld [vmem:[#allocation6 + $0x1200] ss:$16 sps:$4 sm:$0xff]   ;;  %v11127_v48 = vld [vmem:[#allocation6 + $0x12a4] ss:$16 sps:$4 sm:$0xff]  }
 0x23d   :  { %8137 = vmatpush1.bf16.msra.mxu1 %v11050_v6  ;;  %v12520_v6 = vld [vmem:[#allocation3 + $0x308] sm:$0xff] }
 0x23e   :  { %8138 = vmatprep.subr.bf16.mxu1 %v11058_v13  ;;  %v668_v32 = vunpack.c.h.bf16 %v12520_v6  ;;  %v11086_v13 = vld [vmem:[#allocation6 + $0xdc8] ss:$16 sps:$4 sm:$0xff]  }
 0x23f   :  { %7563 = vmatpush1.bf16.msra.mxu0 %v11047_v40  ;;  %v11085_v40 = vld [vmem:[#allocation6 + $0x11c4] ss:$16 sps:$4 sm:$0xff]  }
 0x240   :  { %7564 = vmatprep.subr.bf16.mxu0 %v11055_v3  ;;  %v684_v15 = vadd.f32 %v668_v32, %v635_v4  ;;  %v11101_v4 = vld [vmem:[#allocation6 + $0x1220] ss:$16 sps:$4 sm:$0xff]   ;;  %v11118_v32 = vld [vmem:[#allocation6 + $0xe6c] ss:$16 sps:$4 sm:$0xff]  }
 0x241   :  { %8139 = vmatpush1.bf16.msra.mxu1 %v11056_v16  ;;  %v12524_v16 = vld [vmem:[#allocation3 + $0x348] sm:$0xff] }
 0x242   :  { %8140 = vmatprep.subr.bf16.mxu1 %v11064_v60  ;;  %v717_v18 = vunpack.c.h.bf16 %v12524_v16  ;;  %v11092_v60 = vld [vmem:[#allocation6 + $0xde8] ss:$16 sps:$4 sm:$0xff]  }
 0x243   :  { %7565 = vmatpush1.bf16.msra.mxu0 %v11053_v51  ;;  %v11091_v51 = vld [vmem:[#allocation6 + $0x11e4] ss:$16 sps:$4 sm:$0xff]  }
 0x244   :  { %7566 = vmatprep.subr.bf16.mxu0 %v11061_v11  ;;  %v733_v3 = vadd.f32 %v717_v18, %v684_v15  ;;  %v11107_v15 = vld [vmem:[#allocation6 + $0x1240] ss:$16 sps:$4 sm:$0xff]   ;;  %v11124_v18 = vld [vmem:[#allocation6 + $0xe8c] ss:$16 sps:$4 sm:$0xff]  }
 0x245   :  { %8141 = vmatpush1.bf16.msra.mxu1 %v11062_v29  ;;  %v12528_v29 = vld [vmem:[#allocation3 + $0x388] sm:$0xff] }
 0x246   :  { %8142 = vmatprep.subr.bf16.mxu1 %v11070_v38  ;;  %v766_v47 = vunpack.c.h.bf16 %v12528_v29  ;;  %v11098_v38 = vld [vmem:[#allocation6 + $0xe08] ss:$16 sps:$4 sm:$0xff]  }
 0x247   :  { %7567 = vmatpush1.bf16.msra.mxu0 %v11059_v57  ;;  %v11104_v57 = vld [vmem:[#allocation6 + $0xe28] ss:$16 sps:$4 sm:$0xff]  }
 0x248   :  { %7568 = vmatprep.subr.bf16.mxu0 %v11067_v17  ;;  %v782_v11 = vadd.f32 %v766_v47, %v733_v3  ;;  %v95_v17 = vunpack.c.l.bf16 %v12471_v2  ;;  %v12546_v2 = vld [vmem:[#allocation3 + $0x50] sm:$0xff]  ;;  %v11130_v47 = vld [vmem:[#allocation6 + $0xeac] ss:$16 sps:$4 sm:$0xff]  }
 0x249   :  { %8143 = vmatpush1.bf16.msra.mxu1 %v11068_v39  ;;  %v12532_v39 = vld [vmem:[#allocation3 + $0x3c8] sm:$0xff] }
 0x24a   :  { %8144 = vmatprep.subr.bf16.mxu1 %v11076_v52  ;;  %v815_v27 = vunpack.c.h.bf16 %v12532_v39 }
 0x24b   :  { %7569 = vmatpush1.bf16.msra.mxu0 %v11065_v9  ;;  %v11110_v9 = vld [vmem:[#allocation6 + $0xe48] ss:$16 sps:$4 sm:$0xff]  }
 0x24c   :  { %7570 = vmatprep.subr.bf16.mxu0 %v11073_v42  ;;  %v831_v52 = vadd.f32 %v815_v27, %v782_v11  ;;  %v12543_v42 = vld [vmem:[#allocation3 + $0x10] sm:$0xff]  ;;  %v11136_v27 = vld [vmem:[#allocation6 + $0xecc] ss:$16 sps:$4 sm:$0xff]  }
 0x24d   :  { %8145 = vmatpush1.bf16.msra.mxu1 %v11074_v53  ;;  %v128_v53 = vunpack.c.l.bf16 %v12474_v63  ;;  %v131_v63 = vunpack.c.h.bf16 %v12546_v2 }
 0x24e   :  { %8146 = vmatprep.subr.bf16.mxu1 %v11082_v0  ;;  %v12541_v0 = vpack.c.bf16 %v831_v52, %v831_v52  ;;  %v373_v52 = vunpack.c.l.bf16 %v12496_v59  ;;  %v11131_v59 = vld [vmem:[#allocation6 + $0x12c0] ss:$16 sps:$4 sm:$0xff]  }
 0x24f   :  { %7571 = vmatpush1.bf16.msra.mxu0 %v11071_v14 }
 0x250   :  { %7572 = vmatprep.subr.bf16.mxu0 %v11079_v33 }
 0x251   :  { %8147 = vmatpush1.bf16.msra.mxu1 %v11080_v8  ;;  %v177_v8 = vunpack.c.l.bf16 %v12480_v1  ;;  %v226_v1 = vunpack.c.l.bf16 %v12484_v23  ;;  %v11113_v23 = vld [vmem:[#allocation6 + $0x1260] ss:$16 sps:$4 sm:$0xff]  }
 0x252   :  { %8148 = vmatprep.subr.bf16.mxu1 %v11088_v55  ;;  %v12552_v55 = vld [vmem:[#allocation3 + $0x90] sm:$0xff] }
 0x253   :  { %7573 = vmatpush1.bf16.msra.mxu0 %v11077_v24  ;;  %v180_v33 = vunpack.c.h.bf16 %v12552_v55 }
 0x254   :  { %7574 = vmatprep.subr.bf16.mxu0 %v11085_v40 }
 0x255   :  { %8149 = vmatpush1.bf16.msra.mxu1 %v11086_v13 }
 0x256   :  { %8150 = vmatprep.subr.bf16.mxu1 %v11094_v28  ;;  %v12556_v28 = vld [vmem:[#allocation3 + $0xd0] sm:$0xff] }
 0x257   :  { %7575 = vmatpush1.bf16.msra.mxu0 %v11083_v31  ;;  %v229_v40 = vunpack.c.h.bf16 %v12556_v28 }
 0x258   :  { %7576 = vmatprep.subr.bf16.mxu0 %v11091_v51 }
 0x259   :  { %8151 = vmatpush1.bf16.msra.mxu1 %v11092_v60  ;;  %v275_v60 = vunpack.c.l.bf16 %v12488_v35  ;;  %v11119_v35 = vld [vmem:[#allocation6 + $0x1280] ss:$16 sps:$4 sm:$0xff]  }
 0x25a   :  { %8161 = vmatprep.subr.bf16.mxu1 %v11100_v37  ;;  %v12560_v37 = vld [vmem:[#allocation3 + $0x110] sm:$0xff] }
 0x25b   :  { %7577 = vmatpush1.bf16.msra.mxu0 %v11089_v22  ;;  %v278_v51 = vunpack.c.h.bf16 %v12560_v37  ;;  %v11134_v22 = vld [vmem:[#allocation6 + $0xec8] ss:$16 sps:$4 sm:$0xff]  }
 0x25c   :  { %8153 = vmatmul.mubr.bf16.vlgmr.msra.gmra.mrb[4].mxu1 %v12404_v44  ;;  %7587 = vmatprep.subr.bf16.mxu0 %v11097_v26  ;;  %v98_v44 = vunpack.c.h.bf16 %v12543_v42  ;;  %v12564_v26 = vld [vmem:[#allocation3 + $0x150] sm:$0xff] }
 0x25d   :  { %8162 = vmatpush1.bf16.msra.mxu1 %v11098_v38  ;;  %8193 = vmatprep.mubr.bf16.mxu1 %v12409_v62  ;;  %v144_v62 = vadd.f32 %v128_v53, %v95_v17  ;;  %v324_v38 = vunpack.c.l.bf16 %v12492_v49  ;;  %v11125_v49 = vld [vmem:[#allocation6 + $0x12a0] ss:$16 sps:$4 sm:$0xff]   ;;  %v11142_v53 = vld [vmem:[#allocation6 + $0xeec] ss:$16 sps:$4 sm:$0xff]  }
 0x25e   :  { %8163 = vmatprep.subr.bf16.mxu1 %v11106_v41  ;;  %7579 = vmatmul.mubr.bf16.vlgmr.msra.gmra.mrb[0].mxu0 %v12538_v54  ;;  %v147_v14 = vadd.f32 %v131_v63, %v98_v44  ;;  %v422_v63 = vunpack.c.l.bf16 %v12500_v20  ;;  %v11137_v20 = vld [vmem:[#allocation6 + $0x12e0] ss:$16 sps:$4 sm:$0xff]  }
 0x25f   :  { %7588 = vmatpush1.bf16.msra.mxu0 %v11095_v58  ;;  %7619 = vmatprep.mubr.bf16.mxu0 %v12541_v0  ;;  %v193_v13 = vadd.f32 %v177_v8, %v144_v62  ;;  %v11133_v58 = vld [vmem:[#allocation6 + $0x12c4] ss:$16 sps:$4 sm:$0xff]   ;;  %v11148_v62 = vld [vmem:[#allocation6 + $0xf0c] ss:$16 sps:$4 sm:$0xff]  }
 0x260   :  { %7589 = vmatprep.subr.bf16.mxu0 %v11103_v43  ;;  %v196_v24 = vadd.f32 %v180_v33, %v147_v14  ;;  %v471_v33 = vunpack.c.l.bf16 %v12504_v19  ;;  %v11143_v19 = vld [vmem:[#allocation6 + $0x1300] ss:$16 sps:$4 sm:$0xff]  }
 0x261   :  { %8164 = vmatpush1.bf16.msra.mxu1 %v11104_v57  ;;  %v242_v3 = vadd.f32 %v226_v1, %v193_v13  ;;  %v327_v57 = vunpack.c.h.bf16 %v12564_v26  ;;  %v11154_v13 = vld [vmem:[#allocation6 + $0xf2c] ss:$16 sps:$4 sm:$0xff]  }
 0x262   :  { %8165 = vmatprep.subr.bf16.mxu1 %v11112_v50  ;;  %v245_v31 = vadd.f32 %v229_v40, %v196_v24  ;;  %v11140_v50 = vld [vmem:[#allocation6 + $0xee8] ss:$16 sps:$4 sm:$0xff]   ;;  %v520_v40 = vunpack.c.l.bf16 %v12508_v30  ;;  %v11149_v30 = vld [vmem:[#allocation6 + $0x1320] ss:$16 sps:$4 sm:$0xff]  }
 0x263   :  { %7590 = vmatpush1.bf16.msra.mxu0 %v11101_v4  ;;  %v291_v11 = vadd.f32 %v275_v60, %v242_v3  ;;  %v11139_v4 = vld [vmem:[#allocation6 + $0x12e4] ss:$16 sps:$4 sm:$0xff]   ;;  %v11160_v3 = vld [vmem:[#allocation6 + $0xf4c] ss:$16 sps:$4 sm:$0xff]  }
 0x264   :  { %7591 = vmatprep.subr.bf16.mxu0 %v11109_v10  ;;  %v294_v41 = vadd.f32 %v278_v51, %v245_v31  ;;  %v569_v51 = vunpack.c.l.bf16 %v12512_v46  ;;  %v11155_v46 = vld [vmem:[#allocation6 + $0x1340] ss:$16 sps:$4 sm:$0xff]  }
 0x265   :  { %8166 = vmatpush1.bf16.msra.mxu1 %v11110_v9  ;;  %v340_v17 = vadd.f32 %v324_v38, %v291_v11  ;;  %v12568_v9 = vld [vmem:[#allocation3 + $0x190] sm:$0xff]  ;;  %v11166_v11 = vld [vmem:[#allocation6 + $0xf6c] ss:$16 sps:$4 sm:$0xff]  }
 0x266   :  { %8167 = vmatprep.subr.bf16.mxu1 %v11118_v32  ;;  %v343_v43 = vadd.f32 %v327_v57, %v294_v41  ;;  %v376_v44 = vunpack.c.h.bf16 %v12568_v9  ;;  %v11146_v32 = vld [vmem:[#allocation6 + $0xf08] ss:$16 sps:$4 sm:$0xff]   ;;  %v618_v57 = vunpack.c.l.bf16 %v12516_v56  ;;  %v11161_v56 = vld [vmem:[#allocation6 + $0x1360] ss:$16 sps:$4 sm:$0xff]  }
 0x267   :  { %7592 = vmatpush1.bf16.msra.mxu0 %v11107_v15  ;;  %v389_v8 = vadd.f32 %v373_v52, %v340_v17  ;;  %v11145_v15 = vld [vmem:[#allocation6 + $0x1304] ss:$16 sps:$4 sm:$0xff]   ;;  %v11172_v17 = vld [vmem:[#allocation6 + $0xf8c] ss:$16 sps:$4 sm:$0xff]  }
 0x268   :  { %7593 = vmatprep.subr.bf16.mxu0 %v11115_v21  ;;  %v392_v10 = vadd.f32 %v376_v44, %v343_v43  ;;  %v667_v44 = vunpack.c.l.bf16 %v12520_v6  ;;  %v11167_v6 = vld [vmem:[#allocation6 + $0x1380] ss:$16 sps:$4 sm:$0xff]  }
 0x269   :  { %8168 = vmatpush1.bf16.msra.mxu1 %v11116_v12  ;;  %v12572_v12 = vld [vmem:[#allocation3 + $0x1d0] sm:$0xff]  ;;  %v438_v1 = vadd.f32 %v422_v63, %v389_v8  ;;  %v11178_v8 = vld [vmem:[#allocation6 + $0xfac] ss:$16 sps:$4 sm:$0xff]  }
 0x26a   :  { %8169 = vmatprep.subr.bf16.mxu1 %v11124_v18  ;;  %v425_v14 = vunpack.c.h.bf16 %v12572_v12  ;;  %v11152_v18 = vld [vmem:[#allocation6 + $0xf28] ss:$16 sps:$4 sm:$0xff]  }
 0x26b   :  { %7594 = vmatpush1.bf16.msra.mxu0 %v11113_v23  ;;  %v487_v60 = vadd.f32 %v471_v33, %v438_v1  ;;  %v11151_v23 = vld [vmem:[#allocation6 + $0x1324] ss:$16 sps:$4 sm:$0xff]   ;;  %v11184_v1 = vld [vmem:[#allocation6 + $0xfcc] ss:$16 sps:$4 sm:$0xff]  }
 0x26c   :  { %7595 = vmatprep.subr.bf16.mxu0 %v11121_v34  ;;  %v441_v21 = vadd.f32 %v425_v14, %v392_v10  ;;  %v716_v14 = vunpack.c.l.bf16 %v12524_v16  ;;  %v11173_v16 = vld [vmem:[#allocation6 + $0x13a0] ss:$16 sps:$4 sm:$0xff]  }
 0x26d   :  { %8170 = vmatpush1.bf16.msra.mxu1 %v11122_v25  ;;  %v12576_v25 = vld [vmem:[#allocation3 + $0x210] sm:$0xff]  ;;  %v536_v38 = vadd.f32 %v520_v40, %v487_v60  ;;  %v11190_v60 = vld [vmem:[#allocation6 + $0xfec] ss:$16 sps:$4 sm:$0xff]  }
 0x26e   :  { %8171 = vmatprep.subr.bf16.mxu1 %v11130_v47  ;;  %v474_v24 = vunpack.c.h.bf16 %v12576_v25  ;;  %v11158_v47 = vld [vmem:[#allocation6 + $0xf48] ss:$16 sps:$4 sm:$0xff]  }
 0x26f   :  { %7596 = vmatpush1.bf16.msra.mxu0 %v11119_v35  ;;  %v11157_v35 = vld [vmem:[#allocation6 + $0x1344] ss:$16 sps:$4 sm:$0xff]   ;;  %v585_v52 = vadd.f32 %v569_v51, %v536_v38  ;;  %v11196_v38 = vld [vmem:[#allocation6 + $0x100c] ss:$16 sps:$4 sm:$0xff]  }
 0x270   :  { %7597 = vmatprep.subr.bf16.mxu0 %v11127_v48  ;;  %v490_v34 = vadd.f32 %v474_v24, %v441_v21  ;;  %v765_v24 = vunpack.c.l.bf16 %v12528_v29  ;;  %v11179_v29 = vld [vmem:[#allocation6 + $0x13c0] ss:$16 sps:$4 sm:$0xff]  }
 0x271   :  { %8172 = vmatpush1.bf16.msra.mxu1 %v11128_v36  ;;  %v12580_v36 = vld [vmem:[#allocation3 + $0x250] sm:$0xff]  ;;  %v634_v63 = vadd.f32 %v618_v57, %v585_v52 }
 0x272   :  { %8173 = vmatprep.subr.bf16.mxu1 %v11136_v27  ;;  %v523_v31 = vunpack.c.h.bf16 %v12580_v36  ;;  %v11164_v27 = vld [vmem:[#allocation6 + $0xf68] ss:$16 sps:$4 sm:$0xff]   ;;  %v11185_v57 = vld [vmem:[#allocation6 + $0x13e0] ss:$16 sps:$4 sm:$0xff]   ;;  %v11193_v52 = vld [vmem:[#allocation6 + $0x1404] ss:$16 sps:$4 sm:$0xff]  }
 0x273   :  { %7598 = vmatpush1.bf16.msra.mxu0 %v11125_v49  ;;  %v11163_v49 = vld [vmem:[#allocation6 + $0x1364] ss:$16 sps:$4 sm:$0xff]   ;;  %v683_v33 = vadd.f32 %v667_v44, %v634_v63  ;;  %v11208_v44 = vld [vmem:[#allocation6 + $0x104c] ss:$16 sps:$4 sm:$0xff]  }
 0x274   :  { %7599 = vmatprep.subr.bf16.mxu0 %v11133_v58  ;;  %v539_v48 = vadd.f32 %v523_v31, %v490_v34  ;;  %v814_v31 = vunpack.c.l.bf16 %v12532_v39  ;;  %v11202_v39 = vld [vmem:[#allocation6 + $0x102c] ss:$16 sps:$4 sm:$0xff]   ;;  %v11199_v63 = vld [vmem:[#allocation6 + $0x1424] ss:$16 sps:$4 sm:$0xff]  }
 0x275   :  { %8174 = vmatpush1.bf16.msra.mxu1 %v11134_v22  ;;  %v12584_v22 = vld [vmem:[#allocation3 + $0x290] sm:$0xff]  ;;  %v732_v40 = vadd.f32 %v716_v14, %v683_v33  ;;  %v11212_v33 = vld [vmem:[#allocation6 + $0x1068] ss:$16 sps:$4 sm:$0xff]  }
 0x276   :  { %8175 = vmatprep.subr.bf16.mxu1 %v11142_v53  ;;  %v572_v41 = vunpack.c.h.bf16 %v12584_v22  ;;  %v11170_v53 = vld [vmem:[#allocation6 + $0xf88] ss:$16 sps:$4 sm:$0xff]   ;;  %v11205_v14 = vld [vmem:[#allocation6 + $0x1444] ss:$16 sps:$4 sm:$0xff]  }
 0x277   :  { %7600 = vmatpush1.bf16.msra.mxu0 %v11131_v59  ;;  %v11169_v59 = vld [vmem:[#allocation6 + $0x1384] ss:$16 sps:$4 sm:$0xff]   ;;  %v781_v51 = vadd.f32 %v765_v24, %v732_v40  ;;  %v11218_v40 = vld [vmem:[#allocation6 + $0x1088] ss:$16 sps:$4 sm:$0xff]  }
 0x278   :  { %7601 = vmatprep.subr.bf16.mxu0 %v11139_v4  ;;  %v588_v58 = vadd.f32 %v572_v41, %v539_v48  ;;  %v11211_v24 = vld [vmem:[#allocation6 + $0x1464] ss:$16 sps:$4 sm:$0xff]  }
 0x279   :  { %8176 = vmatpush1.bf16.msra.mxu1 %v11140_v50  ;;  %v12588_v50 = vld [vmem:[#allocation3 + $0x2d0] sm:$0xff]  ;;  %v830_v41 = vadd.f32 %v814_v31, %v781_v51  ;;  %v11224_v51 = vld [vmem:[#allocation6 + $0x10a8] ss:$16 sps:$4 sm:$0xff]  }
 0x27a   :  { %8177 = vmatprep.subr.bf16.mxu1 %v11148_v62  ;;  %v621_v43 = vunpack.c.h.bf16 %v12588_v50  ;;  %v11176_v62 = vld [vmem:[#allocation6 + $0xfa8] ss:$16 sps:$4 sm:$0xff]   ;;  %v11217_v31 = vld [vmem:[#allocation6 + $0x1484] ss:$16 sps:$4 sm:$0xff]  }
 0x27b   :  { %7602 = vmatpush1.bf16.msra.mxu0 %v11137_v20  ;;  %v11175_v20 = vld [vmem:[#allocation6 + $0x13a4] ss:$16 sps:$4 sm:$0xff]  }
 0x27c   :  { %7603 = vmatprep.subr.bf16.mxu0 %v11145_v15  ;;  %v637_v4 = vadd.f32 %v621_v43, %v588_v58  ;;  %v130_v58 = vunpack.c.l.bf16 %v12546_v2  ;;  %v11191_v43 = vld [vmem:[#allocation6 + $0x1400] ss:$16 sps:$4 sm:$0xff]   ;;  %v179_v2 = vunpack.c.l.bf16 %v12552_v55 }
 0x27d   :  { %8178 = vmatpush1.bf16.msra.mxu1 %v11146_v32  ;;  %v12592_v32 = vld [vmem:[#allocation3 + $0x310] sm:$0xff] }
 0x27e   :  { %8179 = vmatprep.subr.bf16.mxu1 %v11154_v13  ;;  %v670_v10 = vunpack.c.h.bf16 %v12592_v32  ;;  %v11182_v13 = vld [vmem:[#allocation6 + $0xfc8] ss:$16 sps:$4 sm:$0xff]   ;;  %v11203_v55 = vld [vmem:[#allocation6 + $0x1440] ss:$16 sps:$4 sm:$0xff]  }
 0x27f   :  { %7604 = vmatpush1.bf16.msra.mxu0 %v11143_v19  ;;  %v11181_v19 = vld [vmem:[#allocation6 + $0x13c4] ss:$16 sps:$4 sm:$0xff]  }
 0x280   :  { %7605 = vmatprep.subr.bf16.mxu0 %v11151_v23  ;;  %v686_v15 = vadd.f32 %v670_v10, %v637_v4  ;;  %v11197_v4 = vld [vmem:[#allocation6 + $0x1420] ss:$16 sps:$4 sm:$0xff]   ;;  %v11214_v10 = vld [vmem:[#allocation6 + $0x106c] ss:$16 sps:$4 sm:$0xff]  }
 0x281   :  { %8180 = vmatpush1.bf16.msra.mxu1 %v11152_v18  ;;  %v12596_v18 = vld [vmem:[#allocation3 + $0x350] sm:$0xff] }
 0x282   :  { %8181 = vmatprep.subr.bf16.mxu1 %v11160_v3  ;;  %v719_v21 = vunpack.c.h.bf16 %v12596_v18  ;;  %v11188_v3 = vld [vmem:[#allocation6 + $0xfe8] ss:$16 sps:$4 sm:$0xff]  }
 0x283   :  { %7606 = vmatpush1.bf16.msra.mxu0 %v11149_v30  ;;  %v11187_v30 = vld [vmem:[#allocation6 + $0x13e4] ss:$16 sps:$4 sm:$0xff]  }
 0x284   :  { %7607 = vmatprep.subr.bf16.mxu0 %v11157_v35  ;;  %v735_v23 = vadd.f32 %v719_v21, %v686_v15  ;;  %v228_v15 = vunpack.c.l.bf16 %v12556_v28  ;;  %v11220_v21 = vld [vmem:[#allocation6 + $0x108c] ss:$16 sps:$4 sm:$0xff]  }
 0x285   :  { %8182 = vmatpush1.bf16.msra.mxu1 %v11158_v47  ;;  %v12600_v47 = vld [vmem:[#allocation3 + $0x390] sm:$0xff]  ;;  %v11226_v28 = vld [vmem:[#allocation6 + $0x10ac] ss:$16 sps:$4 sm:$0xff]  }
 0x286   :  { %8183 = vmatprep.subr.bf16.mxu1 %v11166_v11  ;;  %v768_v34 = vunpack.c.h.bf16 %v12600_v47  ;;  %v11194_v11 = vld [vmem:[#allocation6 + $0x1008] ss:$16 sps:$4 sm:$0xff]  }
 0x287   :  { %7608 = vmatpush1.bf16.msra.mxu0 %v11155_v46  ;;  %v11200_v46 = vld [vmem:[#allocation6 + $0x1028] ss:$16 sps:$4 sm:$0xff]  }
 0x288   :  { %7609 = vmatprep.subr.bf16.mxu0 %v11163_v49  ;;  %v784_v35 = vadd.f32 %v768_v34, %v735_v23  ;;  %v12608_v49 = vpack.c.bf16 %v830_v41, %v830_v41  ;;  %v277_v23 = vunpack.c.l.bf16 %v12560_v37  ;;  %v11209_v34 = vld [vmem:[#allocation6 + $0x1460] ss:$16 sps:$4 sm:$0xff]   ;;  %v11232_v37 = vld [vmem:[#allocation6 + $0x10cc] ss:$16 sps:$4 sm:$0xff]   ;;  %v11223_v41 = vld [vmem:[#allocation6 + $0x14a4] ss:$16 sps:$4 sm:$0xff]  }
 0x289   :  { %8184 = vmatpush1.bf16.msra.mxu1 %v11164_v27  ;;  %v12604_v27 = vld [vmem:[#allocation3 + $0x3d0] sm:$0xff] }
 0x28a   :  { %8185 = vmatprep.subr.bf16.mxu1 %v11172_v17  ;;  %v817_v48 = vunpack.c.h.bf16 %v12604_v27 }
 0x28b   :  { %7610 = vmatpush1.bf16.msra.mxu0 %v11161_v56  ;;  %v11206_v56 = vld [vmem:[#allocation6 + $0x1048] ss:$16 sps:$4 sm:$0xff]  }
 0x28c   :  { %7611 = vmatprep.subr.bf16.mxu0 %v11169_v59  ;;  %v833_v17 = vadd.f32 %v817_v48, %v784_v35  ;;  %v12615_v59 = vld [vmem:[#allocation3 + $0x18] sm:$0xff]  ;;  %v326_v35 = vunpack.c.l.bf16 %v12564_v26  ;;  %v11215_v48 = vld [vmem:[#allocation6 + $0x1480] ss:$16 sps:$4 sm:$0xff]  }
 0x28d   :  { %8186 = vmatpush1.bf16.msra.mxu1 %v11170_v53  ;;  %v97_v53 = vunpack.c.l.bf16 %v12543_v42  ;;  %v11238_v26 = vld [vmem:[#allocation6 + $0x10ec] ss:$16 sps:$4 sm:$0xff]  }
 0x28e   :  { %8187 = vmatprep.subr.bf16.mxu1 %v11178_v8  ;;  %v12613_v8 = vpack.c.bf16 %v833_v17, %v833_v17 }
 0x28f   :  { %7612 = vmatpush1.bf16.msra.mxu0 %v11167_v6  ;;  %v146_v42 = vadd.f32 %v130_v58, %v97_v53  ;;  %v375_v53 = vunpack.c.l.bf16 %v12568_v9  ;;  %v11221_v58 = vld [vmem:[#allocation6 + $0x14a0] ss:$16 sps:$4 sm:$0xff]   ;;  %v11244_v9 = vld [vmem:[#allocation6 + $0x110c] ss:$16 sps:$4 sm:$0xff]  }
 0x290   :  { %7613 = vmatprep.subr.bf16.mxu0 %v11175_v20 }
 0x291   :  { %8188 = vmatpush1.bf16.msra.mxu1 %v11176_v62  ;;  %v12618_v62 = vld [vmem:[#allocation3 + $0x58] sm:$0xff] }
 0x292   :  { %8189 = vmatprep.subr.bf16.mxu1 %v11184_v1  ;;  %v12624_v1 = vld [vmem:[#allocation3 + $0x98] sm:$0xff] }
 0x293   :  { %7614 = vmatpush1.bf16.msra.mxu0 %v11173_v16  ;;  %v182_v20 = vunpack.c.h.bf16 %v12624_v1 }
 0x294   :  { %7615 = vmatprep.subr.bf16.mxu0 %v11181_v19 }
 0x295   :  { %8190 = vmatpush1.bf16.msra.mxu1 %v11182_v13  ;;  %v195_v13 = vadd.f32 %v179_v2, %v146_v42  ;;  %v424_v42 = vunpack.c.l.bf16 %v12572_v12  ;;  %v11227_v2 = vld [vmem:[#allocation6 + $0x14c0] ss:$16 sps:$4 sm:$0xff]   ;;  %v11250_v12 = vld [vmem:[#allocation6 + $0x112c] ss:$16 sps:$4 sm:$0xff]  }
 0x296   :  { %8191 = vmatprep.subr.bf16.mxu1 %v11190_v60  ;;  %v12628_v60 = vld [vmem:[#allocation3 + $0xd8] sm:$0xff] }
 0x297   :  { %7616 = vmatpush1.bf16.msra.mxu0 %v11179_v29  ;;  %v231_v19 = vunpack.c.h.bf16 %v12628_v60 }
 0x298   :  { %7617 = vmatprep.subr.bf16.mxu0 %v11187_v30 }
 0x299   :  { %8192 = vmatpush1.bf16.msra.mxu1 %v11188_v3  ;;  %v244_v3 = vadd.f32 %v228_v15, %v195_v13  ;;  %v473_v13 = vunpack.c.l.bf16 %v12576_v25  ;;  %v11233_v15 = vld [vmem:[#allocation6 + $0x14e0] ss:$16 sps:$4 sm:$0xff]   ;;  %v11256_v25 = vld [vmem:[#allocation6 + $0x114c] ss:$16 sps:$4 sm:$0xff]  }
 0x29a   :  { %8202 = vmatprep.subr.bf16.mxu1 %v11196_v38  ;;  %v12632_v38 = vld [vmem:[#allocation3 + $0x118] sm:$0xff] }
 0x29b   :  { %7618 = vmatpush1.bf16.msra.mxu0 %v11185_v57  ;;  %v280_v30 = vunpack.c.h.bf16 %v12632_v38  ;;  %v11230_v57 = vld [vmem:[#allocation6 + $0x10c8] ss:$16 sps:$4 sm:$0xff]  }
 0x29c   :  { %8194 = vmatmul.mubr.bf16.vlgmr.msra.gmra.mrb[4].mxu1 %v12466_v5  ;;  %7628 = vmatprep.subr.bf16.mxu0 %v11193_v52  ;;  %v100_v5 = vunpack.c.h.bf16 %v12615_v59  ;;  %v12636_v52 = vld [vmem:[#allocation3 + $0x158] sm:$0xff] }
 0x29d   :  { %8203 = vmatpush1.bf16.msra.mxu1 %v11194_v11  ;;  %8234 = vmatprep.mubr.bf16.mxu1 %v12469_v61  ;;  %v133_v61 = vunpack.c.h.bf16 %v12618_v62  ;;  %v293_v11 = vadd.f32 %v277_v23, %v244_v3  ;;  %v522_v3 = vunpack.c.l.bf16 %v12580_v36  ;;  %v11239_v23 = vld [vmem:[#allocation6 + $0x1500] ss:$16 sps:$4 sm:$0xff]   ;;  %v11262_v36 = vld [vmem:[#allocation6 + $0x116c] ss:$16 sps:$4 sm:$0xff]  }
 0x29e   :  { %8204 = vmatprep.subr.bf16.mxu1 %v11202_v39  ;;  %7620 = vmatmul.mubr.bf16.vlgmr.msra.gmra.mrb[0].mxu0 %v12608_v49 }
 0x29f   :  { %7629 = vmatpush1.bf16.msra.mxu0 %v11191_v43  ;;  %7660 = vmatprep.mubr.bf16.mxu0 %v12613_v8  ;;  %v149_v6 = vadd.f32 %v133_v61, %v100_v5  ;;  %v342_v17 = vadd.f32 %v326_v35, %v293_v11  ;;  %v11229_v43 = vld [vmem:[#allocation6 + $0x14c4] ss:$16 sps:$4 sm:$0xff]   ;;  %v571_v11 = vunpack.c.l.bf16 %v12584_v22  ;;  %v11245_v35 = vld [vmem:[#allocation6 + $0x1520] ss:$16 sps:$4 sm:$0xff]   ;;  %v11268_v22 = vld [vmem:[#allocation6 + $0x118c] ss:$16 sps:$4 sm:$0xff]  }
 0x2a0   :  { %7630 = vmatprep.subr.bf16.mxu0 %v11199_v63 }
 0x2a1   :  { %8205 = vmatpush1.bf16.msra.mxu1 %v11200_v46  ;;  %v198_v16 = vadd.f32 %v182_v20, %v149_v6  ;;  %v329_v46 = vunpack.c.h.bf16 %v12636_v52  ;;  %v391_v61 = vadd.f32 %v375_v53, %v342_v17  ;;  %v620_v17 = vunpack.c.l.bf16 %v12588_v50  ;;  %v11251_v53 = vld [vmem:[#allocation6 + $0x1540] ss:$16 sps:$4 sm:$0xff]   ;;  %v11274_v50 = vld [vmem:[#allocation6 + $0x11ac] ss:$16 sps:$4 sm:$0xff]  }
 0x2a2   :  { %8206 = vmatprep.subr.bf16.mxu1 %v11208_v44  ;;  %v11236_v44 = vld [vmem:[#allocation6 + $0x10e8] ss:$16 sps:$4 sm:$0xff]  }
 0x2a3   :  { %7631 = vmatpush1.bf16.msra.mxu0 %v11197_v4  ;;  %v247_v29 = vadd.f32 %v231_v19, %v198_v16  ;;  %v11235_v4 = vld [vmem:[#allocation6 + $0x14e4] ss:$16 sps:$4 sm:$0xff]   ;;  %v440_v20 = vadd.f32 %v424_v42, %v391_v61  ;;  %v669_v61 = vunpack.c.l.bf16 %v12592_v32  ;;  %v11257_v42 = vld [vmem:[#allocation6 + $0x1560] ss:$16 sps:$4 sm:$0xff]   ;;  %v11280_v32 = vld [vmem:[#allocation6 + $0x11cc] ss:$16 sps:$4 sm:$0xff]  }
 0x2a4   :  { %7632 = vmatprep.subr.bf16.mxu0 %v11205_v14 }
 0x2a5   :  { %8207 = vmatpush1.bf16.msra.mxu1 %v11206_v56  ;;  %v296_v39 = vadd.f32 %v280_v30, %v247_v29  ;;  %v12640_v56 = vld [vmem:[#allocation3 + $0x198] sm:$0xff]  ;;  %v489_v19 = vadd.f32 %v473_v13, %v440_v20  ;;  %v718_v20 = vunpack.c.l.bf16 %v12596_v18  ;;  %v11263_v13 = vld [vmem:[#allocation6 + $0x1580] ss:$16 sps:$4 sm:$0xff]  }
 0x2a6   :  { %8208 = vmatprep.subr.bf16.mxu1 %v11214_v10  ;;  %v378_v5 = vunpack.c.h.bf16 %v12640_v56  ;;  %v11242_v10 = vld [vmem:[#allocation6 + $0x1108] ss:$16 sps:$4 sm:$0xff]   ;;  %v11286_v18 = vld [vmem:[#allocation6 + $0x11ec] ss:$16 sps:$4 sm:$0xff]  }
 0x2a7   :  { %7633 = vmatpush1.bf16.msra.mxu0 %v11203_v55  ;;  %v345_v63 = vadd.f32 %v329_v46, %v296_v39  ;;  %v11241_v55 = vld [vmem:[#allocation6 + $0x1504] ss:$16 sps:$4 sm:$0xff]   ;;  %v538_v30 = vadd.f32 %v522_v3, %v489_v19  ;;  %v767_v19 = vunpack.c.l.bf16 %v12600_v47  ;;  %v11269_v3 = vld [vmem:[#allocation6 + $0x15a0] ss:$16 sps:$4 sm:$0xff]   ;;  %v11292_v47 = vld [vmem:[#allocation6 + $0x120c] ss:$16 sps:$4 sm:$0xff]  }
 0x2a8   :  { %7634 = vmatprep.subr.bf16.mxu0 %v11211_v24 }
 0x2a9   :  { %8209 = vmatpush1.bf16.msra.mxu1 %v11212_v33  ;;  %v394_v14 = vadd.f32 %v378_v5, %v345_v63  ;;  %v12644_v33 = vld [vmem:[#allocation3 + $0x1d8] sm:$0xff]  ;;  %v587_v46 = vadd.f32 %v571_v11, %v538_v30  ;;  %v816_v30 = vunpack.c.l.bf16 %v12604_v27  ;;  %v11275_v11 = vld [vmem:[#allocation6 + $0x15c0] ss:$16 sps:$4 sm:$0xff]   ;;  %v11289_v27 = vld [vmem:[#allocation6 + $0x1604] ss:$16 sps:$4 sm:$0xff]  }
 0x2aa   :  { %8210 = vmatprep.subr.bf16.mxu1 %v11220_v21  ;;  %v427_v6 = vunpack.c.h.bf16 %v12644_v33  ;;  %v11248_v21 = vld [vmem:[#allocation6 + $0x1128] ss:$16 sps:$4 sm:$0xff]  }
 0x2ab   :  { %7635 = vmatpush1.bf16.msra.mxu0 %v11209_v34  ;;  %v11247_v34 = vld [vmem:[#allocation6 + $0x1524] ss:$16 sps:$4 sm:$0xff]   ;;  %v636_v5 = vadd.f32 %v620_v17, %v587_v46  ;;  %v11281_v46 = vld [vmem:[#allocation6 + $0x15e0] ss:$16 sps:$4 sm:$0xff]   ;;  %v11298_v17 = vld [vmem:[#allocation6 + $0x122c] ss:$16 sps:$4 sm:$0xff]  }
 0x2ac   :  { %7636 = vmatprep.subr.bf16.mxu0 %v11217_v31  ;;  %v443_v24 = vadd.f32 %v427_v6, %v394_v14 }
 0x2ad   :  { %8211 = vmatpush1.bf16.msra.mxu1 %v11218_v40  ;;  %v12648_v40 = vld [vmem:[#allocation3 + $0x218] sm:$0xff]  ;;  %v685_v6 = vadd.f32 %v669_v61, %v636_v5  ;;  %v11295_v61 = vld [vmem:[#allocation6 + $0x1624] ss:$16 sps:$4 sm:$0xff]  }
 0x2ae   :  { %8212 = vmatprep.subr.bf16.mxu1 %v11226_v28  ;;  %v476_v16 = vunpack.c.h.bf16 %v12648_v40  ;;  %v11254_v28 = vld [vmem:[#allocation6 + $0x1148] ss:$16 sps:$4 sm:$0xff]   ;;  %v11304_v5 = vld [vmem:[#allocation6 + $0x124c] ss:$16 sps:$4 sm:$0xff]  }
 0x2af   :  { %7637 = vmatpush1.bf16.msra.mxu0 %v11215_v48  ;;  %v11253_v48 = vld [vmem:[#allocation6 + $0x1544] ss:$16 sps:$4 sm:$0xff]  }
 0x2b0   :  { %7638 = vmatprep.subr.bf16.mxu0 %v11223_v41  ;;  %v492_v31 = vadd.f32 %v476_v16, %v443_v24  ;;  %v734_v16 = vadd.f32 %v718_v20, %v685_v6  ;;  %v11301_v6 = vld [vmem:[#allocation6 + $0x1644] ss:$16 sps:$4 sm:$0xff]   ;;  %v11308_v20 = vld [vmem:[#allocation6 + $0x1268] ss:$16 sps:$4 sm:$0xff]  }
 0x2b1   :  { %8213 = vmatpush1.bf16.msra.mxu1 %v11224_v51  ;;  %v12652_v51 = vld [vmem:[#allocation3 + $0x258] sm:$0xff] }
 0x2b2   :  { %8214 = vmatprep.subr.bf16.mxu1 %v11232_v37  ;;  %v525_v29 = vunpack.c.h.bf16 %v12652_v51  ;;  %v11260_v37 = vld [vmem:[#allocation6 + $0x1168] ss:$16 sps:$4 sm:$0xff]  }
 0x2b3   :  { %7639 = vmatpush1.bf16.msra.mxu0 %v11221_v58  ;;  %v11259_v58 = vld [vmem:[#allocation6 + $0x1564] ss:$16 sps:$4 sm:$0xff]  }
 0x2b4   :  { %7640 = vmatprep.subr.bf16.mxu0 %v11229_v43  ;;  %v541_v41 = vadd.f32 %v525_v29, %v492_v31  ;;  %v783_v29 = vadd.f32 %v767_v19, %v734_v16  ;;  %v11307_v16 = vld [vmem:[#allocation6 + $0x1664] ss:$16 sps:$4 sm:$0xff]  }
 0x2b5   :  { %8215 = vmatpush1.bf16.msra.mxu1 %v11230_v57  ;;  %v12656_v57 = vld [vmem:[#allocation3 + $0x298] sm:$0xff] }
 0x2b6   :  { %8216 = vmatprep.subr.bf16.mxu1 %v11238_v26  ;;  %v574_v39 = vunpack.c.h.bf16 %v12656_v57  ;;  %v11266_v26 = vld [vmem:[#allocation6 + $0x1188] ss:$16 sps:$4 sm:$0xff]  }
 0x2b7   :  { %7641 = vmatpush1.bf16.msra.mxu0 %v11227_v2  ;;  %v11265_v2 = vld [vmem:[#allocation6 + $0x1584] ss:$16 sps:$4 sm:$0xff]  }
 0x2b8   :  { %7642 = vmatprep.subr.bf16.mxu0 %v11235_v4  ;;  %v590_v43 = vadd.f32 %v574_v39, %v541_v41  ;;  %v832_v39 = vadd.f32 %v816_v30, %v783_v29  ;;  %v11313_v29 = vld [vmem:[#allocation6 + $0x1684] ss:$16 sps:$4 sm:$0xff]  }
 0x2b9   :  { %8217 = vmatpush1.bf16.msra.mxu1 %v11236_v44  ;;  %v12660_v44 = vld [vmem:[#allocation3 + $0x2d8] sm:$0xff] }
 0x2ba   :  { %8218 = vmatprep.subr.bf16.mxu1 %v11244_v9  ;;  %v623_v63 = vunpack.c.h.bf16 %v12660_v44  ;;  %v11272_v9 = vld [vmem:[#allocation6 + $0x11a8] ss:$16 sps:$4 sm:$0xff]  }
 0x2bb   :  { %7643 = vmatpush1.bf16.msra.mxu0 %v11233_v15  ;;  %v11271_v15 = vld [vmem:[#allocation6 + $0x15a4] ss:$16 sps:$4 sm:$0xff]  }
 0x2bc   :  { %7644 = vmatprep.subr.bf16.mxu0 %v11241_v55  ;;  %v639_v4 = vadd.f32 %v623_v63, %v590_v43  ;;  %v132_v43 = vunpack.c.l.bf16 %v12618_v62  ;;  %v11287_v63 = vld [vmem:[#allocation6 + $0x1600] ss:$16 sps:$4 sm:$0xff]   ;;  %v181_v62 = vunpack.c.l.bf16 %v12624_v1 }
 0x2bd   :  { %8219 = vmatpush1.bf16.msra.mxu1 %v11242_v10  ;;  %v12664_v10 = vld [vmem:[#allocation3 + $0x318] sm:$0xff]  ;;  %v11299_v1 = vld [vmem:[#allocation6 + $0x1640] ss:$16 sps:$4 sm:$0xff]  }
 0x2be   :  { %8220 = vmatprep.subr.bf16.mxu1 %v11250_v12  ;;  %v672_v14 = vunpack.c.h.bf16 %v12664_v10  ;;  %v11278_v12 = vld [vmem:[#allocation6 + $0x11c8] ss:$16 sps:$4 sm:$0xff]  }
 0x2bf   :  { %7645 = vmatpush1.bf16.msra.mxu0 %v11239_v23  ;;  %v11277_v23 = vld [vmem:[#allocation6 + $0x15c4] ss:$16 sps:$4 sm:$0xff]  }
 0x2c0   :  { %7646 = vmatprep.subr.bf16.mxu0 %v11247_v34  ;;  %v688_v55 = vadd.f32 %v672_v14, %v639_v4  ;;  %v11293_v4 = vld [vmem:[#allocation6 + $0x1620] ss:$16 sps:$4 sm:$0xff]   ;;  %v11310_v14 = vld [vmem:[#allocation6 + $0x126c] ss:$16 sps:$4 sm:$0xff]  }
 0x2c1   :  { %8221 = vmatpush1.bf16.msra.mxu1 %v11248_v21  ;;  %v12668_v21 = vld [vmem:[#allocation3 + $0x358] sm:$0xff] }
 0x2c2   :  { %8222 = vmatprep.subr.bf16.mxu1 %v11256_v25  ;;  %v721_v24 = vunpack.c.h.bf16 %v12668_v21  ;;  %v11284_v25 = vld [vmem:[#allocation6 + $0x11e8] ss:$16 sps:$4 sm:$0xff]  }
 0x2c3   :  { %7647 = vmatpush1.bf16.msra.mxu0 %v11245_v35  ;;  %v11283_v35 = vld [vmem:[#allocation6 + $0x15e4] ss:$16 sps:$4 sm:$0xff]  }
 0x2c4   :  { %7648 = vmatprep.subr.bf16.mxu0 %v11253_v48  ;;  %v737_v34 = vadd.f32 %v721_v24, %v688_v55  ;;  %v230_v55 = vunpack.c.l.bf16 %v12628_v60  ;;  %v11316_v24 = vld [vmem:[#allocation6 + $0x128c] ss:$16 sps:$4 sm:$0xff]  }
 0x2c5   :  { %8223 = vmatpush1.bf16.msra.mxu1 %v11254_v28  ;;  %v12672_v28 = vld [vmem:[#allocation3 + $0x398] sm:$0xff] }
 0x2c6   :  { %8224 = vmatprep.subr.bf16.mxu1 %v11262_v36  ;;  %v770_v31 = vunpack.c.h.bf16 %v12672_v28  ;;  %v11290_v36 = vld [vmem:[#allocation6 + $0x1208] ss:$16 sps:$4 sm:$0xff]   ;;  %v11322_v60 = vld [vmem:[#allocation6 + $0x12ac] ss:$16 sps:$4 sm:$0xff]  }
 0x2c7   :  { %7649 = vmatpush1.bf16.msra.mxu0 %v11251_v53  ;;  %v11296_v53 = vld [vmem:[#allocation6 + $0x1228] ss:$16 sps:$4 sm:$0xff]  }
 0x2c8   :  { %7650 = vmatprep.subr.bf16.mxu0 %v11259_v58  ;;  %v786_v48 = vadd.f32 %v770_v31, %v737_v34  ;;  %v12680_v58 = vpack.c.bf16 %v832_v39, %v832_v39  ;;  %v279_v34 = vunpack.c.l.bf16 %v12632_v38  ;;  %v11305_v31 = vld [vmem:[#allocation6 + $0x1660] ss:$16 sps:$4 sm:$0xff]   ;;  %v11328_v38 = vld [vmem:[#allocation6 + $0x12cc] ss:$16 sps:$4 sm:$0xff]   ;;  %v11319_v39 = vld [vmem:[#allocation6 + $0x16a4] ss:$16 sps:$4 sm:$0xff]  }
 0x2c9   :  { %8225 = vmatpush1.bf16.msra.mxu1 %v11260_v37  ;;  %v12676_v37 = vld [vmem:[#allocation3 + $0x3d8] sm:$0xff] }
 0x2ca   :  { %8226 = vmatprep.subr.bf16.mxu1 %v11268_v22  ;;  %v819_v41 = vunpack.c.h.bf16 %v12676_v37 }
 0x2cb   :  { %7651 = vmatpush1.bf16.msra.mxu0 %v11257_v42  ;;  %v11302_v42 = vld [vmem:[#allocation6 + $0x1248] ss:$16 sps:$4 sm:$0xff]  }
 0x2cc   :  { %7652 = vmatprep.subr.bf16.mxu0 %v11265_v2  ;;  %v835_v22 = vadd.f32 %v819_v41, %v786_v48  ;;  %v12687_v2 = vld [vmem:[#allocation3 + $0x20] sm:$0xff]  ;;  %v328_v48 = vunpack.c.l.bf16 %v12636_v52  ;;  %v11334_v52 = vld [vmem:[#allocation6 + $0x12ec] ss:$16 sps:$4 sm:$0xff]  }
 0x2cd   :  { %8227 = vmatpush1.bf16.msra.mxu1 %v11266_v26  ;;  %v99_v26 = vunpack.c.l.bf16 %v12615_v59  ;;  %v11311_v41 = vld [vmem:[#allocation6 + $0x1680] ss:$16 sps:$4 sm:$0xff]  }
 0x2ce   :  { %8228 = vmatprep.subr.bf16.mxu1 %v11274_v50  ;;  %v12685_v50 = vpack.c.bf16 %v835_v22, %v835_v22 }
 0x2cf   :  { %7653 = vmatpush1.bf16.msra.mxu0 %v11263_v13  ;;  %v148_v59 = vadd.f32 %v132_v43, %v99_v26  ;;  %v377_v26 = vunpack.c.l.bf16 %v12640_v56  ;;  %v11317_v43 = vld [vmem:[#allocation6 + $0x16a0] ss:$16 sps:$4 sm:$0xff]   ;;  %v11340_v56 = vld [vmem:[#allocation6 + $0x130c] ss:$16 sps:$4 sm:$0xff]  }
 0x2d0   :  { %7654 = vmatprep.subr.bf16.mxu0 %v11271_v15 }
 0x2d1   :  { %8229 = vmatpush1.bf16.msra.mxu1 %v11272_v9  ;;  %v12690_v9 = vld [vmem:[#allocation3 + $0x60] sm:$0xff] }
 0x2d2   :  { %8230 = vmatprep.subr.bf16.mxu1 %v11280_v32  ;;  %v12696_v32 = vld [vmem:[#allocation3 + $0xa0] sm:$0xff] }
 0x2d3   :  { %7655 = vmatpush1.bf16.msra.mxu0 %v11269_v3  ;;  %v184_v15 = vunpack.c.h.bf16 %v12696_v32  ;;  %v12700_v3 = vld [vmem:[#allocation3 + $0xe0] sm:$0xff] }
 0x2d4   :  { %7656 = vmatprep.subr.bf16.mxu0 %v11277_v23  ;;  %v11314_v23 = vld [vmem:[#allocation6 + $0x1288] ss:$16 sps:$4 sm:$0xff]  }
 0x2d5   :  { %8231 = vmatpush1.bf16.msra.mxu1 %v11278_v12  ;;  %v197_v12 = vadd.f32 %v181_v62, %v148_v59  ;;  %v426_v59 = vunpack.c.l.bf16 %v12644_v33  ;;  %v11323_v62 = vld [vmem:[#allocation6 + $0x16c0] ss:$16 sps:$4 sm:$0xff]   ;;  %v11346_v33 = vld [vmem:[#allocation6 + $0x132c] ss:$16 sps:$4 sm:$0xff]  }
 0x2d6   :  { %8232 = vmatprep.subr.bf16.mxu1 %v11286_v18  ;;  %v233_v18 = vunpack.c.h.bf16 %v12700_v3 }
 0x2d7   :  { %7657 = vmatpush1.bf16.msra.mxu0 %v11275_v11  ;;  %v12704_v11 = vld [vmem:[#allocation3 + $0x120] sm:$0xff] }
 0x2d8   :  { %7658 = vmatprep.subr.bf16.mxu0 %v11283_v35  ;;  %v11320_v35 = vld [vmem:[#allocation6 + $0x12a8] ss:$16 sps:$4 sm:$0xff]  }
 0x2d9   :  { %8233 = vmatpush1.bf16.msra.mxu1 %v11284_v25  ;;  %v246_v25 = vadd.f32 %v230_v55, %v197_v12  ;;  %v475_v12 = vunpack.c.l.bf16 %v12648_v40  ;;  %v11329_v55 = vld [vmem:[#allocation6 + $0x16e0] ss:$16 sps:$4 sm:$0xff]   ;;  %v11352_v40 = vld [vmem:[#allocation6 + $0x134c] ss:$16 sps:$4 sm:$0xff]  }
 0x2da   :  { %8243 = vmatprep.subr.bf16.mxu1 %v11292_v47  ;;  %v282_v47 = vunpack.c.h.bf16 %v12704_v11 }
 0x2db   :  { %7659 = vmatpush1.bf16.msra.mxu0 %v11281_v46 }
 0x2dc   :  { %8235 = vmatmul.mubr.bf16.vlgmr.msra.gmra.mrb[4].mxu1 %v12538_v54  ;;  %7669 = vmatprep.subr.bf16.mxu0 %v11289_v27  ;;  %v102_v54 = vunpack.c.h.bf16 %v12687_v2 }
 0x2dd   :  { %8244 = vmatpush1.bf16.msra.mxu1 %v11290_v36  ;;  %8275 = vmatprep.mubr.bf16.mxu1 %v12541_v0  ;;  %v135_v0 = vunpack.c.h.bf16 %v12690_v9  ;;  %v295_v36 = vadd.f32 %v279_v34, %v246_v25  ;;  %v524_v25 = vunpack.c.l.bf16 %v12652_v51  ;;  %v11335_v34 = vld [vmem:[#allocation6 + $0x1700] ss:$16 sps:$4 sm:$0xff]   ;;  %v11358_v51 = vld [vmem:[#allocation6 + $0x136c] ss:$16 sps:$4 sm:$0xff]  }
 0x2de   :  { %8245 = vmatprep.subr.bf16.mxu1 %v11298_v17  ;;  %7661 = vmatmul.mubr.bf16.vlgmr.msra.gmra.mrb[0].mxu0 %v12680_v58  ;;  %v12708_v17 = vld [vmem:[#allocation3 + $0x160] sm:$0xff] }
 0x2df   :  { %7670 = vmatpush1.bf16.msra.mxu0 %v11287_v63  ;;  %7701 = vmatprep.mubr.bf16.mxu0 %v12685_v50  ;;  %v151_v13 = vadd.f32 %v135_v0, %v102_v54  ;;  %v331_v27 = vunpack.c.h.bf16 %v12708_v17  ;;  %v344_v22 = vadd.f32 %v328_v48, %v295_v36  ;;  %v11325_v63 = vld [vmem:[#allocation6 + $0x16c4] ss:$16 sps:$4 sm:$0xff]   ;;  %v11332_v54 = vld [vmem:[#allocation6 + $0x12e8] ss:$16 sps:$4 sm:$0xff]   ;;  %v573_v36 = vunpack.c.l.bf16 %v12656_v57  ;;  %v11341_v48 = vld [vmem:[#allocation6 + $0x1720] ss:$16 sps:$4 sm:$0xff]  }
 0x2e0   :  { %7671 = vmatprep.subr.bf16.mxu0 %v11295_v61  ;;  %v12712_v61 = vld [vmem:[#allocation3 + $0x1a0] sm:$0xff]  ;;  %v11364_v57 = vld [vmem:[#allocation6 + $0x138c] ss:$16 sps:$4 sm:$0xff]  }
 0x2e1   :  { %8246 = vmatpush1.bf16.msra.mxu1 %v11296_v53  ;;  %v200_v19 = vadd.f32 %v184_v15, %v151_v13  ;;  %v11326_v53 = vld [vmem:[#allocation6 + $0x12c8] ss:$16 sps:$4 sm:$0xff]   ;;  %v393_v0 = vadd.f32 %v377_v26, %v344_v22  ;;  %v622_v22 = vunpack.c.l.bf16 %v12660_v44  ;;  %v11347_v26 = vld [vmem:[#allocation6 + $0x1740] ss:$16 sps:$4 sm:$0xff]   ;;  %v11370_v44 = vld [vmem:[#allocation6 + $0x13ac] ss:$16 sps:$4 sm:$0xff]  }
 0x2e2   :  { %8247 = vmatprep.subr.bf16.mxu1 %v11304_v5  ;;  %v11338_v13 = vld [vmem:[#allocation6 + $0x1308] ss:$16 sps:$4 sm:$0xff]  }
 0x2e3   :  { %7672 = vmatpush1.bf16.msra.mxu0 %v11293_v4  ;;  %v249_v30 = vadd.f32 %v233_v18, %v200_v19  ;;  %v11331_v4 = vld [vmem:[#allocation6 + $0x16e4] ss:$16 sps:$4 sm:$0xff]   ;;  %v442_v15 = vadd.f32 %v426_v59, %v393_v0  ;;  %v11344_v18 = vld [vmem:[#allocation6 + $0x1328] ss:$16 sps:$4 sm:$0xff]   ;;  %v671_v0 = vunpack.c.l.bf16 %v12664_v10  ;;  %v11353_v59 = vld [vmem:[#allocation6 + $0x1760] ss:$16 sps:$4 sm:$0xff]  }
 0x2e4   :  { %7673 = vmatprep.subr.bf16.mxu0 %v11301_v6  ;;  %v12716_v6 = vld [vmem:[#allocation3 + $0x1e0] sm:$0xff]  ;;  %v11376_v10 = vld [vmem:[#allocation6 + $0x13cc] ss:$16 sps:$4 sm:$0xff]  }
 0x2e5   :  { %8248 = vmatpush1.bf16.msra.mxu1 %v11302_v42  ;;  %v298_v46 = vadd.f32 %v282_v47, %v249_v30  ;;  %v380_v42 = vunpack.c.h.bf16 %v12712_v61  ;;  %v11350_v47 = vld [vmem:[#allocation6 + $0x1348] ss:$16 sps:$4 sm:$0xff]  }
 0x2e6   :  { %8249 = vmatprep.subr.bf16.mxu1 %v11310_v14 }
 0x2e7   :  { %7674 = vmatpush1.bf16.msra.mxu0 %v11299_v1  ;;  %v347_v5 = vadd.f32 %v331_v27, %v298_v46  ;;  %v11337_v1 = vld [vmem:[#allocation6 + $0x1704] ss:$16 sps:$4 sm:$0xff]   ;;  %v11356_v27 = vld [vmem:[#allocation6 + $0x1368] ss:$16 sps:$4 sm:$0xff]  }
 0x2e8   :  { %7675 = vmatprep.subr.bf16.mxu0 %v11307_v16  ;;  %v12720_v16 = vld [vmem:[#allocation3 + $0x220] sm:$0xff] }
 0x2e9   :  { %8250 = vmatpush1.bf16.msra.mxu1 %v11308_v20  ;;  %v396_v14 = vadd.f32 %v380_v42, %v347_v5  ;;  %v429_v20 = vunpack.c.h.bf16 %v12716_v6  ;;  %v478_v19 = vunpack.c.h.bf16 %v12720_v16  ;;  %v11362_v42 = vld [vmem:[#allocation6 + $0x1388] ss:$16 sps:$4 sm:$0xff]  }
 0x2ea   :  { %8251 = vmatprep.subr.bf16.mxu1 %v11316_v24 }
 0x2eb   :  { %7676 = vmatpush1.bf16.msra.mxu0 %v11305_v31  ;;  %v445_v24 = vadd.f32 %v429_v20, %v396_v14  ;;  %v11343_v31 = vld [vmem:[#allocation6 + $0x1724] ss:$16 sps:$4 sm:$0xff]   ;;  %v11368_v20 = vld [vmem:[#allocation6 + $0x13a8] ss:$16 sps:$4 sm:$0xff]  }
 0x2ec   :  { %7677 = vmatprep.subr.bf16.mxu0 %v11313_v29  ;;  %v12724_v29 = vld [vmem:[#allocation3 + $0x260] sm:$0xff] }
 0x2ed   :  { %8252 = vmatpush1.bf16.msra.mxu1 %v11314_v23  ;;  %v491_v23 = vadd.f32 %v475_v12, %v442_v15  ;;  %v527_v30 = vunpack.c.h.bf16 %v12724_v29  ;;  %v720_v15 = vunpack.c.l.bf16 %v12668_v21  ;;  %v11359_v12 = vld [vmem:[#allocation6 + $0x1780] ss:$16 sps:$4 sm:$0xff]   ;;  %v11382_v21 = vld [vmem:[#allocation6 + $0x13ec] ss:$16 sps:$4 sm:$0xff]  }
 0x2ee   :  { %8253 = vmatprep.subr.bf16.mxu1 %v11322_v60  ;;  %v494_v60 = vadd.f32 %v478_v19, %v445_v24  ;;  %v11374_v19 = vld [vmem:[#allocation6 + $0x13c8] ss:$16 sps:$4 sm:$0xff]  }
 0x2ef   :  { %7678 = vmatpush1.bf16.msra.mxu0 %v11311_v41  ;;  %v11349_v41 = vld [vmem:[#allocation6 + $0x1744] ss:$16 sps:$4 sm:$0xff]  }
 0x2f0   :  { %7679 = vmatprep.subr.bf16.mxu0 %v11319_v39  ;;  %v12728_v39 = vld [vmem:[#allocation3 + $0x2a0] sm:$0xff] }
 0x2f1   :  { %8254 = vmatpush1.bf16.msra.mxu1 %v11320_v35  ;;  %v540_v35 = vadd.f32 %v524_v25, %v491_v23  ;;  %v576_v46 = vunpack.c.h.bf16 %v12728_v39  ;;  %v769_v23 = vunpack.c.l.bf16 %v12672_v28  ;;  %v11365_v25 = vld [vmem:[#allocation6 + $0x17a0] ss:$16 sps:$4 sm:$0xff]   ;;  %v11388_v28 = vld [vmem:[#allocation6 + $0x140c] ss:$16 sps:$4 sm:$0xff]  }
 0x2f2   :  { %8255 = vmatprep.subr.bf16.mxu1 %v11328_v38  ;;  %v543_v38 = vadd.f32 %v527_v30, %v494_v60  ;;  %v11380_v30 = vld [vmem:[#allocation6 + $0x13e8] ss:$16 sps:$4 sm:$0xff]  }
 0x2f3   :  { %7680 = vmatpush1.bf16.msra.mxu0 %v11317_v43  ;;  %v11355_v43 = vld [vmem:[#allocation6 + $0x1764] ss:$16 sps:$4 sm:$0xff]  }
 0x2f4   :  { %7681 = vmatprep.subr.bf16.mxu0 %v11325_v63  ;;  %v12732_v63 = vld [vmem:[#allocation3 + $0x2e0] sm:$0xff] }
 0x2f5   :  { %8256 = vmatpush1.bf16.msra.mxu1 %v11326_v53  ;;  %v589_v53 = vadd.f32 %v573_v36, %v540_v35  ;;  %v625_v5 = vunpack.c.h.bf16 %v12732_v63  ;;  %v818_v35 = vunpack.c.l.bf16 %v12676_v37  ;;  %v11371_v36 = vld [vmem:[#allocation6 + $0x17c0] ss:$16 sps:$4 sm:$0xff]   ;;  %v11385_v37 = vld [vmem:[#allocation6 + $0x1804] ss:$16 sps:$4 sm:$0xff]  }
 0x2f6   :  { %8257 = vmatprep.subr.bf16.mxu1 %v11334_v52  ;;  %v592_v52 = vadd.f32 %v576_v46, %v543_v38  ;;  %v11386_v46 = vld [vmem:[#allocation6 + $0x1408] ss:$16 sps:$4 sm:$0xff]  }
 0x2f7   :  { %7682 = vmatpush1.bf16.msra.mxu0 %v11323_v62  ;;  %v11361_v62 = vld [vmem:[#allocation6 + $0x1784] ss:$16 sps:$4 sm:$0xff]  }
 0x2f8   :  { %7683 = vmatprep.subr.bf16.mxu0 %v11331_v4  ;;  %v12736_v4 = vld [vmem:[#allocation3 + $0x320] sm:$0xff] }
 0x2f9   :  { %8258 = vmatpush1.bf16.msra.mxu1 %v11332_v54  ;;  %v638_v54 = vadd.f32 %v622_v22, %v589_v53  ;;  %v674_v14 = vunpack.c.h.bf16 %v12736_v4  ;;  %v11377_v53 = vld [vmem:[#allocation6 + $0x17e0] ss:$16 sps:$4 sm:$0xff]   ;;  %v11394_v22 = vld [vmem:[#allocation6 + $0x142c] ss:$16 sps:$4 sm:$0xff]  }
 0x2fa   :  { %8259 = vmatprep.subr.bf16.mxu1 %v11340_v56  ;;  %v641_v56 = vadd.f32 %v625_v5, %v592_v52  ;;  %v101_v52 = vunpack.c.l.bf16 %v12687_v2  ;;  %v134_v5 = vunpack.c.l.bf16 %v12690_v9  ;;  %v11398_v2 = vld [vmem:[#allocation6 + $0x1448] ss:$16 sps:$4 sm:$0xff]  }
 0x2fb   :  { %7684 = vmatpush1.bf16.msra.mxu0 %v11329_v55  ;;  %v11367_v55 = vld [vmem:[#allocation6 + $0x17a4] ss:$16 sps:$4 sm:$0xff]  }
 0x2fc   :  { %7685 = vmatprep.subr.bf16.mxu0 %v11337_v1  ;;  %v12740_v1 = vld [vmem:[#allocation3 + $0x360] sm:$0xff]  ;;  %v150_v9 = vadd.f32 %v134_v5, %v101_v52  ;;  %v379_v52 = vunpack.c.l.bf16 %v12712_v61  ;;  %v11436_v61 = vld [vmem:[#allocation6 + $0x150c] ss:$16 sps:$4 sm:$0xff]  }
 0x2fd   :  { %8260 = vmatpush1.bf16.msra.mxu1 %v11338_v13  ;;  %v687_v13 = vadd.f32 %v671_v0, %v638_v54  ;;  %v723_v24 = vunpack.c.h.bf16 %v12740_v1  ;;  %v11400_v54 = vld [vmem:[#allocation6 + $0x144c] ss:$16 sps:$4 sm:$0xff]   ;;  %v11391_v0 = vld [vmem:[#allocation6 + $0x1824] ss:$16 sps:$4 sm:$0xff]   ;;  %v11413_v5 = vld [vmem:[#allocation6 + $0x18a0] ss:$16 sps:$4 sm:$0xff]  }
 0x2fe   :  { %8261 = vmatprep.subr.bf16.mxu1 %v11346_v33  ;;  %v690_v33 = vadd.f32 %v674_v14, %v641_v56  ;;  %v183_v56 = vunpack.c.l.bf16 %v12696_v32  ;;  %v11389_v14 = vld [vmem:[#allocation6 + $0x1820] ss:$16 sps:$4 sm:$0xff]  }
 0x2ff   :  { %7686 = vmatpush1.bf16.msra.mxu0 %v11335_v34  ;;  %v11373_v34 = vld [vmem:[#allocation6 + $0x17c4] ss:$16 sps:$4 sm:$0xff]   ;;  %v11395_v32 = vld [vmem:[#allocation6 + $0x1840] ss:$16 sps:$4 sm:$0xff]  }
 0x300   :  { %7687 = vmatprep.subr.bf16.mxu0 %v11343_v31  ;;  %v12744_v31 = vld [vmem:[#allocation3 + $0x3a0] sm:$0xff] }
 0x301   :  { %8262 = vmatpush1.bf16.msra.mxu1 %v11344_v18  ;;  %v736_v18 = vadd.f32 %v720_v15, %v687_v13  ;;  %v772_v60 = vunpack.c.h.bf16 %v12744_v31  ;;  %v11397_v13 = vld [vmem:[#allocation6 + $0x1844] ss:$16 sps:$4 sm:$0xff]  }
 0x302   :  { %8263 = vmatprep.subr.bf16.mxu1 %v11352_v40  ;;  %v739_v40 = vadd.f32 %v723_v24, %v690_v33  ;;  %v199_v33 = vadd.f32 %v183_v56, %v150_v9  ;;  %v232_v24 = vunpack.c.l.bf16 %v12700_v3  ;;  %v11418_v3 = vld [vmem:[#allocation6 + $0x14ac] ss:$16 sps:$4 sm:$0xff]   ;;  %v428_v9 = vunpack.c.l.bf16 %v12716_v6  ;;  %v11419_v56 = vld [vmem:[#allocation6 + $0x18c0] ss:$16 sps:$4 sm:$0xff]  }
 0x303   :  { %7688 = vmatpush1.bf16.msra.mxu0 %v11341_v48  ;;  %v11379_v48 = vld [vmem:[#allocation6 + $0x17e4] ss:$16 sps:$4 sm:$0xff]   ;;  %v11442_v6 = vld [vmem:[#allocation6 + $0x152c] ss:$16 sps:$4 sm:$0xff]  }
 0x304   :  { %7689 = vmatprep.subr.bf16.mxu0 %v11349_v41  ;;  %v12748_v41 = vld [vmem:[#allocation3 + $0x3e0] sm:$0xff] }
 0x305   :  { %8264 = vmatpush1.bf16.msra.mxu1 %v11350_v47  ;;  %v785_v47 = vadd.f32 %v769_v23, %v736_v18  ;;  %v821_v38 = vunpack.c.h.bf16 %v12748_v41  ;;  %v11403_v18 = vld [vmem:[#allocation6 + $0x1864] ss:$16 sps:$4 sm:$0xff]  }
 0x306   :  { %8265 = vmatprep.subr.bf16.mxu1 %v11358_v51  ;;  %v788_v51 = vadd.f32 %v772_v60, %v739_v40  ;;  %v248_v40 = vadd.f32 %v232_v24, %v199_v33  ;;  %v281_v60 = vunpack.c.l.bf16 %v12704_v11  ;;  %v11424_v11 = vld [vmem:[#allocation6 + $0x14cc] ss:$16 sps:$4 sm:$0xff]   ;;  %v477_v33 = vunpack.c.l.bf16 %v12720_v16  ;;  %v11425_v24 = vld [vmem:[#allocation6 + $0x18e0] ss:$16 sps:$4 sm:$0xff]  }
 0x307   :  { %7690 = vmatpush1.bf16.msra.mxu0 %v11347_v26  ;;  %v11448_v16 = vld [vmem:[#allocation6 + $0x154c] ss:$16 sps:$4 sm:$0xff]  }
 0x308   :  { %7691 = vmatprep.subr.bf16.mxu0 %v11355_v43  ;;  %v837_v26 = vadd.f32 %v821_v38, %v788_v51  ;;  %v11392_v43 = vld [vmem:[#allocation6 + $0x1428] ss:$16 sps:$4 sm:$0xff]   ;;  %v297_v51 = vadd.f32 %v281_v60, %v248_v40  ;;  %v330_v38 = vunpack.c.l.bf16 %v12708_v17  ;;  %v11430_v17 = vld [vmem:[#allocation6 + $0x14ec] ss:$16 sps:$4 sm:$0xff]   ;;  %v526_v40 = vunpack.c.l.bf16 %v12724_v29  ;;  %v11431_v60 = vld [vmem:[#allocation6 + $0x1900] ss:$16 sps:$4 sm:$0xff]  }
 0x309   :  { %8266 = vmatpush1.bf16.msra.mxu1 %v11356_v27  ;;  %v834_v27 = vadd.f32 %v818_v35, %v785_v47  ;;  %v11409_v47 = vld [vmem:[#allocation6 + $0x1884] ss:$16 sps:$4 sm:$0xff]   ;;  %v11454_v29 = vld [vmem:[#allocation6 + $0x156c] ss:$16 sps:$4 sm:$0xff]  }
 0x30a   :  { %8267 = vmatprep.subr.bf16.mxu1 %v11364_v57 }
 0x30b   :  { %7692 = vmatpush1.bf16.msra.mxu0 %v11353_v59  ;;  %v12752_v57 = vpack.c.bf16 %v834_v27, %v834_v27  ;;  %v12757_v59 = vpack.c.bf16 %v837_v26, %v837_v26  ;;  %v11415_v27 = vld [vmem:[#allocation6 + $0x18a4] ss:$16 sps:$4 sm:$0xff]   ;;  %v11422_v26 = vld [vmem:[#allocation6 + $0x14c8] ss:$16 sps:$4 sm:$0xff]  }
 0x30c   :  { %7693 = vmatprep.subr.bf16.mxu0 %v11361_v62  ;;  %v12762_v62 = vld [vmem:[#allocation3 + $0x68] sm:$0xff] }
 0x30d   :  { %8268 = vmatpush1.bf16.msra.mxu1 %v11362_v42  ;;  %v11383_v42 = vld [vmem:[#allocation6 + $0x1800] ss:$16 sps:$4 sm:$0xff]  }
 0x30e   :  { %8269 = vmatprep.subr.bf16.mxu1 %v11370_v44  ;;  %v12759_v44 = vld [vmem:[#allocation3 + $0x28] sm:$0xff] }
 0x30f   :  { %7694 = vmatpush1.bf16.msra.mxu0 %v11359_v12  ;;  %v12768_v12 = vld [vmem:[#allocation3 + $0xa8] sm:$0xff] }
 0x310   :  { %7695 = vmatprep.subr.bf16.mxu0 %v11367_v55  ;;  %v11404_v55 = vld [vmem:[#allocation6 + $0x1468] ss:$16 sps:$4 sm:$0xff]  }
 0x311   :  { %8270 = vmatpush1.bf16.msra.mxu1 %v11368_v20  ;;  %v11406_v20 = vld [vmem:[#allocation6 + $0x146c] ss:$16 sps:$4 sm:$0xff]  }
 0x312   :  { %8271 = vmatprep.subr.bf16.mxu1 %v11376_v10  ;;  %v186_v10 = vunpack.c.h.bf16 %v12768_v12 }
 0x313   :  { %7696 = vmatpush1.bf16.msra.mxu0 %v11365_v25  ;;  %v12772_v25 = vld [vmem:[#allocation3 + $0xe8] sm:$0xff] }
 0x314   :  { %7697 = vmatprep.subr.bf16.mxu0 %v11373_v34  ;;  %v11410_v34 = vld [vmem:[#allocation6 + $0x1488] ss:$16 sps:$4 sm:$0xff]  }
 0x315   :  { %8272 = vmatpush1.bf16.msra.mxu1 %v11374_v19  ;;  %v11412_v19 = vld [vmem:[#allocation6 + $0x148c] ss:$16 sps:$4 sm:$0xff]  }
 0x316   :  { %8273 = vmatprep.subr.bf16.mxu1 %v11382_v21  ;;  %v235_v21 = vunpack.c.h.bf16 %v12772_v25 }
 0x317   :  { %7698 = vmatpush1.bf16.msra.mxu0 %v11371_v36  ;;  %v12776_v36 = vld [vmem:[#allocation3 + $0x128] sm:$0xff] }
 0x318   :  { %7699 = vmatprep.subr.bf16.mxu0 %v11379_v48  ;;  %v11416_v48 = vld [vmem:[#allocation6 + $0x14a8] ss:$16 sps:$4 sm:$0xff]  }
 0x319   :  { %8274 = vmatpush1.bf16.msra.mxu1 %v11380_v30  ;;  %v11401_v30 = vld [vmem:[#allocation6 + $0x1860] ss:$16 sps:$4 sm:$0xff]  }
 0x31a   :  { %8284 = vmatprep.subr.bf16.mxu1 %v11388_v28  ;;  %v284_v28 = vunpack.c.h.bf16 %v12776_v36 }
 0x31b   :  { %7700 = vmatpush1.bf16.msra.mxu0 %v11377_v53 }
 0x31c   :  { %8276 = vmatmul.mubr.bf16.vlgmr.msra.gmra.mrb[4].mxu1 %v12608_v49  ;;  %7710 = vmatprep.subr.bf16.mxu0 %v11385_v37  ;;  %v104_v49 = vunpack.c.h.bf16 %v12759_v44 }
 0x31d   :  { %8285 = vmatpush1.bf16.msra.mxu1 %v11386_v46  ;;  %8316 = vmatprep.mubr.bf16.mxu1 %v12613_v8  ;;  %v137_v8 = vunpack.c.h.bf16 %v12762_v62  ;;  %v11407_v46 = vld [vmem:[#allocation6 + $0x1880] ss:$16 sps:$4 sm:$0xff]  }
 0x31e   :  { %8286 = vmatprep.subr.bf16.mxu1 %v11394_v22  ;;  %7702 = vmatmul.mubr.bf16.vlgmr.msra.gmra.mrb[0].mxu0 %v12752_v57  ;;  %v12780_v22 = vld [vmem:[#allocation3 + $0x168] sm:$0xff] }
 0x31f   :  { %7711 = vmatpush1.bf16.msra.mxu0 %v11383_v42  ;;  %7742 = vmatprep.mubr.bf16.mxu0 %v12757_v59  ;;  %v153_v15 = vadd.f32 %v137_v8, %v104_v49  ;;  %v333_v37 = vunpack.c.h.bf16 %v12780_v22  ;;  %v11421_v42 = vld [vmem:[#allocation6 + $0x18c4] ss:$16 sps:$4 sm:$0xff]   ;;  %v11428_v8 = vld [vmem:[#allocation6 + $0x14e8] ss:$16 sps:$4 sm:$0xff]  }
 0x320   :  { %7712 = vmatprep.subr.bf16.mxu0 %v11391_v0  ;;  %v12784_v0 = vld [vmem:[#allocation3 + $0x1a8] sm:$0xff] }
 0x321   :  { %8287 = vmatpush1.bf16.msra.mxu1 %v11392_v43  ;;  %v202_v23 = vadd.f32 %v186_v10, %v153_v15  ;;  %v346_v43 = vadd.f32 %v330_v38, %v297_v51  ;;  %v382_v49 = vunpack.c.h.bf16 %v12784_v0  ;;  %v11434_v10 = vld [vmem:[#allocation6 + $0x1508] ss:$16 sps:$4 sm:$0xff]   ;;  %v575_v51 = vunpack.c.l.bf16 %v12728_v39  ;;  %v11437_v38 = vld [vmem:[#allocation6 + $0x1920] ss:$16 sps:$4 sm:$0xff]   ;;  %v11460_v39 = vld [vmem:[#allocation6 + $0x158c] ss:$16 sps:$4 sm:$0xff]  }
 0x322   :  { %8288 = vmatprep.subr.bf16.mxu1 %v11400_v54 }
 0x323   :  { %7713 = vmatpush1.bf16.msra.mxu0 %v11389_v14  ;;  %v251_v35 = vadd.f32 %v235_v21, %v202_v23  ;;  %v11427_v14 = vld [vmem:[#allocation6 + $0x18e4] ss:$16 sps:$4 sm:$0xff]   ;;  %v11440_v21 = vld [vmem:[#allocation6 + $0x1528] ss:$16 sps:$4 sm:$0xff]  }
 0x324   :  { %7714 = vmatprep.subr.bf16.mxu0 %v11397_v13  ;;  %v12788_v13 = vld [vmem:[#allocation3 + $0x1e8] sm:$0xff] }
 0x325   :  { %8289 = vmatpush1.bf16.msra.mxu1 %v11398_v2  ;;  %v300_v53 = vadd.f32 %v284_v28, %v251_v35  ;;  %v395_v2 = vadd.f32 %v379_v52, %v346_v43  ;;  %v431_v15 = vunpack.c.h.bf16 %v12788_v13  ;;  %v11446_v28 = vld [vmem:[#allocation6 + $0x1548] ss:$16 sps:$4 sm:$0xff]   ;;  %v624_v43 = vunpack.c.l.bf16 %v12732_v63  ;;  %v11443_v52 = vld [vmem:[#allocation6 + $0x1940] ss:$16 sps:$4 sm:$0xff]   ;;  %v11466_v63 = vld [vmem:[#allocation6 + $0x15ac] ss:$16 sps:$4 sm:$0xff]  }
 0x326   :  { %8290 = vmatprep.subr.bf16.mxu1 %v11406_v20 }
 0x327   :  { %7715 = vmatpush1.bf16.msra.mxu0 %v11395_v32  ;;  %v349_v54 = vadd.f32 %v333_v37, %v300_v53  ;;  %v11433_v32 = vld [vmem:[#allocation6 + $0x1904] ss:$16 sps:$4 sm:$0xff]   ;;  %v11452_v37 = vld [vmem:[#allocation6 + $0x1568] ss:$16 sps:$4 sm:$0xff]  }
 0x328   :  { %7716 = vmatprep.subr.bf16.mxu0 %v11403_v18  ;;  %v12792_v18 = vld [vmem:[#allocation3 + $0x228] sm:$0xff] }
 0x329   :  { %8291 = vmatpush1.bf16.msra.mxu1 %v11404_v55  ;;  %v398_v20 = vadd.f32 %v382_v49, %v349_v54  ;;  %v444_v55 = vadd.f32 %v428_v9, %v395_v2  ;;  %v480_v23 = vunpack.c.h.bf16 %v12792_v18  ;;  %v11458_v49 = vld [vmem:[#allocation6 + $0x1588] ss:$16 sps:$4 sm:$0xff]   ;;  %v673_v2 = vunpack.c.l.bf16 %v12736_v4  ;;  %v11449_v9 = vld [vmem:[#allocation6 + $0x1960] ss:$16 sps:$4 sm:$0xff]   ;;  %v11472_v4 = vld [vmem:[#allocation6 + $0x15cc] ss:$16 sps:$4 sm:$0xff]  }
 0x32a   :  { %8292 = vmatprep.subr.bf16.mxu1 %v11412_v19 }
 0x32b   :  { %7717 = vmatpush1.bf16.msra.mxu0 %v11401_v30  ;;  %v447_v19 = vadd.f32 %v431_v15, %v398_v20  ;;  %v11439_v30 = vld [vmem:[#allocation6 + $0x1924] ss:$16 sps:$4 sm:$0xff]   ;;  %v11464_v15 = vld [vmem:[#allocation6 + $0x15a8] ss:$16 sps:$4 sm:$0xff]  }
 0x32c   :  { %7718 = vmatprep.subr.bf16.mxu0 %v11409_v47  ;;  %v12796_v47 = vld [vmem:[#allocation3 + $0x268] sm:$0xff] }
 0x32d   :  { %8293 = vmatpush1.bf16.msra.mxu1 %v11410_v34  ;;  %v493_v34 = vadd.f32 %v477_v33, %v444_v55  ;;  %v529_v35 = vunpack.c.h.bf16 %v12796_v47  ;;  %v722_v55 = vunpack.c.l.bf16 %v12740_v1  ;;  %v11455_v33 = vld [vmem:[#allocation6 + $0x1980] ss:$16 sps:$4 sm:$0xff]   ;;  %v11478_v1 = vld [vmem:[#allocation6 + $0x15ec] ss:$16 sps:$4 sm:$0xff]  }
 0x32e   :  { %8294 = vmatprep.subr.bf16.mxu1 %v11418_v3  ;;  %v496_v3 = vadd.f32 %v480_v23, %v447_v19  ;;  %v11470_v23 = vld [vmem:[#allocation6 + $0x15c8] ss:$16 sps:$4 sm:$0xff]  }
 0x32f   :  { %7719 = vmatpush1.bf16.msra.mxu0 %v11407_v46  ;;  %v11445_v46 = vld [vmem:[#allocation6 + $0x1944] ss:$16 sps:$4 sm:$0xff]  }
 0x330   :  { %7720 = vmatprep.subr.bf16.mxu0 %v11415_v27  ;;  %v12800_v27 = vld [vmem:[#allocation3 + $0x2a8] sm:$0xff] }
 0x331   :  { %8295 = vmatpush1.bf16.msra.mxu1 %v11416_v48  ;;  %v542_v48 = vadd.f32 %v526_v40, %v493_v34  ;;  %v578_v53 = vunpack.c.h.bf16 %v12800_v27  ;;  %v771_v34 = vunpack.c.l.bf16 %v12744_v31  ;;  %v11461_v40 = vld [vmem:[#allocation6 + $0x19a0] ss:$16 sps:$4 sm:$0xff]   ;;  %v11484_v31 = vld [vmem:[#allocation6 + $0x160c] ss:$16 sps:$4 sm:$0xff]  }
 0x332   :  { %8296 = vmatprep.subr.bf16.mxu1 %v11424_v11  ;;  %v545_v11 = vadd.f32 %v529_v35, %v496_v3  ;;  %v11476_v35 = vld [vmem:[#allocation6 + $0x15e8] ss:$16 sps:$4 sm:$0xff]  }
 0x333   :  { %7721 = vmatpush1.bf16.msra.mxu0 %v11413_v5  ;;  %v11451_v5 = vld [vmem:[#allocation6 + $0x1964] ss:$16 sps:$4 sm:$0xff]  }
 0x334   :  { %7722 = vmatprep.subr.bf16.mxu0 %v11421_v42  ;;  %v12804_v42 = vld [vmem:[#allocation3 + $0x2e8] sm:$0xff] }
 0x335   :  { %8297 = vmatpush1.bf16.msra.mxu1 %v11422_v26  ;;  %v591_v26 = vadd.f32 %v575_v51, %v542_v48  ;;  %v627_v54 = vunpack.c.h.bf16 %v12804_v42  ;;  %v820_v48 = vunpack.c.l.bf16 %v12748_v41  ;;  %v11467_v51 = vld [vmem:[#allocation6 + $0x19c0] ss:$16 sps:$4 sm:$0xff]   ;;  %v11481_v41 = vld [vmem:[#allocation6 + $0x1a04] ss:$16 sps:$4 sm:$0xff]  }
 0x336   :  { %8298 = vmatprep.subr.bf16.mxu1 %v11430_v17  ;;  %v594_v17 = vadd.f32 %v578_v53, %v545_v11  ;;  %v11482_v53 = vld [vmem:[#allocation6 + $0x1608] ss:$16 sps:$4 sm:$0xff]  }
 0x337   :  { %7723 = vmatpush1.bf16.msra.mxu0 %v11419_v56  ;;  %v11457_v56 = vld [vmem:[#allocation6 + $0x1984] ss:$16 sps:$4 sm:$0xff]  }
 0x338   :  { %7724 = vmatprep.subr.bf16.mxu0 %v11427_v14  ;;  %v12808_v14 = vld [vmem:[#allocation3 + $0x328] sm:$0xff] }
 0x339   :  { %8299 = vmatpush1.bf16.msra.mxu1 %v11428_v8  ;;  %v640_v8 = vadd.f32 %v624_v43, %v591_v26  ;;  %v676_v20 = vunpack.c.h.bf16 %v12808_v14  ;;  %v11473_v26 = vld [vmem:[#allocation6 + $0x19e0] ss:$16 sps:$4 sm:$0xff]   ;;  %v11490_v43 = vld [vmem:[#allocation6 + $0x162c] ss:$16 sps:$4 sm:$0xff]  }
 0x33a   :  { %8300 = vmatprep.subr.bf16.mxu1 %v11436_v61  ;;  %v643_v61 = vadd.f32 %v627_v54, %v594_v17  ;;  %v103_v17 = vunpack.c.l.bf16 %v12759_v44  ;;  %v136_v54 = vunpack.c.l.bf16 %v12762_v62  ;;  %v11494_v44 = vld [vmem:[#allocation6 + $0x1648] ss:$16 sps:$4 sm:$0xff]  }
 0x33b   :  { %7725 = vmatpush1.bf16.msra.mxu0 %v11425_v24  ;;  %v11463_v24 = vld [vmem:[#allocation6 + $0x19a4] ss:$16 sps:$4 sm:$0xff]  }
 0x33c   :  { %7726 = vmatprep.subr.bf16.mxu0 %v11433_v32  ;;  %v12812_v32 = vld [vmem:[#allocation3 + $0x368] sm:$0xff]  ;;  %v152_v62 = vadd.f32 %v136_v54, %v103_v17  ;;  %v381_v17 = vunpack.c.l.bf16 %v12784_v0  ;;  %v11509_v54 = vld [vmem:[#allocation6 + $0x1aa0] ss:$16 sps:$4 sm:$0xff]  }
 0x33d   :  { %8301 = vmatpush1.bf16.msra.mxu1 %v11434_v10  ;;  %v689_v10 = vadd.f32 %v673_v2, %v640_v8  ;;  %v725_v19 = vunpack.c.h.bf16 %v12812_v32  ;;  %v11496_v8 = vld [vmem:[#allocation6 + $0x164c] ss:$16 sps:$4 sm:$0xff]   ;;  %v11487_v2 = vld [vmem:[#allocation6 + $0x1a24] ss:$16 sps:$4 sm:$0xff]  }
 0x33e   :  { %8302 = vmatprep.subr.bf16.mxu1 %v11442_v6  ;;  %v692_v6 = vadd.f32 %v676_v20, %v643_v61  ;;  %v185_v61 = vunpack.c.l.bf16 %v12768_v12  ;;  %v11485_v20 = vld [vmem:[#allocation6 + $0x1a20] ss:$16 sps:$4 sm:$0xff]   ;;  %v11532_v0 = vld [vmem:[#allocation6 + $0x170c] ss:$16 sps:$4 sm:$0xff]  }
 0x33f   :  { %7727 = vmatpush1.bf16.msra.mxu0 %v11431_v60  ;;  %v11469_v60 = vld [vmem:[#allocation6 + $0x19c4] ss:$16 sps:$4 sm:$0xff]   ;;  %v11491_v12 = vld [vmem:[#allocation6 + $0x1a40] ss:$16 sps:$4 sm:$0xff]  }
 0x340   :  { %7728 = vmatprep.subr.bf16.mxu0 %v11439_v30  ;;  %v12816_v30 = vld [vmem:[#allocation3 + $0x3a8] sm:$0xff] }
 0x341   :  { %8303 = vmatpush1.bf16.msra.mxu1 %v11440_v21  ;;  %v738_v21 = vadd.f32 %v722_v55, %v689_v10  ;;  %v774_v3 = vunpack.c.h.bf16 %v12816_v30  ;;  %v11493_v10 = vld [vmem:[#allocation6 + $0x1a44] ss:$16 sps:$4 sm:$0xff]  }
 0x342   :  { %8304 = vmatprep.subr.bf16.mxu1 %v11448_v16  ;;  %v741_v16 = vadd.f32 %v725_v19, %v692_v6  ;;  %v201_v6 = vadd.f32 %v185_v61, %v152_v62  ;;  %v234_v19 = vunpack.c.l.bf16 %v12772_v25  ;;  %v11514_v25 = vld [vmem:[#allocation6 + $0x16ac] ss:$16 sps:$4 sm:$0xff]   ;;  %v430_v62 = vunpack.c.l.bf16 %v12788_v13  ;;  %v11515_v61 = vld [vmem:[#allocation6 + $0x1ac0] ss:$16 sps:$4 sm:$0xff]  }
 0x343   :  { %7729 = vmatpush1.bf16.msra.mxu0 %v11437_v38  ;;  %v11475_v38 = vld [vmem:[#allocation6 + $0x19e4] ss:$16 sps:$4 sm:$0xff]   ;;  %v11538_v13 = vld [vmem:[#allocation6 + $0x172c] ss:$16 sps:$4 sm:$0xff]  }
 0x344   :  { %7730 = vmatprep.subr.bf16.mxu0 %v11445_v46  ;;  %v12820_v46 = vld [vmem:[#allocation3 + $0x3e8] sm:$0xff] }
 0x345   :  { %8305 = vmatpush1.bf16.msra.mxu1 %v11446_v28  ;;  %v787_v28 = vadd.f32 %v771_v34, %v738_v21  ;;  %v823_v11 = vunpack.c.h.bf16 %v12820_v46  ;;  %v11499_v21 = vld [vmem:[#allocation6 + $0x1a64] ss:$16 sps:$4 sm:$0xff]  }
 0x346   :  { %8306 = vmatprep.subr.bf16.mxu1 %v11454_v29  ;;  %v790_v29 = vadd.f32 %v774_v3, %v741_v16  ;;  %v250_v16 = vadd.f32 %v234_v19, %v201_v6  ;;  %v283_v3 = vunpack.c.l.bf16 %v12776_v36  ;;  %v11520_v36 = vld [vmem:[#allocation6 + $0x16cc] ss:$16 sps:$4 sm:$0xff]   ;;  %v479_v6 = vunpack.c.l.bf16 %v12792_v18  ;;  %v11521_v19 = vld [vmem:[#allocation6 + $0x1ae0] ss:$16 sps:$4 sm:$0xff]  }
 0x347   :  { %7731 = vmatpush1.bf16.msra.mxu0 %v11443_v52  ;;  %v11544_v18 = vld [vmem:[#allocation6 + $0x174c] ss:$16 sps:$4 sm:$0xff]  }
 0x348   :  { %7732 = vmatprep.subr.bf16.mxu0 %v11451_v5  ;;  %v839_v52 = vadd.f32 %v823_v11, %v790_v29  ;;  %v11488_v5 = vld [vmem:[#allocation6 + $0x1628] ss:$16 sps:$4 sm:$0xff]   ;;  %v299_v29 = vadd.f32 %v283_v3, %v250_v16  ;;  %v332_v11 = vunpack.c.l.bf16 %v12780_v22  ;;  %v11526_v22 = vld [vmem:[#allocation6 + $0x16ec] ss:$16 sps:$4 sm:$0xff]   ;;  %v528_v16 = vunpack.c.l.bf16 %v12796_v47  ;;  %v11527_v3 = vld [vmem:[#allocation6 + $0x1b00] ss:$16 sps:$4 sm:$0xff]  }
 0x349   :  { %8307 = vmatpush1.bf16.msra.mxu1 %v11452_v37  ;;  %v836_v37 = vadd.f32 %v820_v48, %v787_v28  ;;  %v11505_v28 = vld [vmem:[#allocation6 + $0x1a84] ss:$16 sps:$4 sm:$0xff]   ;;  %v11550_v47 = vld [vmem:[#allocation6 + $0x176c] ss:$16 sps:$4 sm:$0xff]  }
 0x34a   :  { %8308 = vmatprep.subr.bf16.mxu1 %v11460_v39 }
 0x34b   :  { %7733 = vmatpush1.bf16.msra.mxu0 %v11449_v9  ;;  %v12824_v39 = vpack.c.bf16 %v836_v37, %v836_v37  ;;  %v12829_v9 = vpack.c.bf16 %v839_v52, %v839_v52  ;;  %v11511_v37 = vld [vmem:[#allocation6 + $0x1aa4] ss:$16 sps:$4 sm:$0xff]   ;;  %v11518_v52 = vld [vmem:[#allocation6 + $0x16c8] ss:$16 sps:$4 sm:$0xff]  }
 0x34c   :  { %7734 = vmatprep.subr.bf16.mxu0 %v11457_v56  ;;  %v12834_v56 = vld [vmem:[#allocation3 + $0x70] sm:$0xff] }
 0x34d   :  { %8309 = vmatpush1.bf16.msra.mxu1 %v11458_v49  ;;  %v11479_v49 = vld [vmem:[#allocation6 + $0x1a00] ss:$16 sps:$4 sm:$0xff]  }
 0x34e   :  { %8310 = vmatprep.subr.bf16.mxu1 %v11466_v63  ;;  %v12831_v63 = vld [vmem:[#allocation3 + $0x30] sm:$0xff] }
 0x34f   :  { %7735 = vmatpush1.bf16.msra.mxu0 %v11455_v33  ;;  %v12840_v33 = vld [vmem:[#allocation3 + $0xb0] sm:$0xff] }
 0x350   :  { %7736 = vmatprep.subr.bf16.mxu0 %v11463_v24  ;;  %v11500_v24 = vld [vmem:[#allocation6 + $0x1668] ss:$16 sps:$4 sm:$0xff]  }
 0x351   :  { %8311 = vmatpush1.bf16.msra.mxu1 %v11464_v15  ;;  %v11502_v15 = vld [vmem:[#allocation6 + $0x166c] ss:$16 sps:$4 sm:$0xff]  }
 0x352   :  { %8312 = vmatprep.subr.bf16.mxu1 %v11472_v4  ;;  %v188_v4 = vunpack.c.h.bf16 %v12840_v33 }
 0x353   :  { %7737 = vmatpush1.bf16.msra.mxu0 %v11461_v40  ;;  %v12844_v40 = vld [vmem:[#allocation3 + $0xf0] sm:$0xff] }
 0x354   :  { %7738 = vmatprep.subr.bf16.mxu0 %v11469_v60  ;;  %v11506_v60 = vld [vmem:[#allocation6 + $0x1688] ss:$16 sps:$4 sm:$0xff]  }
 0x355   :  { %8313 = vmatpush1.bf16.msra.mxu1 %v11470_v23  ;;  %v11508_v23 = vld [vmem:[#allocation6 + $0x168c] ss:$16 sps:$4 sm:$0xff]  }
 0x356   :  { %8314 = vmatprep.subr.bf16.mxu1 %v11478_v1  ;;  %v237_v1 = vunpack.c.h.bf16 %v12844_v40 }
 0x357   :  { %7739 = vmatpush1.bf16.msra.mxu0 %v11467_v51  ;;  %v12848_v51 = vld [vmem:[#allocation3 + $0x130] sm:$0xff] }
 0x358   :  { %7740 = vmatprep.subr.bf16.mxu0 %v11475_v38  ;;  %v11512_v38 = vld [vmem:[#allocation6 + $0x16a8] ss:$16 sps:$4 sm:$0xff]  }
 0x359   :  { %8315 = vmatpush1.bf16.msra.mxu1 %v11476_v35  ;;  %v11497_v35 = vld [vmem:[#allocation6 + $0x1a60] ss:$16 sps:$4 sm:$0xff]  }
 0x35a   :  { %8325 = vmatprep.subr.bf16.mxu1 %v11484_v31  ;;  %v286_v31 = vunpack.c.h.bf16 %v12848_v51 }
 0x35b   :  { %7741 = vmatpush1.bf16.msra.mxu0 %v11473_v26 }
 0x35c   :  { %8317 = vmatmul.mubr.bf16.vlgmr.msra.gmra.mrb[4].mxu1 %v12680_v58  ;;  %7751 = vmatprep.subr.bf16.mxu0 %v11481_v41  ;;  %v106_v58 = vunpack.c.h.bf16 %v12831_v63 }
 0x35d   :  { %8326 = vmatpush1.bf16.msra.mxu1 %v11482_v53  ;;  %8357 = vmatprep.mubr.bf16.mxu1 %v12685_v50  ;;  %v139_v50 = vunpack.c.h.bf16 %v12834_v56  ;;  %v11503_v53 = vld [vmem:[#allocation6 + $0x1a80] ss:$16 sps:$4 sm:$0xff]  }
 0x35e   :  { %8327 = vmatprep.subr.bf16.mxu1 %v11490_v43  ;;  %7743 = vmatmul.mubr.bf16.vlgmr.msra.gmra.mrb[0].mxu0 %v12824_v39  ;;  %v12852_v43 = vld [vmem:[#allocation3 + $0x170] sm:$0xff] }
 0x35f   :  { %7752 = vmatpush1.bf16.msra.mxu0 %v11479_v49  ;;  %7783 = vmatprep.mubr.bf16.mxu0 %v12829_v9  ;;  %v155_v55 = vadd.f32 %v139_v50, %v106_v58  ;;  %v335_v41 = vunpack.c.h.bf16 %v12852_v43  ;;  %v11517_v49 = vld [vmem:[#allocation6 + $0x1ac4] ss:$16 sps:$4 sm:$0xff]   ;;  %v11524_v50 = vld [vmem:[#allocation6 + $0x16e8] ss:$16 sps:$4 sm:$0xff]  }
 0x360   :  { %7753 = vmatprep.subr.bf16.mxu0 %v11487_v2  ;;  %v12856_v2 = vld [vmem:[#allocation3 + $0x1b0] sm:$0xff] }
 0x361   :  { %8328 = vmatpush1.bf16.msra.mxu1 %v11488_v5  ;;  %v204_v34 = vadd.f32 %v188_v4, %v155_v55  ;;  %v348_v5 = vadd.f32 %v332_v11, %v299_v29  ;;  %v384_v58 = vunpack.c.h.bf16 %v12856_v2  ;;  %v11530_v4 = vld [vmem:[#allocation6 + $0x1708] ss:$16 sps:$4 sm:$0xff]   ;;  %v577_v29 = vunpack.c.l.bf16 %v12800_v27  ;;  %v11533_v11 = vld [vmem:[#allocation6 + $0x1b20] ss:$16 sps:$4 sm:$0xff]   ;;  %v11556_v27 = vld [vmem:[#allocation6 + $0x178c] ss:$16 sps:$4 sm:$0xff]  }
 0x362   :  { %8329 = vmatprep.subr.bf16.mxu1 %v11496_v8 }
 0x363   :  { %7754 = vmatpush1.bf16.msra.mxu0 %v11485_v20  ;;  %v253_v48 = vadd.f32 %v237_v1, %v204_v34  ;;  %v11523_v20 = vld [vmem:[#allocation6 + $0x1ae4] ss:$16 sps:$4 sm:$0xff]   ;;  %v11536_v1 = vld [vmem:[#allocation6 + $0x1728] ss:$16 sps:$4 sm:$0xff]  }
 0x364   :  { %7755 = vmatprep.subr.bf16.mxu0 %v11493_v10  ;;  %v12860_v10 = vld [vmem:[#allocation3 + $0x1f0] sm:$0xff] }
 0x365   :  { %8330 = vmatpush1.bf16.msra.mxu1 %v11494_v44  ;;  %v302_v26 = vadd.f32 %v286_v31, %v253_v48  ;;  %v397_v44 = vadd.f32 %v381_v17, %v348_v5  ;;  %v433_v55 = vunpack.c.h.bf16 %v12860_v10  ;;  %v11542_v31 = vld [vmem:[#allocation6 + $0x1748] ss:$16 sps:$4 sm:$0xff]   ;;  %v626_v5 = vunpack.c.l.bf16 %v12804_v42  ;;  %v11539_v17 = vld [vmem:[#allocation6 + $0x1b40] ss:$16 sps:$4 sm:$0xff]   ;;  %v11562_v42 = vld [vmem:[#allocation6 + $0x17ac] ss:$16 sps:$4 sm:$0xff]  }
 0x366   :  { %8331 = vmatprep.subr.bf16.mxu1 %v11502_v15 }
 0x367   :  { %7756 = vmatpush1.bf16.msra.mxu0 %v11491_v12  ;;  %v351_v8 = vadd.f32 %v335_v41, %v302_v26  ;;  %v11529_v12 = vld [vmem:[#allocation6 + $0x1b04] ss:$16 sps:$4 sm:$0xff]   ;;  %v11548_v41 = vld [vmem:[#allocation6 + $0x1768] ss:$16 sps:$4 sm:$0xff]  }
 0x368   :  { %7757 = vmatprep.subr.bf16.mxu0 %v11499_v21  ;;  %v12864_v21 = vld [vmem:[#allocation3 + $0x230] sm:$0xff] }
 0x369   :  { %8332 = vmatpush1.bf16.msra.mxu1 %v11500_v24  ;;  %v400_v15 = vadd.f32 %v384_v58, %v351_v8  ;;  %v446_v24 = vadd.f32 %v430_v62, %v397_v44  ;;  %v482_v34 = vunpack.c.h.bf16 %v12864_v21  ;;  %v11554_v58 = vld [vmem:[#allocation6 + $0x1788] ss:$16 sps:$4 sm:$0xff]   ;;  %v675_v44 = vunpack.c.l.bf16 %v12808_v14  ;;  %v11545_v62 = vld [vmem:[#allocation6 + $0x1b60] ss:$16 sps:$4 sm:$0xff]   ;;  %v11568_v14 = vld [vmem:[#allocation6 + $0x17cc] ss:$16 sps:$4 sm:$0xff]  }
 0x36a   :  { %8333 = vmatprep.subr.bf16.mxu1 %v11508_v23 }
 0x36b   :  { %7758 = vmatpush1.bf16.msra.mxu0 %v11497_v35  ;;  %v449_v23 = vadd.f32 %v433_v55, %v400_v15  ;;  %v11535_v35 = vld [vmem:[#allocation6 + $0x1b24] ss:$16 sps:$4 sm:$0xff]   ;;  %v11560_v55 = vld [vmem:[#allocation6 + $0x17a8] ss:$16 sps:$4 sm:$0xff]  }
 0x36c   :  { %7759 = vmatprep.subr.bf16.mxu0 %v11505_v28  ;;  %v12868_v28 = vld [vmem:[#allocation3 + $0x270] sm:$0xff] }
 0x36d   :  { %8334 = vmatpush1.bf16.msra.mxu1 %v11506_v60  ;;  %v495_v60 = vadd.f32 %v479_v6, %v446_v24  ;;  %v531_v48 = vunpack.c.h.bf16 %v12868_v28  ;;  %v724_v24 = vunpack.c.l.bf16 %v12812_v32  ;;  %v11551_v6 = vld [vmem:[#allocation6 + $0x1b80] ss:$16 sps:$4 sm:$0xff]   ;;  %v11574_v32 = vld [vmem:[#allocation6 + $0x17ec] ss:$16 sps:$4 sm:$0xff]  }
 0x36e   :  { %8335 = vmatprep.subr.bf16.mxu1 %v11514_v25  ;;  %v498_v25 = vadd.f32 %v482_v34, %v449_v23  ;;  %v11566_v34 = vld [vmem:[#allocation6 + $0x17c8] ss:$16 sps:$4 sm:$0xff]  }
 0x36f   :  { %7760 = vmatpush1.bf16.msra.mxu0 %v11503_v53  ;;  %v11541_v53 = vld [vmem:[#allocation6 + $0x1b44] ss:$16 sps:$4 sm:$0xff]  }
 0x370   :  { %7761 = vmatprep.subr.bf16.mxu0 %v11511_v37  ;;  %v12872_v37 = vld [vmem:[#allocation3 + $0x2b0] sm:$0xff] }
 0x371   :  { %8336 = vmatpush1.bf16.msra.mxu1 %v11512_v38  ;;  %v544_v38 = vadd.f32 %v528_v16, %v495_v60  ;;  %v580_v26 = vunpack.c.h.bf16 %v12872_v37  ;;  %v773_v60 = vunpack.c.l.bf16 %v12816_v30  ;;  %v11557_v16 = vld [vmem:[#allocation6 + $0x1ba0] ss:$16 sps:$4 sm:$0xff]   ;;  %v11580_v30 = vld [vmem:[#allocation6 + $0x180c] ss:$16 sps:$4 sm:$0xff]  }
 0x372   :  { %8337 = vmatprep.subr.bf16.mxu1 %v11520_v36  ;;  %v547_v36 = vadd.f32 %v531_v48, %v498_v25  ;;  %v11572_v48 = vld [vmem:[#allocation6 + $0x17e8] ss:$16 sps:$4 sm:$0xff]  }
 0x373   :  { %7762 = vmatpush1.bf16.msra.mxu0 %v11509_v54  ;;  %v11547_v54 = vld [vmem:[#allocation6 + $0x1b64] ss:$16 sps:$4 sm:$0xff]  }
 0x374   :  { %7763 = vmatprep.subr.bf16.mxu0 %v11517_v49  ;;  %v12876_v49 = vld [vmem:[#allocation3 + $0x2f0] sm:$0xff] }
 0x375   :  { %8338 = vmatpush1.bf16.msra.mxu1 %v11518_v52  ;;  %v593_v52 = vadd.f32 %v577_v29, %v544_v38  ;;  %v629_v8 = vunpack.c.h.bf16 %v12876_v49  ;;  %v822_v38 = vunpack.c.l.bf16 %v12820_v46  ;;  %v11563_v29 = vld [vmem:[#allocation6 + $0x1bc0] ss:$16 sps:$4 sm:$0xff]   ;;  %v11577_v46 = vld [vmem:[#allocation6 + $0x1c04] ss:$16 sps:$4 sm:$0xff]  }
 0x376   :  { %8339 = vmatprep.subr.bf16.mxu1 %v11526_v22  ;;  %v596_v22 = vadd.f32 %v580_v26, %v547_v36  ;;  %v11578_v26 = vld [vmem:[#allocation6 + $0x1808] ss:$16 sps:$4 sm:$0xff]  }
 0x377   :  { %7764 = vmatpush1.bf16.msra.mxu0 %v11515_v61  ;;  %v11553_v61 = vld [vmem:[#allocation6 + $0x1b84] ss:$16 sps:$4 sm:$0xff]  }
 0x378   :  { %7765 = vmatprep.subr.bf16.mxu0 %v11523_v20  ;;  %v12880_v20 = vld [vmem:[#allocation3 + $0x330] sm:$0xff] }
 0x379   :  { %8340 = vmatpush1.bf16.msra.mxu1 %v11524_v50  ;;  %v642_v50 = vadd.f32 %v626_v5, %v593_v52  ;;  %v678_v15 = vunpack.c.h.bf16 %v12880_v20  ;;  %v11569_v52 = vld [vmem:[#allocation6 + $0x1be0] ss:$16 sps:$4 sm:$0xff]   ;;  %v11586_v5 = vld [vmem:[#allocation6 + $0x182c] ss:$16 sps:$4 sm:$0xff]  }
 0x37a   :  { %8341 = vmatprep.subr.bf16.mxu1 %v11532_v0  ;;  %v645_v0 = vadd.f32 %v629_v8, %v596_v22  ;;  %v105_v22 = vunpack.c.l.bf16 %v12831_v63  ;;  %v138_v8 = vunpack.c.l.bf16 %v12834_v56  ;;  %v11590_v63 = vld [vmem:[#allocation6 + $0x1848] ss:$16 sps:$4 sm:$0xff]  }
 0x37b   :  { %7766 = vmatpush1.bf16.msra.mxu0 %v11521_v19  ;;  %v11559_v19 = vld [vmem:[#allocation6 + $0x1ba4] ss:$16 sps:$4 sm:$0xff]  }
 0x37c   :  { %7767 = vmatprep.subr.bf16.mxu0 %v11529_v12  ;;  %v12884_v12 = vld [vmem:[#allocation3 + $0x370] sm:$0xff]  ;;  %v154_v56 = vadd.f32 %v138_v8, %v105_v22  ;;  %v383_v22 = vunpack.c.l.bf16 %v12856_v2  ;;  %v11628_v2 = vld [vmem:[#allocation6 + $0x190c] ss:$16 sps:$4 sm:$0xff]  }
 0x37d   :  { %8342 = vmatpush1.bf16.msra.mxu1 %v11530_v4  ;;  %v691_v4 = vadd.f32 %v675_v44, %v642_v50  ;;  %v727_v23 = vunpack.c.h.bf16 %v12884_v12  ;;  %v11592_v50 = vld [vmem:[#allocation6 + $0x184c] ss:$16 sps:$4 sm:$0xff]   ;;  %v11583_v44 = vld [vmem:[#allocation6 + $0x1c24] ss:$16 sps:$4 sm:$0xff]   ;;  %v11605_v8 = vld [vmem:[#allocation6 + $0x1ca0] ss:$16 sps:$4 sm:$0xff]  }
 0x37e   :  { %8343 = vmatprep.subr.bf16.mxu1 %v11538_v13  ;;  %v694_v13 = vadd.f32 %v678_v15, %v645_v0  ;;  %v187_v0 = vunpack.c.l.bf16 %v12840_v33  ;;  %v11581_v15 = vld [vmem:[#allocation6 + $0x1c20] ss:$16 sps:$4 sm:$0xff]  }
 0x37f   :  { %7768 = vmatpush1.bf16.msra.mxu0 %v11527_v3  ;;  %v11565_v3 = vld [vmem:[#allocation6 + $0x1bc4] ss:$16 sps:$4 sm:$0xff]   ;;  %v11587_v33 = vld [vmem:[#allocation6 + $0x1c40] ss:$16 sps:$4 sm:$0xff]  }
 0x380   :  { %7769 = vmatprep.subr.bf16.mxu0 %v11535_v35  ;;  %v12888_v35 = vld [vmem:[#allocation3 + $0x3b0] sm:$0xff] }
 0x381   :  { %8344 = vmatpush1.bf16.msra.mxu1 %v11536_v1  ;;  %v740_v1 = vadd.f32 %v724_v24, %v691_v4  ;;  %v776_v25 = vunpack.c.h.bf16 %v12888_v35  ;;  %v11589_v4 = vld [vmem:[#allocation6 + $0x1c44] ss:$16 sps:$4 sm:$0xff]  }
 0x382   :  { %8345 = vmatprep.subr.bf16.mxu1 %v11544_v18  ;;  %v743_v18 = vadd.f32 %v727_v23, %v694_v13  ;;  %v203_v13 = vadd.f32 %v187_v0, %v154_v56  ;;  %v236_v23 = vunpack.c.l.bf16 %v12844_v40  ;;  %v11610_v40 = vld [vmem:[#allocation6 + $0x18ac] ss:$16 sps:$4 sm:$0xff]   ;;  %v432_v56 = vunpack.c.l.bf16 %v12860_v10  ;;  %v11611_v0 = vld [vmem:[#allocation6 + $0x1cc0] ss:$16 sps:$4 sm:$0xff]  }
 0x383   :  { %7770 = vmatpush1.bf16.msra.mxu0 %v11533_v11  ;;  %v11571_v11 = vld [vmem:[#allocation6 + $0x1be4] ss:$16 sps:$4 sm:$0xff]   ;;  %v11634_v10 = vld [vmem:[#allocation6 + $0x192c] ss:$16 sps:$4 sm:$0xff]  }
 0x384   :  { %7771 = vmatprep.subr.bf16.mxu0 %v11541_v53  ;;  %v12892_v53 = vld [vmem:[#allocation3 + $0x3f0] sm:$0xff] }
 0x385   :  { %8346 = vmatpush1.bf16.msra.mxu1 %v11542_v31  ;;  %v789_v31 = vadd.f32 %v773_v60, %v740_v1  ;;  %v825_v36 = vunpack.c.h.bf16 %v12892_v53  ;;  %v11595_v1 = vld [vmem:[#allocation6 + $0x1c64] ss:$16 sps:$4 sm:$0xff]  }
 0x386   :  { %8347 = vmatprep.subr.bf16.mxu1 %v11550_v47  ;;  %v792_v47 = vadd.f32 %v776_v25, %v743_v18  ;;  %v252_v18 = vadd.f32 %v236_v23, %v203_v13  ;;  %v285_v25 = vunpack.c.l.bf16 %v12848_v51  ;;  %v11616_v51 = vld [vmem:[#allocation6 + $0x18cc] ss:$16 sps:$4 sm:$0xff]   ;;  %v481_v13 = vunpack.c.l.bf16 %v12864_v21  ;;  %v11617_v23 = vld [vmem:[#allocation6 + $0x1ce0] ss:$16 sps:$4 sm:$0xff]  }
 0x387   :  { %7772 = vmatpush1.bf16.msra.mxu0 %v11539_v17  ;;  %v11640_v21 = vld [vmem:[#allocation6 + $0x194c] ss:$16 sps:$4 sm:$0xff]  }
 0x388   :  { %7773 = vmatprep.subr.bf16.mxu0 %v11547_v54  ;;  %v841_v17 = vadd.f32 %v825_v36, %v792_v47  ;;  %v11584_v54 = vld [vmem:[#allocation6 + $0x1828] ss:$16 sps:$4 sm:$0xff]   ;;  %v301_v47 = vadd.f32 %v285_v25, %v252_v18  ;;  %v334_v36 = vunpack.c.l.bf16 %v12852_v43  ;;  %v11622_v43 = vld [vmem:[#allocation6 + $0x18ec] ss:$16 sps:$4 sm:$0xff]   ;;  %v530_v18 = vunpack.c.l.bf16 %v12868_v28  ;;  %v11623_v25 = vld [vmem:[#allocation6 + $0x1d00] ss:$16 sps:$4 sm:$0xff]  }
 0x389   :  { %8348 = vmatpush1.bf16.msra.mxu1 %v11548_v41  ;;  %v838_v41 = vadd.f32 %v822_v38, %v789_v31  ;;  %v11601_v31 = vld [vmem:[#allocation6 + $0x1c84] ss:$16 sps:$4 sm:$0xff]   ;;  %v11646_v28 = vld [vmem:[#allocation6 + $0x196c] ss:$16 sps:$4 sm:$0xff]  }
 0x38a   :  { %8349 = vmatprep.subr.bf16.mxu1 %v11556_v27 }
 0x38b   :  { %7774 = vmatpush1.bf16.msra.mxu0 %v11545_v62  ;;  %v12896_v27 = vpack.c.bf16 %v838_v41, %v838_v41  ;;  %v12901_v62 = vpack.c.bf16 %v841_v17, %v841_v17  ;;  %v11607_v41 = vld [vmem:[#allocation6 + $0x1ca4] ss:$16 sps:$4 sm:$0xff]   ;;  %v11614_v17 = vld [vmem:[#allocation6 + $0x18c8] ss:$16 sps:$4 sm:$0xff]  }
 0x38c   :  { %7775 = vmatprep.subr.bf16.mxu0 %v11553_v61  ;;  %v12906_v61 = vld [vmem:[#allocation3 + $0x78] sm:$0xff] }
 0x38d   :  { %8350 = vmatpush1.bf16.msra.mxu1 %v11554_v58  ;;  %v11575_v58 = vld [vmem:[#allocation6 + $0x1c00] ss:$16 sps:$4 sm:$0xff]  }
 0x38e   :  { %8351 = vmatprep.subr.bf16.mxu1 %v11562_v42  ;;  %v12903_v42 = vld [vmem:[#allocation3 + $0x38] sm:$0xff] }
 0x38f   :  { %7776 = vmatpush1.bf16.msra.mxu0 %v11551_v6  ;;  %v12912_v6 = vld [vmem:[#allocation3 + $0xb8] sm:$0xff] }
 0x390   :  { %7777 = vmatprep.subr.bf16.mxu0 %v11559_v19  ;;  %v11596_v19 = vld [vmem:[#allocation6 + $0x1868] ss:$16 sps:$4 sm:$0xff]  }
 0x391   :  { %8352 = vmatpush1.bf16.msra.mxu1 %v11560_v55  ;;  %v11598_v55 = vld [vmem:[#allocation6 + $0x186c] ss:$16 sps:$4 sm:$0xff]  }
 0x392   :  { %8353 = vmatprep.subr.bf16.mxu1 %v11568_v14  ;;  %v190_v14 = vunpack.c.h.bf16 %v12912_v6 }
 0x393   :  { %7778 = vmatpush1.bf16.msra.mxu0 %v11557_v16  ;;  %v12916_v16 = vld [vmem:[#allocation3 + $0xf8] sm:$0xff] }
 0x394   :  { %7779 = vmatprep.subr.bf16.mxu0 %v11565_v3  ;;  %v11602_v3 = vld [vmem:[#allocation6 + $0x1888] ss:$16 sps:$4 sm:$0xff]  }
 0x395   :  { %8354 = vmatpush1.bf16.msra.mxu1 %v11566_v34  ;;  %v11604_v34 = vld [vmem:[#allocation6 + $0x188c] ss:$16 sps:$4 sm:$0xff]  }
 0x396   :  { %8355 = vmatprep.subr.bf16.mxu1 %v11574_v32  ;;  %v239_v32 = vunpack.c.h.bf16 %v12916_v16 }
 0x397   :  { %7780 = vmatpush1.bf16.msra.mxu0 %v11563_v29  ;;  %v12920_v29 = vld [vmem:[#allocation3 + $0x138] sm:$0xff] }
 0x398   :  { %7781 = vmatprep.subr.bf16.mxu0 %v11571_v11  ;;  %v11608_v11 = vld [vmem:[#allocation6 + $0x18a8] ss:$16 sps:$4 sm:$0xff]  }
 0x399   :  { %8356 = vmatpush1.bf16.msra.mxu1 %v11572_v48  ;;  %v11593_v48 = vld [vmem:[#allocation6 + $0x1c60] ss:$16 sps:$4 sm:$0xff]  }
 0x39a   :  { %8366 = vmatprep.subr.bf16.mxu1 %v11580_v30  ;;  %v288_v30 = vunpack.c.h.bf16 %v12920_v29 }
 0x39b   :  { %7782 = vmatpush1.bf16.msra.mxu0 %v11569_v52 }
 0x39c   :  { %8358 = vmatmul.mubr.bf16.vlgmr.msra.gmra.mrb[4].mxu1 %v12752_v57  ;;  %7792 = vmatprep.subr.bf16.mxu0 %v11577_v46  ;;  %v108_v57 = vunpack.c.h.bf16 %v12903_v42 }
 0x39d   :  { %8367 = vmatpush1.bf16.msra.mxu1 %v11578_v26  ;;  %8398 = vmatprep.mubr.bf16.mxu1 %v12757_v59  ;;  %v141_v59 = vunpack.c.h.bf16 %v12906_v61  ;;  %v11599_v26 = vld [vmem:[#allocation6 + $0x1c80] ss:$16 sps:$4 sm:$0xff]  }
 0x39e   :  { %8368 = vmatprep.subr.bf16.mxu1 %v11586_v5  ;;  %7784 = vmatmul.mubr.bf16.vlgmr.msra.gmra.mrb[0].mxu0 %v12896_v27  ;;  %v12924_v5 = vld [vmem:[#allocation3 + $0x178] sm:$0xff] }
 0x39f   :  { %7793 = vmatpush1.bf16.msra.mxu0 %v11575_v58  ;;  %7824 = vmatprep.mubr.bf16.mxu0 %v12901_v62  ;;  %v157_v24 = vadd.f32 %v141_v59, %v108_v57  ;;  %v337_v46 = vunpack.c.h.bf16 %v12924_v5  ;;  %v11613_v58 = vld [vmem:[#allocation6 + $0x1cc4] ss:$16 sps:$4 sm:$0xff]   ;;  %v11620_v59 = vld [vmem:[#allocation6 + $0x18e8] ss:$16 sps:$4 sm:$0xff]  }
 0x3a0   :  { %7794 = vmatprep.subr.bf16.mxu0 %v11583_v44  ;;  %v12928_v44 = vld [vmem:[#allocation3 + $0x1b8] sm:$0xff] }
 0x3a1   :  { %8369 = vmatpush1.bf16.msra.mxu1 %v11584_v54  ;;  %v206_v60 = vadd.f32 %v190_v14, %v157_v24  ;;  %v350_v54 = vadd.f32 %v334_v36, %v301_v47  ;;  %v386_v57 = vunpack.c.h.bf16 %v12928_v44  ;;  %v11626_v14 = vld [vmem:[#allocation6 + $0x1908] ss:$16 sps:$4 sm:$0xff]   ;;  %v579_v47 = vunpack.c.l.bf16 %v12872_v37  ;;  %v11629_v36 = vld [vmem:[#allocation6 + $0x1d20] ss:$16 sps:$4 sm:$0xff]   ;;  %v11652_v37 = vld [vmem:[#allocation6 + $0x198c] ss:$16 sps:$4 sm:$0xff]  }
 0x3a2   :  { %8370 = vmatprep.subr.bf16.mxu1 %v11592_v50 }
 0x3a3   :  { %7795 = vmatpush1.bf16.msra.mxu0 %v11581_v15  ;;  %v255_v38 = vadd.f32 %v239_v32, %v206_v60  ;;  %v11619_v15 = vld [vmem:[#allocation6 + $0x1ce4] ss:$16 sps:$4 sm:$0xff]   ;;  %v11632_v32 = vld [vmem:[#allocation6 + $0x1928] ss:$16 sps:$4 sm:$0xff]  }
 0x3a4   :  { %7796 = vmatprep.subr.bf16.mxu0 %v11589_v4  ;;  %v12932_v4 = vld [vmem:[#allocation3 + $0x1f8] sm:$0xff] }
 0x3a5   :  { %8371 = vmatpush1.bf16.msra.mxu1 %v11590_v63  ;;  %v304_v52 = vadd.f32 %v288_v30, %v255_v38  ;;  %v399_v63 = vadd.f32 %v383_v22, %v350_v54  ;;  %v435_v24 = vunpack.c.h.bf16 %v12932_v4  ;;  %v11638_v30 = vld [vmem:[#allocation6 + $0x1948] ss:$16 sps:$4 sm:$0xff]   ;;  %v628_v54 = vunpack.c.l.bf16 %v12876_v49  ;;  %v11635_v22 = vld [vmem:[#allocation6 + $0x1d40] ss:$16 sps:$4 sm:$0xff]   ;;  %v11658_v49 = vld [vmem:[#allocation6 + $0x19ac] ss:$16 sps:$4 sm:$0xff]  }
 0x3a6   :  { %8372 = vmatprep.subr.bf16.mxu1 %v11598_v55 }
 0x3a7   :  { %7797 = vmatpush1.bf16.msra.mxu0 %v11587_v33  ;;  %v353_v50 = vadd.f32 %v337_v46, %v304_v52  ;;  %v11625_v33 = vld [vmem:[#allocation6 + $0x1d04] ss:$16 sps:$4 sm:$0xff]   ;;  %v11644_v46 = vld [vmem:[#allocation6 + $0x1968] ss:$16 sps:$4 sm:$0xff]  }
 0x3a8   :  { %7798 = vmatprep.subr.bf16.mxu0 %v11595_v1  ;;  %v12936_v1 = vld [vmem:[#allocation3 + $0x238] sm:$0xff] }
 0x3a9   :  { %8373 = vmatpush1.bf16.msra.mxu1 %v11596_v19  ;;  %v402_v55 = vadd.f32 %v386_v57, %v353_v50  ;;  %v448_v19 = vadd.f32 %v432_v56, %v399_v63  ;;  %v484_v60 = vunpack.c.h.bf16 %v12936_v1  ;;  %v11650_v57 = vld [vmem:[#allocation6 + $0x1988] ss:$16 sps:$4 sm:$0xff]   ;;  %v677_v63 = vunpack.c.l.bf16 %v12880_v20  ;;  %v11641_v56 = vld [vmem:[#allocation6 + $0x1d60] ss:$16 sps:$4 sm:$0xff]   ;;  %v11664_v20 = vld [vmem:[#allocation6 + $0x19cc] ss:$16 sps:$4 sm:$0xff]  }
 0x3aa   :  { %8374 = vmatprep.subr.bf16.mxu1 %v11604_v34 }
 0x3ab   :  { %7799 = vmatpush1.bf16.msra.mxu0 %v11593_v48  ;;  %v451_v34 = vadd.f32 %v435_v24, %v402_v55  ;;  %v11631_v48 = vld [vmem:[#allocation6 + $0x1d24] ss:$16 sps:$4 sm:$0xff]   ;;  %v11656_v24 = vld [vmem:[#allocation6 + $0x19a8] ss:$16 sps:$4 sm:$0xff]  }
 0x3ac   :  { %7800 = vmatprep.subr.bf16.mxu0 %v11601_v31  ;;  %v12940_v31 = vld [vmem:[#allocation3 + $0x278] sm:$0xff] }
 0x3ad   :  { %8375 = vmatpush1.bf16.msra.mxu1 %v11602_v3  ;;  %v497_v3 = vadd.f32 %v481_v13, %v448_v19  ;;  %v533_v38 = vunpack.c.h.bf16 %v12940_v31  ;;  %v726_v19 = vunpack.c.l.bf16 %v12884_v12  ;;  %v11647_v13 = vld [vmem:[#allocation6 + $0x1d80] ss:$16 sps:$4 sm:$0xff]   ;;  %v11670_v12 = vld [vmem:[#allocation6 + $0x19ec] ss:$16 sps:$4 sm:$0xff]  }
 0x3ae   :  { %8376 = vmatprep.subr.bf16.mxu1 %v11610_v40  ;;  %v500_v40 = vadd.f32 %v484_v60, %v451_v34  ;;  %v11662_v60 = vld [vmem:[#allocation6 + $0x19c8] ss:$16 sps:$4 sm:$0xff]  }
 0x3af   :  { %7801 = vmatpush1.bf16.msra.mxu0 %v11599_v26  ;;  %v11637_v26 = vld [vmem:[#allocation6 + $0x1d44] ss:$16 sps:$4 sm:$0xff]  }
 0x3b0   :  { %7802 = vmatprep.subr.bf16.mxu0 %v11607_v41  ;;  %v12944_v41 = vld [vmem:[#allocation3 + $0x2b8] sm:$0xff] }
 0x3b1   :  { %8377 = vmatpush1.bf16.msra.mxu1 %v11608_v11  ;;  %v546_v11 = vadd.f32 %v530_v18, %v497_v3  ;;  %v582_v52 = vunpack.c.h.bf16 %v12944_v41  ;;  %v775_v3 = vunpack.c.l.bf16 %v12888_v35  ;;  %v11653_v18 = vld [vmem:[#allocation6 + $0x1da0] ss:$16 sps:$4 sm:$0xff]   ;;  %v11676_v35 = vld [vmem:[#allocation6 + $0x1a0c] ss:$16 sps:$4 sm:$0xff]  }
 0x3b2   :  { %8378 = vmatprep.subr.bf16.mxu1 %v11616_v51  ;;  %v549_v51 = vadd.f32 %v533_v38, %v500_v40  ;;  %v11668_v38 = vld [vmem:[#allocation6 + $0x19e8] ss:$16 sps:$4 sm:$0xff]  }
 0x3b3   :  { %7803 = vmatpush1.bf16.msra.mxu0 %v11605_v8  ;;  %v11643_v8 = vld [vmem:[#allocation6 + $0x1d64] ss:$16 sps:$4 sm:$0xff]  }
 0x3b4   :  { %7804 = vmatprep.subr.bf16.mxu0 %v11613_v58  ;;  %v12948_v58 = vld [vmem:[#allocation3 + $0x2f8] sm:$0xff] }
 0x3b5   :  { %8379 = vmatpush1.bf16.msra.mxu1 %v11614_v17  ;;  %v595_v17 = vadd.f32 %v579_v47, %v546_v11  ;;  %v631_v50 = vunpack.c.h.bf16 %v12948_v58  ;;  %v824_v11 = vunpack.c.l.bf16 %v12892_v53  ;;  %v11659_v47 = vld [vmem:[#allocation6 + $0x1dc0] ss:$16 sps:$4 sm:$0xff]   ;;  %v11673_v53 = vld [vmem:[#allocation6 + $0x1e04] ss:$16 sps:$4 sm:$0xff]  }
 0x3b6   :  { %8380 = vmatprep.subr.bf16.mxu1 %v11622_v43  ;;  %v598_v43 = vadd.f32 %v582_v52, %v549_v51  ;;  %v11674_v52 = vld [vmem:[#allocation6 + $0x1a08] ss:$16 sps:$4 sm:$0xff]  }
 0x3b7   :  { %7805 = vmatpush1.bf16.msra.mxu0 %v11611_v0  ;;  %v11649_v0 = vld [vmem:[#allocation6 + $0x1d84] ss:$16 sps:$4 sm:$0xff]  }
 0x3b8   :  { %7806 = vmatprep.subr.bf16.mxu0 %v11619_v15  ;;  %v12952_v15 = vld [vmem:[#allocation3 + $0x338] sm:$0xff] }
 0x3b9   :  { %8381 = vmatpush1.bf16.msra.mxu1 %v11620_v59  ;;  %v644_v59 = vadd.f32 %v628_v54, %v595_v17  ;;  %v680_v55 = vunpack.c.h.bf16 %v12952_v15  ;;  %v11665_v17 = vld [vmem:[#allocation6 + $0x1de0] ss:$16 sps:$4 sm:$0xff]   ;;  %v11682_v54 = vld [vmem:[#allocation6 + $0x1a2c] ss:$16 sps:$4 sm:$0xff]  }
 0x3ba   :  { %8382 = vmatprep.subr.bf16.mxu1 %v11628_v2  ;;  %v647_v2 = vadd.f32 %v631_v50, %v598_v43  ;;  %v107_v43 = vunpack.c.l.bf16 %v12903_v42  ;;  %v140_v50 = vunpack.c.l.bf16 %v12906_v61  ;;  %v11677_v42 = vld [vmem:[#allocation6 + $0x1e20] ss:$16 sps:$4 sm:$0xff]   ;;  %v11694_v61 = vld [vmem:[#allocation6 + $0x1a6c] ss:$16 sps:$4 sm:$0xff]  }
 0x3bb   :  { %7807 = vmatpush1.bf16.msra.mxu0 %v11617_v23  ;;  %v11655_v23 = vld [vmem:[#allocation6 + $0x1da4] ss:$16 sps:$4 sm:$0xff]  }
 0x3bc   :  { %7808 = vmatprep.subr.bf16.mxu0 %v11625_v33  ;;  %v12956_v33 = vld [vmem:[#allocation3 + $0x378] sm:$0xff] }
 0x3bd   :  { %8383 = vmatpush1.bf16.msra.mxu1 %v11626_v14  ;;  %v693_v14 = vadd.f32 %v677_v63, %v644_v59  ;;  %v729_v34 = vunpack.c.h.bf16 %v12956_v33  ;;  %v11688_v59 = vld [vmem:[#allocation6 + $0x1a4c] ss:$16 sps:$4 sm:$0xff]   ;;  %v11679_v63 = vld [vmem:[#allocation6 + $0x1e24] ss:$16 sps:$4 sm:$0xff]  }
 0x3be   :  { %8384 = vmatprep.subr.bf16.mxu1 %v11634_v10  ;;  %v696_v10 = vadd.f32 %v680_v55, %v647_v2  ;;  %v11692_v2 = vld [vmem:[#allocation6 + $0x1a68] ss:$16 sps:$4 sm:$0xff]  }
 0x3bf   :  { %7809 = vmatpush1.bf16.msra.mxu0 %v11623_v25  ;;  %v11661_v25 = vld [vmem:[#allocation6 + $0x1dc4] ss:$16 sps:$4 sm:$0xff]  }
 0x3c0   :  { %7810 = vmatprep.subr.bf16.mxu0 %v11631_v48  ;;  %v12960_v48 = vld [vmem:[#allocation3 + $0x3b8] sm:$0xff] }
 0x3c1   :  { %8385 = vmatpush1.bf16.msra.mxu1 %v11632_v32  ;;  %v742_v32 = vadd.f32 %v726_v19, %v693_v14  ;;  %v778_v40 = vunpack.c.h.bf16 %v12960_v48  ;;  %v11683_v14 = vld [vmem:[#allocation6 + $0x1e40] ss:$16 sps:$4 sm:$0xff]   ;;  %v11700_v19 = vld [vmem:[#allocation6 + $0x1a8c] ss:$16 sps:$4 sm:$0xff]  }
 0x3c2   :  { %8386 = vmatprep.subr.bf16.mxu1 %v11640_v21  ;;  %v745_v21 = vadd.f32 %v729_v34, %v696_v10  ;;  %v11689_v10 = vld [vmem:[#allocation6 + $0x1e60] ss:$16 sps:$4 sm:$0xff]   ;;  %v11706_v34 = vld [vmem:[#allocation6 + $0x1aac] ss:$16 sps:$4 sm:$0xff]  }
 0x3c3   :  { %7811 = vmatpush1.bf16.msra.mxu0 %v11629_v36  ;;  %v11667_v36 = vld [vmem:[#allocation6 + $0x1de4] ss:$16 sps:$4 sm:$0xff]  }
 0x3c4   :  { %7812 = vmatprep.subr.bf16.mxu0 %v11637_v26  ;;  %v12964_v26 = vld [vmem:[#allocation3 + $0x3f8] sm:$0xff] }
 0x3c5   :  { %8387 = vmatpush1.bf16.msra.mxu1 %v11638_v30  ;;  %v791_v30 = vadd.f32 %v775_v3, %v742_v32  ;;  %v827_v51 = vunpack.c.h.bf16 %v12964_v26  ;;  %v11704_v32 = vld [vmem:[#allocation6 + $0x1aa8] ss:$16 sps:$4 sm:$0xff]   ;;  %v336_v3 = vunpack.c.l.bf16 %v12924_v5 }
 0x3c6   :  { %8388 = vmatprep.subr.bf16.mxu1 %v11646_v28  ;;  %v794_v28 = vadd.f32 %v778_v40, %v745_v21  ;;  %v11710_v21 = vld [vmem:[#allocation6 + $0x1ac8] ss:$16 sps:$4 sm:$0xff]   ;;  %v385_v40 = vunpack.c.l.bf16 %v12928_v44 }
 0x3c7   :  { %7813 = vmatpush1.bf16.msra.mxu0 %v11635_v22 }
 0x3c8   :  { %7814 = vmatprep.subr.bf16.mxu0 %v11643_v8  ;;  %v843_v22 = vadd.f32 %v827_v51, %v794_v28  ;;  %v11680_v8 = vld [vmem:[#allocation6 + $0x1a28] ss:$16 sps:$4 sm:$0xff]   ;;  %v11724_v28 = vld [vmem:[#allocation6 + $0x1b0c] ss:$16 sps:$4 sm:$0xff]   ;;  %v11715_v51 = vld [vmem:[#allocation6 + $0x1ee4] ss:$16 sps:$4 sm:$0xff]  }
 0x3c9   :  { %8389 = vmatpush1.bf16.msra.mxu1 %v11644_v46  ;;  %v840_v46 = vadd.f32 %v824_v11, %v791_v30  ;;  %v11718_v30 = vld [vmem:[#allocation6 + $0x1aec] ss:$16 sps:$4 sm:$0xff]   ;;  %v11709_v11 = vld [vmem:[#allocation6 + $0x1ec4] ss:$16 sps:$4 sm:$0xff]  }
 0x3ca   :  { %8390 = vmatprep.subr.bf16.mxu1 %v11652_v37 }
 0x3cb   :  { %7815 = vmatpush1.bf16.msra.mxu0 %v11641_v56  ;;  %v12968_v37 = vpack.c.bf16 %v840_v46, %v840_v46  ;;  %v12973_v56 = vpack.c.bf16 %v843_v22, %v843_v22  ;;  %v483_v46 = vunpack.c.l.bf16 %v12936_v1  ;;  %v11728_v22 = vld [vmem:[#allocation6 + $0x1b28] ss:$16 sps:$4 sm:$0xff]  }
 0x3cc   :  { %7816 = vmatprep.subr.bf16.mxu0 %v11649_v0  ;;  %v189_v0 = vunpack.c.l.bf16 %v12912_v6  ;;  %v11698_v6 = vld [vmem:[#allocation6 + $0x1a88] ss:$16 sps:$4 sm:$0xff]  }
 0x3cd   :  { %8391 = vmatpush1.bf16.msra.mxu1 %v11650_v57  ;;  %v11671_v57 = vld [vmem:[#allocation6 + $0x1e00] ss:$16 sps:$4 sm:$0xff]  }
 0x3ce   :  { %8392 = vmatprep.subr.bf16.mxu1 %v11658_v49  ;;  %v156_v49 = vadd.f32 %v140_v50, %v107_v43  ;;  %v11719_v43 = vld [vmem:[#allocation6 + $0x1f00] ss:$16 sps:$4 sm:$0xff]   ;;  %v11736_v50 = vld [vmem:[#allocation6 + $0x1b4c] ss:$16 sps:$4 sm:$0xff]  }
 0x3cf   :  { %7817 = vmatpush1.bf16.msra.mxu0 %v11647_v13  ;;  %v11691_v13 = vld [vmem:[#allocation6 + $0x1e64] ss:$16 sps:$4 sm:$0xff]  }
 0x3d0   :  { %7818 = vmatprep.subr.bf16.mxu0 %v11655_v23  ;;  %v205_v55 = vadd.f32 %v189_v0, %v156_v49  ;;  %v287_v23 = vunpack.c.l.bf16 %v12920_v29  ;;  %v11742_v49 = vld [vmem:[#allocation6 + $0x1b6c] ss:$16 sps:$4 sm:$0xff]   ;;  %v11733_v0 = vld [vmem:[#allocation6 + $0x1f44] ss:$16 sps:$4 sm:$0xff]  }
 0x3d1   :  { %8393 = vmatpush1.bf16.msra.mxu1 %v11656_v24  ;;  %v238_v24 = vunpack.c.l.bf16 %v12916_v16 }
 0x3d2   :  { %8394 = vmatprep.subr.bf16.mxu1 %v11664_v20 }
 0x3d3   :  { %7819 = vmatpush1.bf16.msra.mxu0 %v11653_v18  ;;  %v254_v20 = vadd.f32 %v238_v24, %v205_v55  ;;  %v11695_v18 = vld [vmem:[#allocation6 + $0x1e80] ss:$16 sps:$4 sm:$0xff]   ;;  %v11739_v55 = vld [vmem:[#allocation6 + $0x1f64] ss:$16 sps:$4 sm:$0xff]   ;;  %v11746_v24 = vld [vmem:[#allocation6 + $0x1b88] ss:$16 sps:$4 sm:$0xff]  }
 0x3d4   :  { %7820 = vmatprep.subr.bf16.mxu0 %v11661_v25  ;;  %v11703_v25 = vld [vmem:[#allocation6 + $0x1ea4] ss:$16 sps:$4 sm:$0xff]  }
 0x3d5   :  { %8395 = vmatpush1.bf16.msra.mxu1 %v11662_v60  ;;  %v11697_v60 = vld [vmem:[#allocation6 + $0x1e84] ss:$16 sps:$4 sm:$0xff]   ;;  %v303_v16 = vadd.f32 %v287_v23, %v254_v20  ;;  %v11752_v20 = vld [vmem:[#allocation6 + $0x1ba8] ss:$16 sps:$4 sm:$0xff]   ;;  %v728_v23 = vunpack.c.l.bf16 %v12956_v33 }
 0x3d6   :  { %8396 = vmatprep.subr.bf16.mxu1 %v11670_v12  ;;  %v11712_v12 = vld [vmem:[#allocation6 + $0x1acc] ss:$16 sps:$4 sm:$0xff]  }
 0x3d7   :  { %7821 = vmatpush1.bf16.msra.mxu0 %v11659_v47  ;;  %v352_v29 = vadd.f32 %v336_v3, %v303_v16  ;;  %v11716_v47 = vld [vmem:[#allocation6 + $0x1ae8] ss:$16 sps:$4 sm:$0xff]   ;;  %v777_v16 = vunpack.c.l.bf16 %v12960_v48  ;;  %v11749_v3 = vld [vmem:[#allocation6 + $0x1fa0] ss:$16 sps:$4 sm:$0xff]  }
 0x3d8   :  { %7822 = vmatprep.subr.bf16.mxu0 %v11667_v36  ;;  %v11707_v36 = vld [vmem:[#allocation6 + $0x1ec0] ss:$16 sps:$4 sm:$0xff]   ;;  %v11767_v48 = vld [vmem:[#allocation6 + $0x1c08] ss:$16 sps:$4 sm:$0xff]  }
 0x3d9   :  { %8397 = vmatpush1.bf16.msra.mxu1 %v11668_v38  ;;  %v11701_v38 = vld [vmem:[#allocation6 + $0x1ea0] ss:$16 sps:$4 sm:$0xff]   ;;  %v401_v5 = vadd.f32 %v385_v40, %v352_v29  ;;  %v11769_v40 = vld [vmem:[#allocation6 + $0x1c0c] ss:$16 sps:$4 sm:$0xff]  }
 0x3da   :  { %8407 = vmatprep.subr.bf16.mxu1 %v11676_v35  ;;  %v434_v35 = vunpack.c.l.bf16 %v12932_v4  ;;  %v11755_v29 = vld [vmem:[#allocation6 + $0x1fc0] ss:$16 sps:$4 sm:$0xff]  }
 0x3db   :  { %7823 = vmatpush1.bf16.msra.mxu0 %v11665_v17  ;;  %v11713_v17 = vld [vmem:[#allocation6 + $0x1ee0] ss:$16 sps:$4 sm:$0xff]  }
 0x3dc   :  { %8399 = vmatmul.mubr.bf16.vlgmr.msra.gmra.mrb[4].mxu1 %v12824_v39  ;;  %7833 = vmatprep.subr.bf16.mxu0 %v11673_v53  ;;  %v11686_v39 = vld [vmem:[#allocation6 + $0x1a48] ss:$16 sps:$4 sm:$0xff]   ;;  %v450_v44 = vadd.f32 %v434_v35, %v401_v5  ;;  %v11721_v53 = vld [vmem:[#allocation6 + $0x1f04] ss:$16 sps:$4 sm:$0xff]  }
 0x3dd   :  { %8408 = vmatpush1.bf16.msra.mxu1 %v11674_v52  ;;  %8439 = vmatprep.mubr.bf16.mxu1 %v12829_v9  ;;  %v11685_v9 = vld [vmem:[#allocation6 + $0x1e44] ss:$16 sps:$4 sm:$0xff]   ;;  %v11722_v52 = vld [vmem:[#allocation6 + $0x1b08] ss:$16 sps:$4 sm:$0xff]  }
 0x3de   :  { %8409 = vmatprep.subr.bf16.mxu1 %v11682_v54  ;;  %7825 = vmatmul.mubr.bf16.vlgmr.msra.gmra.mrb[0].mxu0 %v12968_v37  ;;  %v11730_v54 = vld [vmem:[#allocation6 + $0x1b2c] ss:$16 sps:$4 sm:$0xff]   ;;  %v499_v4 = vadd.f32 %v483_v46, %v450_v44  ;;  %v11865_v5 = vld [vmem:[#allocation9 + $0x4] ss:$8 sps:$4 sm:$0xff]  }
 0x3df   :  { %7834 = vmatpush1.bf16.msra.mxu0 %v11671_v57  ;;  %7865 = vmatprep.mubr.bf16.mxu0 %v12973_v56  ;;  %v11727_v57 = vld [vmem:[#allocation6 + $0x1f24] ss:$16 sps:$4 sm:$0xff]   ;;  %v11778_v44 = vld [vmem:[#allocation6 + $0x1c6c] ss:$16 sps:$4 sm:$0xff]   ;;  %v11871_v46 = vld [vmem:[#allocation9 + $0x24] ss:$8 sps:$4 sm:$0xff]  }
 0x3e0   :  { %7835 = vmatprep.subr.bf16.mxu0 %v11679_v63  ;;  %v581_v63 = vunpack.c.l.bf16 %v12944_v41 }
 0x3e1   :  { %8410 = vmatpush1.bf16.msra.mxu1 %v11680_v8  ;;  %v532_v8 = vunpack.c.l.bf16 %v12940_v31 }
 0x3e2   :  { %8411 = vmatprep.subr.bf16.mxu1 %v11688_v59  ;;  %v11734_v59 = vld [vmem:[#allocation6 + $0x1b48] ss:$16 sps:$4 sm:$0xff]  }
 0x3e3   :  { %7836 = vmatpush1.bf16.msra.mxu0 %v11677_v42  ;;  %v548_v1 = vadd.f32 %v532_v8, %v499_v4  ;;  %v11740_v42 = vld [vmem:[#allocation6 + $0x1b68] ss:$16 sps:$4 sm:$0xff]   ;;  %v11784_v4 = vld [vmem:[#allocation6 + $0x1cac] ss:$16 sps:$4 sm:$0xff]  }
 0x3e4   :  { %7837 = vmatprep.subr.bf16.mxu0 %v11685_v9  ;;  %v11731_v9 = vld [vmem:[#allocation6 + $0x1f40] ss:$16 sps:$4 sm:$0xff]   ;;  %v11872_v8 = vld [vmem:[#allocation9 + $0x30] ss:$8 sps:$4 sm:$0xff]  }
 0x3e5   :  { %8412 = vmatpush1.bf16.msra.mxu1 %v11686_v39  ;;  %v11725_v39 = vld [vmem:[#allocation6 + $0x1f20] ss:$16 sps:$4 sm:$0xff]   ;;  %v597_v31 = vadd.f32 %v581_v63, %v548_v1  ;;  %v11785_v63 = vld [vmem:[#allocation6 + $0x1cc8] ss:$16 sps:$4 sm:$0xff]  }
 0x3e6   :  { %8413 = vmatprep.subr.bf16.mxu1 %v11694_v61  ;;  %v630_v61 = vunpack.c.l.bf16 %v12948_v58  ;;  %v11880_v1 = vld [vmem:[#allocation9 + $0x54] ss:$8 sps:$4 sm:$0xff]  }
 0x3e7   :  { %7838 = vmatpush1.bf16.msra.mxu0 %v11683_v14  ;;  %v679_v14 = vunpack.c.l.bf16 %v12952_v15 }
 0x3e8   :  { %7839 = vmatprep.subr.bf16.mxu0 %v11691_v13  ;;  %v646_v41 = vadd.f32 %v630_v61, %v597_v31  ;;  %v11754_v13 = vld [vmem:[#allocation6 + $0x1bac] ss:$16 sps:$4 sm:$0xff]  }
 0x3e9   :  { %8414 = vmatpush1.bf16.msra.mxu1 %v11692_v2  ;;  %v11748_v2 = vld [vmem:[#allocation6 + $0x1b8c] ss:$16 sps:$4 sm:$0xff]  }
 0x3ea   :  { %8415 = vmatprep.subr.bf16.mxu1 %v11700_v19  ;;  %v11737_v19 = vld [vmem:[#allocation6 + $0x1f60] ss:$16 sps:$4 sm:$0xff]   ;;  %v695_v58 = vadd.f32 %v679_v14, %v646_v41  ;;  %v11793_v31 = vld [vmem:[#allocation6 + $0x1d0c] ss:$16 sps:$4 sm:$0xff]   ;;  %v11794_v14 = vld [vmem:[#allocation6 + $0x1d28] ss:$16 sps:$4 sm:$0xff]  }
 0x3eb   :  { %7840 = vmatpush1.bf16.msra.mxu0 %v11689_v10  ;;  %v11743_v10 = vld [vmem:[#allocation6 + $0x1f80] ss:$16 sps:$4 sm:$0xff]   ;;  %v11881_v61 = vld [vmem:[#allocation9 + $0x60] ss:$8 sps:$4 sm:$0xff]  }
 0x3ec   :  { %7841 = vmatprep.subr.bf16.mxu0 %v11697_v60  ;;  %v11751_v60 = vld [vmem:[#allocation6 + $0x1fa4] ss:$16 sps:$4 sm:$0xff]   ;;  %v744_v15 = vadd.f32 %v728_v23, %v695_v58  ;;  %v11889_v41 = vld [vmem:[#allocation9 + $0x84] ss:$8 sps:$4 sm:$0xff]   ;;  %v11802_v58 = vld [vmem:[#allocation6 + $0x1d6c] ss:$16 sps:$4 sm:$0xff]  }
 0x3ed   :  { %8416 = vmatpush1.bf16.msra.mxu1 %v11698_v6  ;;  %v11745_v6 = vld [vmem:[#allocation6 + $0x1f84] ss:$16 sps:$4 sm:$0xff]  }
 0x3ee   :  { %8417 = vmatprep.subr.bf16.mxu1 %v11706_v34  ;;  %v11760_v34 = vld [vmem:[#allocation6 + $0x1bcc] ss:$16 sps:$4 sm:$0xff]   ;;  %v793_v33 = vadd.f32 %v777_v16, %v744_v15  ;;  %v11898_v15 = vld [vmem:[#allocation9 + $0xb4] ss:$8 sps:$4 sm:$0xff]  }
 0x3ef   :  { %7842 = vmatpush1.bf16.msra.mxu0 %v11695_v18  ;;  %v11766_v18 = vld [vmem:[#allocation6 + $0x1bec] ss:$16 sps:$4 sm:$0xff]   ;;  %v11803_v16 = vld [vmem:[#allocation6 + $0x1d88] ss:$16 sps:$4 sm:$0xff]  }
 0x3f0   :  { %7843 = vmatprep.subr.bf16.mxu0 %v11703_v25  ;;  %v11764_v25 = vld [vmem:[#allocation6 + $0x1be8] ss:$16 sps:$4 sm:$0xff]   ;;  %v11890_v23 = vld [vmem:[#allocation9 + $0x90] ss:$8 sps:$4 sm:$0xff]  }
 0x3f1   :  { %8418 = vmatpush1.bf16.msra.mxu1 %v11704_v32  ;;  %v11758_v32 = vld [vmem:[#allocation6 + $0x1bc8] ss:$16 sps:$4 sm:$0xff]  }
 0x3f2   :  { %8419 = vmatprep.subr.bf16.mxu1 %v11712_v12  ;;  %v11757_v12 = vld [vmem:[#allocation6 + $0x1fc4] ss:$16 sps:$4 sm:$0xff]  }
 0x3f3   :  { %7844 = vmatpush1.bf16.msra.mxu0 %v11701_v38  ;;  %v11763_v38 = vld [vmem:[#allocation6 + $0x1fe4] ss:$16 sps:$4 sm:$0xff]  }
 0x3f4   :  { %7845 = vmatprep.subr.bf16.mxu0 %v11709_v11  ;;  %v11761_v11 = vld [vmem:[#allocation6 + $0x1fe0] ss:$16 sps:$4 sm:$0xff]  }
 0x3f5   :  { %8420 = vmatpush1.bf16.msra.mxu1 %v11710_v21  ;;  %v826_v21 = vunpack.c.l.bf16 %v12964_v26  ;;  %v11770_v26 = vld [vmem:[#allocation6 + $0x1c28] ss:$16 sps:$4 sm:$0xff]  }
 0x3f6   :  { %8421 = vmatprep.subr.bf16.mxu1 %v11718_v30 }
 0x3f7   :  { %7846 = vmatpush1.bf16.msra.mxu0 %v11707_v36  ;;  %v842_v30 = vadd.f32 %v826_v21, %v793_v33  ;;  %v11775_v36 = vld [vmem:[#allocation6 + $0x1c4c] ss:$16 sps:$4 sm:$0xff]  }
 0x3f8   :  { %7847 = vmatprep.subr.bf16.mxu0 %v11715_v51  ;;  %v11868_v51 = vld [vmem:[#allocation9 + $0x14] ss:$8 sps:$4 sm:$0xff]   ;;  %v11811_v33 = vld [vmem:[#allocation6 + $0x1dcc] ss:$16 sps:$4 sm:$0xff]  }
 0x3f9   :  { %8422 = vmatpush1.bf16.msra.mxu1 %v11716_v47  ;;  %v11772_v47 = vld [vmem:[#allocation6 + $0x1c2c] ss:$16 sps:$4 sm:$0xff]   ;;  %v12992_v35 = vpack.c.bf16 %v842_v30, %v842_v30 }
 0x3fa   :  { %8423 = vmatprep.subr.bf16.mxu1 %v11724_v28  ;;  %v11863_v28 = vld [vmem:[#allocation9] ss:$8 sps:$4 sm:$0xff]   ;;  %v11902_v30 = vld [vmem:[#allocation9 + $0xd0] ss:$8 sps:$4 sm:$0xff]  }
 0x3fb   :  { %7848 = vmatpush1.bf16.msra.mxu0 %v11713_v17  ;;  %v11776_v17 = vld [vmem:[#allocation6 + $0x1c68] ss:$16 sps:$4 sm:$0xff]   ;;  %v11899_v21 = vld [vmem:[#allocation9 + $0xc0] ss:$8 sps:$4 sm:$0xff]  }
 0x3fc   :  { %7849 = vmatprep.subr.bf16.mxu0 %v11721_v53  ;;  %v11874_v53 = vld [vmem:[#allocation9 + $0x34] ss:$8 sps:$4 sm:$0xff]  }
 0x3fd   :  { %8424 = vmatpush1.bf16.msra.mxu1 %v11722_v52  ;;  %v11773_v52 = vld [vmem:[#allocation6 + $0x1c48] ss:$16 sps:$4 sm:$0xff]  }
 0x3fe   :  { %8425 = vmatprep.subr.bf16.mxu1 %v11730_v54  ;;  %v11869_v54 = vld [vmem:[#allocation9 + $0x20] ss:$8 sps:$4 sm:$0xff]  }
 0x3ff   :  { %7850 = vmatpush1.bf16.msra.mxu0 %v11719_v43  ;;  %v11877_v43 = vld [vmem:[#allocation9 + $0x44] ss:$8 sps:$4 sm:$0xff]  }
 0x400   :  { %7851 = vmatprep.subr.bf16.mxu0 %v11727_v57  ;;  %v11787_v57 = vld [vmem:[#allocation6 + $0x1ccc] ss:$16 sps:$4 sm:$0xff]  }
 0x401   :  { %8426 = vmatpush1.bf16.msra.mxu1 %v11728_v22  ;;  %v11779_v22 = vld [vmem:[#allocation6 + $0x1c88] ss:$16 sps:$4 sm:$0xff]  }
 0x402   :  { %8427 = vmatprep.subr.bf16.mxu1 %v11736_v50  ;;  %v11782_v50 = vld [vmem:[#allocation6 + $0x1ca8] ss:$16 sps:$4 sm:$0xff]  }
 0x403   :  { %7852 = vmatpush1.bf16.msra.mxu0 %v11725_v39  ;;  %v11790_v39 = vld [vmem:[#allocation6 + $0x1cec] ss:$16 sps:$4 sm:$0xff]  }
 0x404   :  { %7853 = vmatprep.subr.bf16.mxu0 %v11733_v0  ;;  %v11883_v0 = vld [vmem:[#allocation9 + $0x64] ss:$8 sps:$4 sm:$0xff]  }
 0x405   :  { %8428 = vmatpush1.bf16.msra.mxu1 %v11734_v59  ;;  %v11875_v59 = vld [vmem:[#allocation9 + $0x40] ss:$8 sps:$4 sm:$0xff]  }
 0x406   :  { %8429 = vmatprep.subr.bf16.mxu1 %v11742_v49  ;;  %v11878_v49 = vld [vmem:[#allocation9 + $0x50] ss:$8 sps:$4 sm:$0xff]  }
 0x407   :  { %7854 = vmatpush1.bf16.msra.mxu0 %v11731_v9  ;;  %v11886_v9 = vld [vmem:[#allocation9 + $0x74] ss:$8 sps:$4 sm:$0xff]  }
 0x408   :  { %7855 = vmatprep.subr.bf16.mxu0 %v11739_v55  ;;  %v11796_v55 = vld [vmem:[#allocation6 + $0x1d2c] ss:$16 sps:$4 sm:$0xff]  }
 0x409   :  { %8430 = vmatpush1.bf16.msra.mxu1 %v11740_v42  ;;  %v11788_v42 = vld [vmem:[#allocation6 + $0x1ce8] ss:$16 sps:$4 sm:$0xff]  }
 0x40a   :  { %8431 = vmatprep.subr.bf16.mxu1 %v11748_v2  ;;  %v11791_v2 = vld [vmem:[#allocation6 + $0x1d08] ss:$16 sps:$4 sm:$0xff]  }
 0x40b   :  { %7856 = vmatpush1.bf16.msra.mxu0 %v11737_v19  ;;  %v11799_v19 = vld [vmem:[#allocation6 + $0x1d4c] ss:$16 sps:$4 sm:$0xff]  }
 0x40c   :  { %7857 = vmatprep.subr.bf16.mxu0 %v11745_v6  ;;  %v11892_v6 = vld [vmem:[#allocation9 + $0x94] ss:$8 sps:$4 sm:$0xff]  }
 0x40d   :  { %8432 = vmatpush1.bf16.msra.mxu1 %v11746_v24  ;;  %v11884_v24 = vld [vmem:[#allocation9 + $0x70] ss:$8 sps:$4 sm:$0xff]  }
 0x40e   :  { %8433 = vmatprep.subr.bf16.mxu1 %v11754_v13  ;;  %v11887_v13 = vld [vmem:[#allocation9 + $0x80] ss:$8 sps:$4 sm:$0xff]  }
 0x40f   :  { %7858 = vmatpush1.bf16.msra.mxu0 %v11743_v10  ;;  %v11895_v10 = vld [vmem:[#allocation9 + $0xa4] ss:$8 sps:$4 sm:$0xff]  }
 0x410   :  { %7859 = vmatprep.subr.bf16.mxu0 %v11751_v60  ;;  %v11805_v60 = vld [vmem:[#allocation6 + $0x1d8c] ss:$16 sps:$4 sm:$0xff]  }
 0x411   :  { %8434 = vmatpush1.bf16.msra.mxu1 %v11752_v20  ;;  %v11797_v20 = vld [vmem:[#allocation6 + $0x1d48] ss:$16 sps:$4 sm:$0xff]  }
 0x412   :  { %8435 = vmatprep.subr.bf16.mxu1 %v11760_v34  ;;  %v11800_v34 = vld [vmem:[#allocation6 + $0x1d68] ss:$16 sps:$4 sm:$0xff]  }
 0x413   :  { %7860 = vmatpush1.bf16.msra.mxu0 %v11749_v3  ;;  %v11808_v3 = vld [vmem:[#allocation6 + $0x1dac] ss:$16 sps:$4 sm:$0xff]  }
 0x414   :  { %7861 = vmatprep.subr.bf16.mxu0 %v11757_v12  ;;  %v11901_v12 = vld [vmem:[#allocation9 + $0xc4] ss:$8 sps:$4 sm:$0xff]  }
 0x415   :  { %8436 = vmatpush1.bf16.msra.mxu1 %v11758_v32  ;;  %v11893_v32 = vld [vmem:[#allocation9 + $0xa0] ss:$8 sps:$4 sm:$0xff]  }
 0x416   :  { %8437 = vmatprep.subr.bf16.mxu1 %v11766_v18  ;;  %v11896_v18 = vld [vmem:[#allocation9 + $0xb0] ss:$8 sps:$4 sm:$0xff]  }
 0x417   :  { %7862 = vmatpush1.bf16.msra.mxu0 %v11755_v29  ;;  %v11904_v29 = vld [vmem:[#allocation9 + $0xd4] ss:$8 sps:$4 sm:$0xff]  }
 0x418   :  { %7863 = vmatprep.subr.bf16.mxu0 %v11763_v38  ;;  %v11814_v38 = vld [vmem:[#allocation6 + $0x1dec] ss:$16 sps:$4 sm:$0xff]  }
 0x419   :  { %8438 = vmatpush1.bf16.msra.mxu1 %v11764_v25  ;;  %v11806_v25 = vld [vmem:[#allocation6 + $0x1da8] ss:$16 sps:$4 sm:$0xff]  }
 0x41a   :  { %8448 = vmatprep.subr.bf16.mxu1 %v11769_v40  ;;  %v11809_v40 = vld [vmem:[#allocation6 + $0x1dc8] ss:$16 sps:$4 sm:$0xff]  }
 0x41b   :  { %7864 = vmatpush1.bf16.msra.mxu0 %v11761_v11  ;;  %v11817_v11 = vld [vmem:[#allocation6 + $0x1e0c] ss:$16 sps:$4 sm:$0xff]  }
 0x41c   :  { %8440 = vmatmul.mubr.bf16.vlgmr.msra.gmra.mrb[4].mxu1 %v12896_v27  ;;  %8934 = vmatprep.subr.bf16.mxu0 %v11865_v5  ;;  %v11866_v27 = vld [vmem:[#allocation9 + $0x10] ss:$8 sps:$4 sm:$0xff]  }
 0x41d   :  { %8449 = vmatpush1.bf16.msra.mxu1 %v11767_v48  ;;  %8480 = vmatprep.mubr.bf16.mxu1 %v12901_v62  ;;  %v11781_v62 = vld [vmem:[#allocation6 + $0x1c8c] ss:$16 sps:$4 sm:$0xff]   ;;  %v11812_v48 = vld [vmem:[#allocation6 + $0x1de8] ss:$16 sps:$4 sm:$0xff]  }
 0x41e   :  { %8450 = vmatprep.subr.bf16.mxu1 %v11772_v47  ;;  %7866 = vmatmul.mubr.bf16.vlgmr.msra.gmra.mrb[0].mxu0 %v12992_v35  ;;  %v11815_v47 = vld [vmem:[#allocation6 + $0x1e08] ss:$16 sps:$4 sm:$0xff]   ;;  %v11820_v5 = vld [vmem:[#allocation6 + $0x1e2c] ss:$16 sps:$4 sm:$0xff]  }
 0x41f   :  { %8935 = vmatpush1.bf16.msra.mxu0 %v11863_v28  ;;  %v11821_v28 = vld [vmem:[#allocation6 + $0x1e48] ss:$16 sps:$4 sm:$0xff]  }
 0x420   :  { %8936 = vmatprep.subr.bf16.mxu0 %v11868_v51  ;;  %v11826_v51 = vld [vmem:[#allocation6 + $0x1e6c] ss:$16 sps:$4 sm:$0xff]  }
 0x421   :  { %8451 = vmatpush1.bf16.msra.mxu1 %v11770_v26  ;;  %v11818_v26 = vld [vmem:[#allocation6 + $0x1e28] ss:$16 sps:$4 sm:$0xff]  }
 0x422   :  { %8452 = vmatprep.subr.bf16.mxu1 %v11775_v36  ;;  %v11823_v36 = vld [vmem:[#allocation6 + $0x1e4c] ss:$16 sps:$4 sm:$0xff]  }
 0x423   :  { %8937 = vmatpush1.bf16.msra.mxu0 %v11866_v27  ;;  %v11827_v27 = vld [vmem:[#allocation6 + $0x1e88] ss:$16 sps:$4 sm:$0xff]  }
 0x424   :  { %8938 = vmatprep.subr.bf16.mxu0 %v11871_v46  ;;  %v11832_v46 = vld [vmem:[#allocation6 + $0x1eac] ss:$16 sps:$4 sm:$0xff]  }
 0x425   :  { %8453 = vmatpush1.bf16.msra.mxu1 %v11773_v52  ;;  %v11824_v52 = vld [vmem:[#allocation6 + $0x1e68] ss:$16 sps:$4 sm:$0xff]  }
 0x426   :  { %8454 = vmatprep.subr.bf16.mxu1 %v11778_v44  ;;  %v11829_v44 = vld [vmem:[#allocation6 + $0x1e8c] ss:$16 sps:$4 sm:$0xff]  }
 0x427   :  { %8939 = vmatpush1.bf16.msra.mxu0 %v11869_v54  ;;  %v11907_v54 = vld [vmem:[#allocation9 + $0xe4] ss:$8 sps:$4 sm:$0xff]  }
 0x428   :  { %8940 = vmatprep.subr.bf16.mxu0 %v11874_v53  ;;  %v11905_v53 = vld [vmem:[#allocation9 + $0xe0] ss:$8 sps:$4 sm:$0xff]  }
 0x429   :  { %8455 = vmatpush1.bf16.msra.mxu1 %v11776_v17  ;;  %v11835_v17 = vld [vmem:[#allocation6 + $0x1ecc] ss:$16 sps:$4 sm:$0xff]  }
 0x42a   :  { %8456 = vmatprep.subr.bf16.mxu1 %v11781_v62  ;;  %v11838_v62 = vld [vmem:[#allocation6 + $0x1eec] ss:$16 sps:$4 sm:$0xff]  }
 0x42b   :  { %8941 = vmatpush1.bf16.msra.mxu0 %v11872_v8  ;;  %v11910_v8 = vld [vmem:[#allocation9 + $0xf4] ss:$8 sps:$4 sm:$0xff]  }
 0x42c   :  { %8942 = vmatprep.subr.bf16.mxu0 %v11877_v43  ;;  %v11908_v43 = vld [vmem:[#allocation9 + $0xf0] ss:$8 sps:$4 sm:$0xff]  }
 0x42d   :  { %8457 = vmatpush1.bf16.msra.mxu1 %v11779_v22  ;;  %v11836_v22 = vld [vmem:[#allocation6 + $0x1ee8] ss:$16 sps:$4 sm:$0xff]  }
 0x42e   :  { %8458 = vmatprep.subr.bf16.mxu1 %v11784_v4  ;;  %v11841_v4 = vld [vmem:[#allocation6 + $0x1f0c] ss:$16 sps:$4 sm:$0xff]  }
 0x42f   :  { %8943 = vmatpush1.bf16.msra.mxu0 %v11875_v59  ;;  %v11842_v59 = vld [vmem:[#allocation6 + $0x1f28] ss:$16 sps:$4 sm:$0xff]  }
 0x430   :  { %8944 = vmatprep.subr.bf16.mxu0 %v11880_v1  ;;  %v11913_v1 = vld [vmem:[#allocation9 + $0x104] ss:$8 sps:$4 sm:$0xff]  }
 0x431   :  { %8459 = vmatpush1.bf16.msra.mxu1 %v11782_v50  ;;  %v11839_v50 = vld [vmem:[#allocation6 + $0x1f08] ss:$16 sps:$4 sm:$0xff]  }
 0x432   :  { %8460 = vmatprep.subr.bf16.mxu1 %v11787_v57  ;;  %v11844_v57 = vld [vmem:[#allocation6 + $0x1f2c] ss:$16 sps:$4 sm:$0xff]  }
 0x433   :  { %8945 = vmatpush1.bf16.msra.mxu0 %v11878_v49  ;;  %v11850_v49 = vld [vmem:[#allocation6 + $0x1f6c] ss:$16 sps:$4 sm:$0xff]  }
 0x434   :  { %8946 = vmatprep.subr.bf16.mxu0 %v11883_v0  ;;  %v11848_v0 = vld [vmem:[#allocation6 + $0x1f68] ss:$16 sps:$4 sm:$0xff]  }
 0x435   :  { %8461 = vmatpush1.bf16.msra.mxu1 %v11785_v63  ;;  %v11847_v63 = vld [vmem:[#allocation6 + $0x1f4c] ss:$16 sps:$4 sm:$0xff]  }
 0x436   :  { %8462 = vmatprep.subr.bf16.mxu1 %v11790_v39  ;;  %v11845_v39 = vld [vmem:[#allocation6 + $0x1f48] ss:$16 sps:$4 sm:$0xff]  }
 0x437   :  { %8947 = vmatpush1.bf16.msra.mxu0 %v11881_v61  ;;  %v11856_v61 = vld [vmem:[#allocation6 + $0x1fac] ss:$16 sps:$4 sm:$0xff]  }
 0x438   :  { %8948 = vmatprep.subr.bf16.mxu0 %v11886_v9  ;;  %v11854_v9 = vld [vmem:[#allocation6 + $0x1fa8] ss:$16 sps:$4 sm:$0xff]  }
 0x439   :  { %8463 = vmatpush1.bf16.msra.mxu1 %v11788_v42  ;;  %v11853_v42 = vld [vmem:[#allocation6 + $0x1f8c] ss:$16 sps:$4 sm:$0xff]  }
 0x43a   :  { %8464 = vmatprep.subr.bf16.mxu1 %v11793_v31  ;;  %v11851_v31 = vld [vmem:[#allocation6 + $0x1f88] ss:$16 sps:$4 sm:$0xff]  }
 0x43b   :  { %8949 = vmatpush1.bf16.msra.mxu0 %v11884_v24  ;;  %v11862_v24 = vld [vmem:[#allocation6 + $0x1fec] ss:$16 sps:$4 sm:$0xff]  }
 0x43c   :  { %8950 = vmatprep.subr.bf16.mxu0 %v11889_v41  ;;  %v11860_v41 = vld [vmem:[#allocation6 + $0x1fe8] ss:$16 sps:$4 sm:$0xff]  }
 0x43d   :  { %8465 = vmatpush1.bf16.msra.mxu1 %v11791_v2  ;;  %v11859_v2 = vld [vmem:[#allocation6 + $0x1fcc] ss:$16 sps:$4 sm:$0xff]  }
 0x43e   :  { %8466 = vmatprep.subr.bf16.mxu1 %v11796_v55  ;;  %v11857_v55 = vld [vmem:[#allocation6 + $0x1fc8] ss:$16 sps:$4 sm:$0xff]  }
 0x43f   :  { %8951 = vmatpush1.bf16.msra.mxu0 %v11887_v13 }
 0x440   :  { %8952 = vmatprep.subr.bf16.mxu0 %v11892_v6  ;;  %v13002_v6 = vld [vmem:[#allocation8] sm:$0xf] }
 0x441   :  { %8467 = vmatpush1.bf16.msra.mxu1 %v11794_v14  ;;  %v1966_v14 = vlaneseq }
 0x442   :  { %8468 = vmatprep.subr.bf16.mxu1 %v11799_v19 }
 0x443   :  { %8953 = vmatpush1.bf16.msra.mxu0 %v11890_v23  ;;  %v12999_v19 = vshrl.u32 %v1966_v14, 7  ;;  %v8602_v14 = vld [vmem:[#allocation11] sm:$0x3] }
 0x444   :  { %8954 = vmatprep.subr.bf16.mxu0 %v11895_v10 }
 0x445   :  { %8469 = vmatpush1.bf16.msra.mxu1 %v11797_v20  ;;  %v1968_v13 = vsub.s32 0, %v12999_v19  ;;  %v1972_v20 = vsub.s32 1, %v12999_v19 }
 0x446   :  { %8470 = vmatprep.subr.bf16.mxu1 %v11802_v58 }
 0x447   :  { %8955 = vmatpush1.bf16.msra.mxu0 %v11893_v32  ;;  %v1969_v58 = vrot.slane %v13002_v6, %v1968_v13  ;;  %v1973_v23 = vrot.slane %v13002_v6, %v1972_v20 }
 0x448   :  { %8956 = vmatprep.subr.bf16.mxu0 %v11898_v15 }
 0x449   :  { %8471 = vmatpush1.bf16.msra.mxu1 %v11800_v34  ;;  %v7253_v10 = vadd.f32 %v12381_v7, %v1969_v58  ;;  %v11919_v7 = vld [vmem:[#allocation9 + $0x124] ss:$8 sps:$4 sm:$0xff]   ;;  %v8607_v58 = vrot.slane %v8602_v14, %v1968_v13 }
 0x44a   :  { %8472 = vmatprep.subr.bf16.mxu1 %v11805_v60 }
 0x44b   :  { %8957 = vmatpush1.bf16.msra.mxu0 %v11896_v18 }
 0x44c   :  { %8958 = vmatprep.subr.bf16.mxu0 %v11901_v12 }
 0x44d   :  { %8473 = vmatpush1.bf16.msra.mxu1 %v11803_v16 }
 0x44e   :  { %8474 = vmatprep.subr.bf16.mxu1 %v11808_v3 }
 0x44f   :  { %8959 = vmatpush1.bf16.msra.mxu0 %v11899_v21 }
 0x450   :  { %8960 = vmatprep.subr.bf16.mxu0 %v11904_v29  ;;  %v11916_v29 = vld [vmem:[#allocation9 + $0x114] ss:$8 sps:$4 sm:$0xff]  }
 0x451   :  { %8475 = vmatpush1.bf16.msra.mxu1 %v11806_v25 }
 0x452   :  { %8476 = vmatprep.subr.bf16.mxu1 %v11811_v33  ;;  %v11911_v33 = vld [vmem:[#allocation9 + $0x100] ss:$8 sps:$4 sm:$0xff]  }
 0x453   :  { %8961 = vmatpush1.bf16.msra.mxu0 %v11902_v30  ;;  %v11920_v30 = vld [vmem:[#allocation9 + $0x130] ss:$8 sps:$4 sm:$0xff]  }
 0x454   :  { %8962 = vmatprep.subr.bf16.mxu0 %v11907_v54  ;;  %v11949_v54 = vld [vmem:[#allocation9 + $0x1c4] ss:$8 sps:$4 sm:$0xff]  }
 0x455   :  { %8477 = vmatpush1.bf16.msra.mxu1 %v11809_v40  ;;  %v11914_v40 = vld [vmem:[#allocation9 + $0x110] ss:$8 sps:$4 sm:$0xff]  }
 0x456   :  { %8478 = vmatprep.subr.bf16.mxu1 %v11814_v38  ;;  %v11922_v38 = vld [vmem:[#allocation9 + $0x134] ss:$8 sps:$4 sm:$0xff]  }
 0x457   :  { %8963 = vmatpush1.bf16.msra.mxu0 %v11905_v53  ;;  %v11947_v53 = vld [vmem:[#allocation9 + $0x1c0] ss:$8 sps:$4 sm:$0xff]  }
 0x458   :  { %8964 = vmatprep.subr.bf16.mxu0 %v11910_v8  ;;  %v11955_v8 = vld [vmem:[#allocation9 + $0x1e4] ss:$8 sps:$4 sm:$0xff]  }
 0x459   :  { %8479 = vmatpush1.bf16.msra.mxu1 %v11812_v48  ;;  %v11925_v48 = vld [vmem:[#allocation9 + $0x144] ss:$8 sps:$4 sm:$0xff]  }
 0x45a   :  { %8489 = vmatprep.subr.bf16.mxu1 %v11817_v11  ;;  %v11923_v11 = vld [vmem:[#allocation9 + $0x140] ss:$8 sps:$4 sm:$0xff]  }
 0x45b   :  { %8965 = vmatpush1.bf16.msra.mxu0 %v11908_v43  ;;  %v11953_v43 = vld [vmem:[#allocation9 + $0x1e0] ss:$8 sps:$4 sm:$0xff]  }
 0x45c   :  { %8481 = vmatmul.mubr.bf16.vlgmr.msra.gmra.mrb[4].mxu1 %v12968_v37  ;;  %v11830_v37 = vld [vmem:[#allocation6 + $0x1ea8] ss:$16 sps:$4 sm:$0xff]   ;;  %8975 = vmatprep.subr.bf16.mxu0 %v11913_v1  ;;  %v1980_v1 = vsub.s32 3, %v12999_v19 }
 0x45d   :  { %8490 = vmatpush1.bf16.msra.mxu1 %v11815_v47  ;;  %8521 = vmatprep.mubr.bf16.mxu1 %v12973_v56  ;;  %v11833_v56 = vld [vmem:[#allocation6 + $0x1ec8] ss:$16 sps:$4 sm:$0xff]  }
 0x45e   :  { %8491 = vmatprep.subr.bf16.mxu1 %v11820_v5  ;;  %v11928_v47 = vld [vmem:[#allocation9 + $0x154] ss:$8 sps:$4 sm:$0xff]   ;;  %v11926_v5 = vld [vmem:[#allocation9 + $0x150] ss:$8 sps:$4 sm:$0xff]  }
 0x461   :  { %8492 = vmatpush1.bf16.msra.mxu1 %v11818_v26  ;;  %v11931_v26 = vld [vmem:[#allocation9 + $0x164] ss:$8 sps:$4 sm:$0xff]  }
 0x462   :  { %8493 = vmatprep.subr.bf16.mxu1 %v11823_v36  ;;  %v11929_v36 = vld [vmem:[#allocation9 + $0x160] ss:$8 sps:$4 sm:$0xff]  }
 0x465   :  { %8494 = vmatpush1.bf16.msra.mxu1 %v11821_v28  ;;  %v11934_v28 = vld [vmem:[#allocation9 + $0x174] ss:$8 sps:$4 sm:$0xff]  }
 0x466   :  { %8495 = vmatprep.subr.bf16.mxu1 %v11826_v51  ;;  %v11932_v51 = vld [vmem:[#allocation9 + $0x170] ss:$8 sps:$4 sm:$0xff]  }
 0x469   :  { %8496 = vmatpush1.bf16.msra.mxu1 %v11824_v52  ;;  %v11937_v52 = vld [vmem:[#allocation9 + $0x184] ss:$8 sps:$4 sm:$0xff]  }
 0x46a   :  { %8497 = vmatprep.subr.bf16.mxu1 %v11829_v44  ;;  %v11935_v44 = vld [vmem:[#allocation9 + $0x180] ss:$8 sps:$4 sm:$0xff]  }
 0x46d   :  { %8498 = vmatpush1.bf16.msra.mxu1 %v11827_v27  ;;  %v11940_v27 = vld [vmem:[#allocation9 + $0x194] ss:$8 sps:$4 sm:$0xff]  }
 0x46e   :  { %8499 = vmatprep.subr.bf16.mxu1 %v11832_v46  ;;  %v11938_v46 = vld [vmem:[#allocation9 + $0x190] ss:$8 sps:$4 sm:$0xff]  }
 0x471   :  { %8500 = vmatpush1.bf16.msra.mxu1 %v11830_v37  ;;  %v11943_v37 = vld [vmem:[#allocation9 + $0x1a4] ss:$8 sps:$4 sm:$0xff]  }
 0x472   :  { %8501 = vmatprep.subr.bf16.mxu1 %v11835_v17  ;;  %v11941_v17 = vld [vmem:[#allocation9 + $0x1a0] ss:$8 sps:$4 sm:$0xff]  }
 0x475   :  { %8502 = vmatpush1.bf16.msra.mxu1 %v11833_v56  ;;  %v11946_v56 = vld [vmem:[#allocation9 + $0x1b4] ss:$8 sps:$4 sm:$0xff]  }
 0x476   :  { %8503 = vmatprep.subr.bf16.mxu1 %v11838_v62  ;;  %v11944_v62 = vld [vmem:[#allocation9 + $0x1b0] ss:$8 sps:$4 sm:$0xff]  }
 0x479   :  { %8504 = vmatpush1.bf16.msra.mxu1 %v11836_v22  ;;  %v11952_v22 = vld [vmem:[#allocation9 + $0x1d4] ss:$8 sps:$4 sm:$0xff]  }
 0x47a   :  { %8505 = vmatprep.subr.bf16.mxu1 %v11841_v4  ;;  %v11950_v4 = vld [vmem:[#allocation9 + $0x1d0] ss:$8 sps:$4 sm:$0xff]  }
 0x47d   :  { %8506 = vmatpush1.bf16.msra.mxu1 %v11839_v50  ;;  %v11958_v50 = vld [vmem:[#allocation9 + $0x1f4] ss:$8 sps:$4 sm:$0xff]  }
 0x47e   :  { %8507 = vmatprep.subr.bf16.mxu1 %v11844_v57  ;;  %v11956_v57 = vld [vmem:[#allocation9 + $0x1f0] ss:$8 sps:$4 sm:$0xff]  }
 0x481   :  { %8508 = vmatpush1.bf16.msra.mxu1 %v11842_v59  ;;  %v1976_v59 = vsub.s32 2, %v12999_v19 }
 0x482   :  { %8509 = vmatprep.subr.bf16.mxu1 %v11847_v63 }
 0x483   :  { %v1977_v63 = vrot.slane %v13002_v6, %v1976_v59 }
 0x485   :  { %8510 = vmatpush1.bf16.msra.mxu1 %v11845_v39  ;;  %v1981_v39 = vrot.slane %v13002_v6, %v1980_v1 }
 0x486   :  { %8511 = vmatprep.subr.bf16.mxu1 %v11850_v49 }
 0x489   :  { %8512 = vmatpush1.bf16.msra.mxu1 %v11848_v0 }
 0x48a   :  { %8513 = vmatprep.subr.bf16.mxu1 %v11853_v42 }
 0x48d   :  { %8514 = vmatpush1.bf16.msra.mxu1 %v11851_v31 }
 0x48e   :  { %8515 = vmatprep.subr.bf16.mxu1 %v11856_v61 }
 0x491   :  { %8516 = vmatpush1.bf16.msra.mxu1 %v11854_v9 }
 0x492   :  { %8517 = vmatprep.subr.bf16.mxu1 %v11859_v2 }
 0x495   :  { %8518 = vmatpush1.bf16.msra.mxu1 %v11857_v55 }
 0x496   :  { %8519 = vmatprep.subr.bf16.mxu1 %v11862_v24 }
 0x499   :  { %8520 = vmatpush1.bf16.msra.mxu1 %v11860_v41 }
 0x49c   :  { %8522 = vmatmul.mubr.bf16.vlgmr.msra.gmra.mrb[4].mxu1 %v12992_v35  ;;  %v7255_v35 = vadd.f32 %v12383_v45, %v1973_v23  ;;  %v11917_v45 = vld [vmem:[#allocation9 + $0x120] ss:$8 sps:$4 sm:$0xff]   ;;  %v8611_v23 = vrot.slane %v8602_v14, %v1972_v20 }
 0x4f1   :  { %v7867_v34 = vpop.f32.mrb[0].mxu0 }
 0x4f2   :  { %v10188_v60 = vadd.f32 %v7867_v34, %v7253_v10  ;;  %v7869_v32 = vpop.f32.mrb[1].mxu0 }
 0x4f3   :  { %v10190_v15 = vadd.f32 %v7869_v32, %v7255_v35  ;;  %v7871_v16 = vpop.f32.mrb[2].mxu0 }
 0x4f4   :  { %v8530_v3 = vmax.f32 %v10188_v60, 0.0  ;;  %v7872_v18 = vpop.f32.mrb[3].mxu0 }
 0x4f5   :  { %v8531_v12 = vmax.f32 %v10190_v15, 0.0 }
 0x4f6   :  { %v8534_v21 = vpack.c.bf16 %v8530_v3, %v8530_v3 }
 0x4f7   :  { %v8535_v25 = vpack.c.bf16 %v8531_v12, %v8531_v12 }
 0x4f9   :  { %8966 = vmatprep.mubr.bf16.mxu0 %v8535_v25 }
 0x4fa   :  { %8967 = vmatmul.mubr.bf16.vlgmr.msra.gmra.mrb[4].mxu0 %v8534_v21 }
 0x4fb   :  { %8976 = vmatpush1.bf16.msra.mxu0 %v11911_v33 }
 0x4fc   :  { %8977 = vmatprep.subr.bf16.mxu0 %v11916_v29 }
 0x4ff   :  { %8978 = vmatpush1.bf16.msra.mxu0 %v11914_v40 }
 0x500   :  { %8979 = vmatprep.subr.bf16.mxu0 %v11919_v7 }
 0x503   :  { %8980 = vmatpush1.bf16.msra.mxu0 %v11917_v45 }
 0x504   :  { %8981 = vmatprep.subr.bf16.mxu0 %v11922_v38 }
 0x507   :  { %8982 = vmatpush1.bf16.msra.mxu0 %v11920_v30 }
 0x508   :  { %8983 = vmatprep.subr.bf16.mxu0 %v11925_v48 }
 0x50b   :  { %8984 = vmatpush1.bf16.msra.mxu0 %v11923_v11 }
 0x50c   :  { %8985 = vmatprep.subr.bf16.mxu0 %v11928_v47 }
 0x50f   :  { %8986 = vmatpush1.bf16.msra.mxu0 %v11926_v5 }
 0x510   :  { %8987 = vmatprep.subr.bf16.mxu0 %v11931_v26 }
 0x513   :  { %8988 = vmatpush1.bf16.msra.mxu0 %v11929_v36 }
 0x514   :  { %8989 = vmatprep.subr.bf16.mxu0 %v11934_v28 }
 0x517   :  { %8990 = vmatpush1.bf16.msra.mxu0 %v11932_v51 }
 0x518   :  { %8991 = vmatprep.subr.bf16.mxu0 %v11937_v52 }
 0x51b   :  { %8992 = vmatpush1.bf16.msra.mxu0 %v11935_v44 }
 0x51c   :  { %8993 = vmatprep.subr.bf16.mxu0 %v11940_v27 }
 0x51f   :  { %8994 = vmatpush1.bf16.msra.mxu0 %v11938_v46 }
 0x520   :  { %8995 = vmatprep.subr.bf16.mxu0 %v11943_v37 }
 0x523   :  { %8996 = vmatpush1.bf16.msra.mxu0 %v11941_v17 }
 0x524   :  { %8997 = vmatprep.subr.bf16.mxu0 %v11946_v56 }
 0x527   :  { %8998 = vmatpush1.bf16.msra.mxu0 %v11944_v62 }
 0x528   :  { %8999 = vmatprep.subr.bf16.mxu0 %v11949_v54 }
 0x52b   :  { %9000 = vmatpush1.bf16.msra.mxu0 %v11947_v53 }
 0x52c   :  { %9001 = vmatprep.subr.bf16.mxu0 %v11952_v22 }
 0x52f   :  { %9002 = vmatpush1.bf16.msra.mxu0 %v11950_v4 }
 0x530   :  { %9003 = vmatprep.subr.bf16.mxu0 %v11955_v8 }
 0x533   :  { %9004 = vmatpush1.bf16.msra.mxu0 %v11953_v43 }
 0x534   :  { %9005 = vmatprep.subr.bf16.mxu0 %v11958_v50 }
 0x537   :  { %9006 = vmatpush1.bf16.msra.mxu0 %v11956_v57 }
 0x56f   :  { %v8523_v49 = vpop.f32.mrb[4].mxu1 }
 0x570   :  { %v10191_v0 = vadd.f32 %v8523_v49, %v1977_v63  ;;  %v8525_v42 = vpop.f32.mrb[5].mxu1 }
 0x571   :  { %v10192_v31 = vadd.f32 %v8525_v42, %v1981_v39  ;;  %v8527_v61 = vpop.f32.mrb[6].mxu1 }
 0x572   :  { %v8532_v9 = vmax.f32 %v10191_v0, 0.0  ;;  %v8528_v2 = vpop.f32.mrb[7].mxu1 }
 0x573   :  { %v8533_v55 = vmax.f32 %v10192_v31, 0.0 }
 0x574   :  { %v8536_v41 = vpack.c.bf16 %v8532_v9, %v8532_v9 }
 0x575   :  { %v8537_v24 = vpack.c.bf16 %v8533_v55, %v8533_v55 }
 0x577   :  { %9007 = vmatprep.mubr.bf16.mxu0 %v8537_v24 }
 0x578   :  { %9008 = vmatmul.mubr.bf16.vlgmr.msra.gmra.mrb[4].mxu0 %v8536_v41 }
 0x64b   :  { %v9009_v6 = vpop.f32.mrb[4].mxu0 }
 0x64c   :  { %v10193_v10 = vadd.f32 %v9009_v6, %v8607_v58  ;;  %v9011_v35 = vpop.f32.mrb[5].mxu0 }
 0x64d   :  { %v10194_v34 = vadd.f32 %v9011_v35, %v8611_v23  ;;  %v9013_v60 = vpop.f32.mrb[6].mxu0 }
 0x64e   :  { %9016 = vst [vmem:[#allocation12] sm:$0xff] %v10193_v10  ;;  %v9014_v32 = vpop.f32.mrb[7].mxu0 }
 0x64f   :  { %9017 = vst [vmem:[#allocation12 + $0x8] sm:$0xff] %v10194_v34 }
 0x650   :  { %12208 = shalt.err (!%p12205_p2)
}
 0x651   :  { %s12209_s7 = scalar_lea.hbm %s13038_s5, 256 }
 0x652   :  { %p12210_p3 = scmp.ne.s32.totalorder %s13038_s5, %s12209_s7  ;;  %p12213_p4 = scmp.lt.u32.totalorder %s12209_s7, %s13038_s5 }
 0x654   :  { %p12215_p5 = pnand %p12213_p4, %p12210_p3 }
 0x656   :  { %12218 = shalt.err (!%p12215_p5)
}
 0x657   :  { %9027 = dma.vmem_to_hbm [thread:$0]  %s9025_s29, 256, %s13038_s5, [#allocation5]  }
 0x658   :  { %12225 = dma.done.wait [#allocation5], 256  }
 0x659   :  { %12226 = vsyncadd [#allocation5], 4294967040 }
 0x65a   :  { %9031 = vsyncpa [#allocation4], 1 }
 0x65b   :  { %9032 = vsyncpa [#allocation7], 1 }
 0x65c   :  { %9033 = vsyncpa [#allocation10], 1 }
 0x65d   :  { %9034 = vsyncpa [#allocation5], 1 }

</bundles_post_ra>
